<compile_context>
chip_gen: v7x
topology: tpu7x:2x2x1
jax: 0.10.0
libtpu: 0.0.40
codegen_flags: <defaults>
</compile_context>

<pallas_src>
import functools

import jax
import jax.numpy as jnp
from jax.experimental import pallas as pl
from jax.experimental.pallas import tpu as pltpu


# ---------------------------------------------------------------------------
# Hardware-aware knobs
# ---------------------------------------------------------------------------

@functools.lru_cache(maxsize=None)
def _vmem_limit_bytes():
    """Scoped-VMEM request with headroom (v7x has only 64 MiB physical)."""
    try:
        cap = int(pltpu.get_tpu_info().vmem_capacity_bytes)
    except Exception:
        cap = 64 * 1024 * 1024
    # 3/4 of physical, capped at 100 MiB, floored at 32 MiB:
    #   v5e/v6e (128 MiB) -> 96 MiB, v7x (64 MiB) -> 48 MiB.
    return max(32 * 1024 * 1024, min((cap * 3) // 4, 100 * 1024 * 1024))


@functools.lru_cache(maxsize=None)
def _num_parallel_cores():
    """2 on v7x (megacore sharding of 'parallel' grid axes), else 1."""
    try:
        kind = jax.devices()[0].device_kind.lower()
        return 2 if "7" in kind else 1
    except Exception:
        return 2   # conservative: keeping >=2 M tiles is harmless on 1-TC chips


def _cparams(dims):
    return pltpu.CompilerParams(dimension_semantics=dims,
                                vmem_limit_bytes=_vmem_limit_bytes())


def _tile(dim, pref, quantum):
    """Largest tile <= pref that divides dim and is a multiple of quantum;
    falls back to the full dim (a full-extent block is always legal)."""
    if dim <= pref:
        return dim
    t = (pref // quantum) * quantum
    while t >= quantum:
        if dim % t == 0:
            return t
        t -= quantum
    return dim


def _m_tile(M, pref, quantum=16):
    """M ('parallel') tile: as big as possible, but keep >= num_cores tiles so
    v7x's 2 TensorCores both get work."""
    t = _tile(M, pref, quantum)
    cores = _num_parallel_cores()
    if cores > 1 and M // t < cores and M > quantum:
        smaller = _tile(M, max(quantum, M // cores), quantum)
        if M // smaller >= cores:
            t = smaller
    return t


# ---------------------------------------------------------------------------
# Fused SumGCNEncoder layer kernel
# ---------------------------------------------------------------------------

def _sum_gcn_layer_kernel(sup_ref, h_ref, w_ref, x0_ref, wl_ref, out_ref,
                          acc_ref, *, num_support, addloop):
    """out[i] = relu( sum_{s,k} A[s,i,k] @ (H_other[k] @ W[s]) + X0[i] @ W_loops ).

    grid = (M tiles [parallel], K tiles [arbitrary, last]).  The f32 VMEM
    scratch acc is initialised with the self-loop term at k == 0, accumulates
    the per-k-tile support matmuls (XW_k is built on the fly from the H_other
    k-slice), and relu + bf16 store happens once at the last k step.
    """
    k = pl.program_id(1)
    nk = pl.num_programs(1)

    @pl.when(k == 0)
    def _init():
        if addloop:
            acc_ref[...] = jnp.dot(x0_ref[...], wl_ref[...],
                                   preferred_element_type=jnp.float32)
        else:
            acc_ref[...] = jnp.zeros(acc_ref.shape, acc_ref.dtype)

    h = h_ref[...]                          # (tk, Din) bf16, this K slice
    acc = acc_ref[...]
    for s in range(num_support):            # num_support ~ 2 -> unrolled
        xw = jnp.dot(h, w_ref[s],
                     preferred_element_type=jnp.float32).astype(jnp.bfloat16)
        acc = acc + jnp.dot(sup_ref[s], xw,
                            preferred_element_type=jnp.float32)
    acc_ref[...] = acc

    @pl.when(k == nk - 1)
    def _finalize():
        # relu folded into the single bf16 store; uses the register value so
        # there is no extra VMEM round-trip through acc_ref.
        out_ref[...] = jnp.maximum(acc, 0.0).astype(out_ref.dtype)


def sum_gcn_layer(supports, h_other, w, x0, w_loop, *, addloop=True,
                  tm=512, tk=512, compute_dtype=jnp.bfloat16):
    """One aggregation side of one SumGCNEncoder layer.

    supports : [num_support, M, K]   dense normalized adjacency
    h_other  : [K, Din]              opposite-side hidden features
    w        : [num_support, Din, Dout]
    x0       : [M, Din0]             original inputs (self-loop term)
    w_loop   : [Din0, Dout]
    returns  : [M, Dout] bfloat16 (all consumers cast to bf16 anyway)
    """
    num_support, M, K = supports.shape
    Din = h_other.shape[1]
    Dout = w.shape[2]
    Din0 = x0.shape[1]

    sup_c = supports.astype(compute_dtype)
    h_c = h_other.astype(compute_dtype)
    w_c = w.astype(compute_dtype)
    x0_c = x0.astype(compute_dtype)
    wl_c = w_loop.astype(compute_dtype)

    tm_ = _m_tile(M, tm, 16)       # bf16 sublane quantum = 16
    tk_ = _tile(K, tk, 128)        # lane quantum = 128
    m_tiles = M // tm_
    k_tiles = K // tk_

    flops = int(2 * num_support * M * K * Dout                      # A @ XW
                + 2 * num_support * K * Din * Dout * m_tiles        # XW build
                + (2 * M * Din0 * Dout if addloop else 0))          # self loop
    bytes_accessed = int(
        (sup_c.size + h_c.size * m_tiles + w_c.size + x0_c.size + wl_c.size) * 2
        + M * Dout * 2)

    return pl.pallas_call(
        functools.partial(_sum_gcn_layer_kernel, num_support=num_support,
                          addloop=addloop),
        out_shape=jax.ShapeDtypeStruct((M, Dout), compute_dtype),
        grid_spec=pltpu.PrefetchScalarGridSpec(
            num_scalar_prefetch=0,
            grid=(m_tiles, k_tiles),           # reduction (K) axis last
            in_specs=[
                pl.BlockSpec((num_support, tm_, tk_), lambda i, k: (0, i, k)),
                pl.BlockSpec((tk_, Din), lambda i, k: (k, 0)),
                pl.BlockSpec((num_support, Din, Dout), lambda i, k: (0, 0, 0)),
                pl.BlockSpec((tm_, Din0), lambda i, k: (i, 0)),
                pl.BlockSpec((Din0, Dout), lambda i, k: (0, 0)),
            ],
            out_specs=pl.BlockSpec((tm_, Dout), lambda i, k: (i, 0)),
            scratch_shapes=[pltpu.VMEM((tm_, Dout), jnp.float32)],
        ),
        compiler_params=_cparams(("parallel", "arbitrary")),
        cost_estimate=pl.CostEstimate(flops=flops, transcendentals=0,
                                      bytes_accessed=bytes_accessed),
    )(sup_c, h_c, w_c, x0_c, wl_c)


# ---------------------------------------------------------------------------
# FullyConnected (dense2) and Decoder kernels
# ---------------------------------------------------------------------------

def _linear_kernel(x_ref, w_ref, out_ref):
    out_ref[...] = jnp.dot(x_ref[...], w_ref[...],
                           preferred_element_type=jnp.float32
                           ).astype(out_ref.dtype)


def linear(x, w, *, tm=512, out_dtype=jnp.bfloat16):
    """y = x @ w (nn.Linear, no bias, identity activation). bf16 MXU operands."""
    M, Din = x.shape
    Dout = w.shape[1]
    x_c = x.astype(jnp.bfloat16)
    w_c = w.astype(jnp.bfloat16)
    tm_ = _tile(M, tm, 16)
    return pl.pallas_call(
        _linear_kernel,
        out_shape=jax.ShapeDtypeStruct((M, Dout), out_dtype),
        grid_spec=pltpu.PrefetchScalarGridSpec(
            num_scalar_prefetch=0,
            grid=(M // tm_,),
            in_specs=[pl.BlockSpec((tm_, Din), lambda i: (i, 0)),
                      pl.BlockSpec((Din, Dout), lambda i: (0, 0))],
            out_specs=pl.BlockSpec((tm_, Dout), lambda i: (i, 0)),
        ),
        compiler_params=_cparams(("parallel",)),
    )(x_c, w_c)


def _decoder_kernel(r_ref, p_ref, wc_ref, out_ref):
    rp = r_ref[...] * p_ref[...]                       # bf16 elementwise
    out_ref[...] = jnp.dot(rp, wc_ref[...],
                           preferred_element_type=jnp.float32
                           ).astype(out_ref.dtype)


def decoder_score(r_e, p_e, w_comb, *, te=512):
    """Per-edge class logits: (r*p) @ (w_relation^T @ weight_classifier)."""
    E, D = r_e.shape
    C = w_comb.shape[1]
    te_ = _tile(E, te, 16)
    return pl.pallas_call(
        _decoder_kernel,
        out_shape=jax.ShapeDtypeStruct((E, C), jnp.float32),
        grid_spec=pltpu.PrefetchScalarGridSpec(
            num_scalar_prefetch=0,
            grid=(E // te_,),
            in_specs=[
                pl.BlockSpec((te_, D), lambda i: (i, 0)),
                pl.BlockSpec((te_, D), lambda i: (i, 0)),
                pl.BlockSpec((D, C), lambda i: (0, 0)),
            ],
            out_specs=pl.BlockSpec((te_, C), lambda i: (i, 0)),
        ),
        compiler_params=_cparams(("parallel",)),
    )(r_e.astype(jnp.bfloat16), p_e.astype(jnp.bfloat16),
      w_comb.astype(jnp.bfloat16))


# ---------------------------------------------------------------------------
# Full forward pass
# ---------------------------------------------------------------------------

def graph_matrix_completion_forward(params, rna_supports, protein_supports,
                                    rna_inputs, protein_inputs,
                                    rna_edge_idx, protein_edge_idx):
    # --- SumGCNEncoder (addloop=True; nn.Dropout = identity in eval mode) ---
    h_rna, h_prot = rna_inputs, protein_inputs
    w_loops = params["enc"]["W_loops"]
    for w_l in params["enc"]["weights"]:
        # RNA side aggregates protein features and vice-versa; the self-loop
        # term uses the ORIGINAL inputs with the shared W_loops (exactly as
        # the PyTorch SumGCNEncoder.forward does every layer).
        new_rna = sum_gcn_layer(rna_supports, h_prot, w_l, rna_inputs,
                                w_loops, addloop=True)
        new_prot = sum_gcn_layer(protein_supports, h_rna, w_l, protein_inputs,
                                 w_loops, addloop=True)
        h_rna, h_prot = new_rna, new_prot

    # --- dense2: FullyConnected, identity activation, no bias ---------------
    rna_embed = linear(h_rna, params["dense2"]["w_rna"])
    prot_embed = linear(h_prot, params["dense2"]["w_prot"])

    # --- Decoder -------------------------------------------------------------
    # Fold the two linear maps (identity activation in between) into one:
    #   ((r*p) @ w_rel^T) @ w_cls  ==  (r*p) @ (w_rel^T @ w_cls)
    w_comb = jnp.matmul(params["dec"]["w_relation"].T,
                        params["dec"]["weight_classifier"])
    # TODO(synk): the per-edge row gather stays as jnp.take in the wrapper; for
    # very large edge counts it could be fused via PrefetchScalarGridSpec +
    # pl.Element row gather, negligible at E = O(100).
    r_e = jnp.take(rna_embed, rna_edge_idx, axis=0)
    p_e = jnp.take(prot_embed, protein_edge_idx, axis=0)
    return decoder_score(r_e, p_e, w_comb)


# ---------------------------------------------------------------------------
# Pure-JAX reference (mirrors the kernels' bf16-operand / f32-accum recipe)
# ---------------------------------------------------------------------------

def reference_forward(params, rna_supports, protein_supports,
                      rna_inputs, protein_inputs,
                      rna_edge_idx, protein_edge_idx):
    bf16, f32 = jnp.bfloat16, jnp.float32
    sup_r = rna_supports.astype(bf16)
    sup_p = protein_supports.astype(bf16)
    x_r = rna_inputs.astype(bf16)
    x_p = protein_inputs.astype(bf16)
    wloop = params["enc"]["W_loops"].astype(bf16)

    h_r, h_p = x_r, x_p
    for w_l in params["enc"]["weights"]:
        w16 = w_l.astype(bf16)
        acc_r = jnp.dot(x_r, wloop, preferred_element_type=f32)
        acc_p = jnp.dot(x_p, wloop, preferred_element_type=f32)
        for i in range(w_l.shape[0]):
            xw_r = jnp.dot(h_r, w16[i], preferred_element_type=f32).astype(bf16)
            xw_p = jnp.dot(h_p, w16[i], preferred_element_type=f32).astype(bf16)
            acc_r = acc_r + jnp.dot(sup_r[i], xw_p, preferred_element_type=f32)
            acc_p = acc_p + jnp.dot(sup_p[i], xw_r, preferred_element_type=f32)
        h_r = jnp.maximum(acc_r, 0.0).astype(bf16)
        h_p = jnp.maximum(acc_p, 0.0).astype(bf16)

    r_emb = jnp.dot(h_r, params["dense2"]["w_rna"].astype(bf16),
                    preferred_element_type=f32).astype(bf16)
    p_emb = jnp.dot(h_p, params["dense2"]["w_prot"].astype(bf16),
                    preferred_element_type=f32).astype(bf16)
    r_e = r_emb[rna_edge_idx]
    p_e = p_emb[protein_edge_idx]
    w_comb = jnp.matmul(params["dec"]["w_relation"].T,
                        params["dec"]["weight_classifier"]).astype(bf16)
    return jnp.dot(r_e * p_e, w_comb, preferred_element_type=f32)


# ---------------------------------------------------------------------------
# Synthetic parameter init (kaiming-uniform-style, not a checkpoint)
# ---------------------------------------------------------------------------

def init_params(key, *, input_dim, gcn_hidden_dim, encode_hidden_dim,
                num_support, num_classes, num_basis, layers):
    assert num_basis == num_classes, (
        "The Decoder's basis_outputs @ weight_classifier matmul requires "
        "num_basis == num_classes (as with the module defaults 2, 2).")
    keys = jax.random.split(key, layers + 5)

    def u(k, shape, fan_in):
        b = (6.0 / fan_in) ** 0.5
        return jax.random.uniform(k, shape, minval=-b, maxval=b,
                                  dtype=jnp.float32)

    weights = []
    d_in = input_dim
    for l in range(layers):
        weights.append(u(keys[l], (num_support, d_in, gcn_hidden_dim), d_in))
        d_in = gcn_hidden_dim
    enc = {"weights": weights,
           "W_loops": u(keys[layers], (input_dim, gcn_hidden_dim), input_dim)}
    dense2 = {
        "w_rna": u(keys[layers + 1], (gcn_hidden_dim, encode_hidden_dim),
                   gcn_hidden_dim),
        "w_prot": u(keys[layers + 2], (gcn_hidden_dim, encode_hidden_dim),
                    gcn_hidden_dim),
    }
    dec = {
        "w_relation": u(keys[layers + 3], (num_classes, encode_hidden_dim),
                        encode_hidden_dim),
        "weight_classifier": u(keys[layers + 4], (num_basis, num_classes),
                               num_basis),
    }
    return {"enc": enc, "dense2": dense2, "dec": dec}


if __name__ == "__main__":
    # Small but hardware-friendly shapes: feature dims 128 (lane-dense),
    # node counts multiples of 16/128 so M/K tiling is exercised.
    N_RNA, N_PROT = 256, 384
    INPUT_DIM = 128
    GCN_HIDDEN = 128
    ENCODE_HIDDEN = 128
    NUM_SUPPORT = 2
    NUM_CLASSES = NUM_BASIS = 2
    LAYERS = 2
    NUM_EDGES = 128

    key = jax.random.PRNGKey(0)
    k_sr, k_sp, k_xr, k_xp, k_er, k_ep, k_par = jax.random.split(key, 7)

    # Dense stand-ins for the normalized sparse adjacency matrices.
    rna_supports = (jax.random.uniform(
        k_sr, (NUM_SUPPORT, N_RNA, N_PROT), dtype=jnp.float32) / N_PROT)
    protein_supports = (jax.random.uniform(
        k_sp, (NUM_SUPPORT, N_PROT, N_RNA), dtype=jnp.float32) / N_RNA)

    rna_inputs = jax.random.normal(k_xr, (N_RNA, INPUT_DIM), dtype=jnp.float32)
    protein_inputs = jax.random.normal(k_xp, (N_PROT, INPUT_DIM),
                                       dtype=jnp.float32)
    rna_edge_idx = jax.random.randint(k_er, (NUM_EDGES,), 0, N_RNA)
    protein_edge_idx = jax.random.randint(k_ep, (NUM_EDGES,), 0, N_PROT)

    params = init_params(k_par, input_dim=INPUT_DIM,
                         gcn_hidden_dim=GCN_HIDDEN,
                         encode_hidden_dim=ENCODE_HIDDEN,
                         num_support=NUM_SUPPORT, num_classes=NUM_CLASSES,
                         num_basis=NUM_BASIS, layers=LAYERS)

    fwd = jax.jit(graph_matrix_completion_forward)
    logits = fwd(params, rna_supports, protein_supports, rna_inputs,
                 protein_inputs, rna_edge_idx, protein_edge_idx)
    jax.block_until_ready(logits)

    ref = reference_forward(params, rna_supports, protein_supports,
                            rna_inputs, protein_inputs,
                            rna_edge_idx, protein_edge_idx)

    assert logits.shape == (NUM_EDGES, NUM_CLASSES)
    assert jnp.allclose(logits, ref, rtol=2e-2, atol=2e-2), (
        "max abs diff = %f" % float(jnp.max(jnp.abs(logits - ref))))

    print("KERNEL_OK")
</pallas_src>

<mosaic_0001>
module attributes {stable_mosaic.version = 11 : i64} {
  func.func @_sum_gcn_layer_kernel(%arg0: i32, %arg1: i32, %arg2: memref<2x384x256xbf16, #tpu.memory_space<vmem>>, %arg3: memref<256x128xbf16, #tpu.memory_space<vmem>>, %arg4: memref<2x128x128xbf16, #tpu.memory_space<vmem>>, %arg5: memref<384x128xbf16, #tpu.memory_space<vmem>>, %arg6: memref<128x128xbf16, #tpu.memory_space<vmem>>, %arg7: memref<384x128xbf16, #tpu.memory_space<vmem>>, %arg8: memref<384x128xf32, #tpu.memory_space<vmem>>) attributes {dimension_semantics = [#tpu.dimension_semantics<parallel>, #tpu.dimension_semantics<arbitrary>], iteration_bounds = array<i64: 1, 1>, scalar_prefetch = 0 : i64, scratch_operands = 1 : i64, tpu.core_type = #tpu.core_type<tc>, window_params = [{transform_indices = @transform_0, window_bounds = array<i64: 2, 384, 256>}, {transform_indices = @transform_1, window_bounds = array<i64: 256, 128>}, {pipeline_mode = #tpu.pipeline_mode<synchronous>, transform_indices = @transform_2, window_bounds = array<i64: 2, 128, 128>}, {transform_indices = @transform_3, window_bounds = array<i64: 384, 128>}, {pipeline_mode = #tpu.pipeline_mode<synchronous>, transform_indices = @transform_4, window_bounds = array<i64: 128, 128>}, {transform_indices = @transform_5, window_bounds = array<i64: 384, 128>}]} {
    %c0_i32 = arith.constant 0 : i32
    %0 = arith.cmpi eq, %arg1, %c0_i32 : i32
    %1 = arith.extui %0 : i1 to i32
    %c0_i32_0 = arith.constant 0 : i32
    %2 = arith.cmpi ne, %1, %c0_i32_0 : i32
    scf.if %2 {
      %c0_22 = arith.constant 0 : index
      %c0_23 = arith.constant 0 : index
      %25 = vector.load %arg5[%c0_22, %c0_23] : memref<384x128xbf16, #tpu.memory_space<vmem>>, vector<384x128xbf16>
      %c0_24 = arith.constant 0 : index
      %c0_25 = arith.constant 0 : index
      %26 = vector.load %arg6[%c0_24, %c0_25] : memref<128x128xbf16, #tpu.memory_space<vmem>>, vector<128x128xbf16>
      %cst_26 = arith.constant dense<0.000000e+00> : vector<384x128xf32>
      %27 = tpu.matmul %25, %26, %cst_26 {dimension_numbers = #tpu.dot_dimension_numbers<[1], [0], [0], [1], [0, 0, 1, 1], [], []>} : vector<384x128xbf16>, vector<128x128xbf16>, vector<384x128xf32> -> vector<384x128xf32>
      %c0_27 = arith.constant 0 : index
      %c0_28 = arith.constant 0 : index
      %28 = vector.load %arg8[%c0_27, %c0_28] : memref<384x128xf32, #tpu.memory_space<vmem>>, vector<384x128xf32>
      tpu.vector_store %arg8[%c0_27, %c0_28], %27 {strides = array<i32>} : memref<384x128xf32, #tpu.memory_space<vmem>>, vector<384x128xf32>,
    } else {
    }
    %c0 = arith.constant 0 : index
    %c0_1 = arith.constant 0 : index
    %3 = vector.load %arg3[%c0, %c0_1] : memref<256x128xbf16, #tpu.memory_space<vmem>>, vector<256x128xbf16>
    %c0_2 = arith.constant 0 : index
    %c0_3 = arith.constant 0 : index
    %4 = vector.load %arg8[%c0_2, %c0_3] : memref<384x128xf32, #tpu.memory_space<vmem>>, vector<384x128xf32>
    %c0_4 = arith.constant 0 : index
    %c0_5 = arith.constant 0 : index
    %c0_6 = arith.constant 0 : index
    %5 = vector.load %arg4[%c0_4, %c0_5, %c0_6] : memref<2x128x128xbf16, #tpu.memory_space<vmem>>, vector<1x128x128xbf16>
    %6 = vector.shape_cast %5 : vector<1x128x128xbf16> to vector<128x128xbf16>
    %cst = arith.constant dense<0.000000e+00> : vector<256x128xf32>
    %7 = tpu.matmul %3, %6, %cst {dimension_numbers = #tpu.dot_dimension_numbers<[1], [0], [0], [1], [0, 0, 1, 1], [], []>} : vector<256x128xbf16>, vector<128x128xbf16>, vector<256x128xf32> -> vector<256x128xf32>
    %8 = arith.truncf %7 : vector<256x128xf32> to vector<256x128xbf16>
    %c0_7 = arith.constant 0 : index
    %c0_8 = arith.constant 0 : index
    %c0_9 = arith.constant 0 : index
    %9 = vector.load %arg2[%c0_7, %c0_8, %c0_9] : memref<2x384x256xbf16, #tpu.memory_space<vmem>>, vector<1x384x256xbf16>
    %10 = vector.shape_cast %9 : vector<1x384x256xbf16> to vector<384x256xbf16>
    %cst_10 = arith.constant dense<0.000000e+00> : vector<384x128xf32>
    %11 = tpu.matmul %10, %8, %cst_10 {dimension_numbers = #tpu.dot_dimension_numbers<[1], [0], [0], [1], [0, 0, 1, 1], [], []>} : vector<384x256xbf16>, vector<256x128xbf16>, vector<384x128xf32> -> vector<384x128xf32>
    %12 = arith.addf %4, %11 : vector<384x128xf32>
    %c1 = arith.constant 1 : index
    %c0_11 = arith.constant 0 : index
    %c0_12 = arith.constant 0 : index
    %13 = vector.load %arg4[%c1, %c0_11, %c0_12] : memref<2x128x128xbf16, #tpu.memory_space<vmem>>, vector<1x128x128xbf16>
    %14 = vector.shape_cast %13 : vector<1x128x128xbf16> to vector<128x128xbf16>
    %cst_13 = arith.constant dense<0.000000e+00> : vector<256x128xf32>
    %15 = tpu.matmul %3, %14, %cst_13 {dimension_numbers = #tpu.dot_dimension_numbers<[1], [0], [0], [1], [0, 0, 1, 1], [], []>} : vector<256x128xbf16>, vector<128x128xbf16>, vector<256x128xf32> -> vector<256x128xf32>
    %16 = arith.truncf %15 : vector<256x128xf32> to vector<256x128xbf16>
    %c1_14 = arith.constant 1 : index
    %c0_15 = arith.constant 0 : index
    %c0_16 = arith.constant 0 : index
    %17 = vector.load %arg2[%c1_14, %c0_15, %c0_16] : memref<2x384x256xbf16, #tpu.memory_space<vmem>>, vector<1x384x256xbf16>
    %18 = vector.shape_cast %17 : vector<1x384x256xbf16> to vector<384x256xbf16>
    %cst_17 = arith.constant dense<0.000000e+00> : vector<384x128xf32>
    %19 = tpu.matmul %18, %16, %cst_17 {dimension_numbers = #tpu.dot_dimension_numbers<[1], [0], [0], [1], [0, 0, 1, 1], [], []>} : vector<384x256xbf16>, vector<256x128xbf16>, vector<384x128xf32> -> vector<384x128xf32>
    %20 = arith.addf %12, %19 : vector<384x128xf32>
    %c0_18 = arith.constant 0 : index
    %c0_19 = arith.constant 0 : index
    %21 = vector.load %arg8[%c0_18, %c0_19] : memref<384x128xf32, #tpu.memory_space<vmem>>, vector<384x128xf32>
    tpu.vector_store %arg8[%c0_18, %c0_19], %20 {strides = array<i32>} : memref<384x128xf32, #tpu.memory_space<vmem>>, vector<384x128xf32>,
    %c0_i32_20 = arith.constant 0 : i32
    %22 = arith.cmpi eq, %arg1, %c0_i32_20 : i32
    %23 = arith.extui %22 : i1 to i32
    %c0_i32_21 = arith.constant 0 : i32
    %24 = arith.cmpi ne, %23, %c0_i32_21 : i32
    scf.if %24 {
      %cst_22 = arith.constant 0.000000e+00 : f32
      %25 = vector.broadcast %cst_22 : f32 to vector<384x128xf32>
      %26 = arith.maximumf %20, %25 : vector<384x128xf32>
      %27 = arith.truncf %26 : vector<384x128xf32> to vector<384x128xbf16>
      %c0_23 = arith.constant 0 : index
      %c0_24 = arith.constant 0 : index
      %28 = vector.load %arg7[%c0_23, %c0_24] : memref<384x128xbf16, #tpu.memory_space<vmem>>, vector<384x128xbf16>
      tpu.vector_store %arg7[%c0_23, %c0_24], %27 {strides = array<i32>} : memref<384x128xbf16, #tpu.memory_space<vmem>>, vector<384x128xbf16>,
    } else {
    }
    return
  }
  func.func @transform_0(%arg0: i32, %arg1: i32) -> (i32, i32, i32) {
    %c0_i32 = arith.constant 0 : i32
    %c0_i32_0 = arith.constant 0 : i32
    return %c0_i32, %arg0, %arg1 : i32, i32, i32
  }
  func.func @transform_1(%arg0: i32, %arg1: i32) -> (i32, i32) {
    %c0_i32 = arith.constant 0 : i32
    %c0_i32_0 = arith.constant 0 : i32
    return %arg1, %c0_i32 : i32, i32
  }
  func.func @transform_2(%arg0: i32, %arg1: i32) -> (i32, i32, i32) {
    %c0_i32 = arith.constant 0 : i32
    %c0_i32_0 = arith.constant 0 : i32
    %c0_i32_1 = arith.constant 0 : i32
    %c0_i32_2 = arith.constant 0 : i32
    return %c0_i32, %c0_i32_0, %c0_i32_1 : i32, i32, i32
  }
  func.func @transform_3(%arg0: i32, %arg1: i32) -> (i32, i32) {
    %c0_i32 = arith.constant 0 : i32
    %c0_i32_0 = arith.constant 0 : i32
    return %arg0, %c0_i32 : i32, i32
  }
  func.func @transform_4(%arg0: i32, %arg1: i32) -> (i32, i32) {
    %c0_i32 = arith.constant 0 : i32
    %c0_i32_0 = arith.constant 0 : i32
    %c0_i32_1 = arith.constant 0 : i32
    return %c0_i32, %c0_i32_0 : i32, i32
  }
  func.func @transform_5(%arg0: i32, %arg1: i32) -> (i32, i32) {
    %c0_i32 = arith.constant 0 : i32
    %c0_i32_0 = arith.constant 0 : i32
    return %arg0, %c0_i32 : i32, i32
  }
}

module attributes {stable_mosaic.version = 11 : i64} {
  func.func @_sum_gcn_layer_kernel(%arg0: i32, %arg1: i32, %arg2: memref<2x256x384xbf16, #tpu.memory_space<vmem>>, %arg3: memref<384x128xbf16, #tpu.memory_space<vmem>>, %arg4: memref<2x128x128xbf16, #tpu.memory_space<vmem>>, %arg5: memref<256x128xbf16, #tpu.memory_space<vmem>>, %arg6: memref<128x128xbf16, #tpu.memory_space<vmem>>, %arg7: memref<256x128xbf16, #tpu.memory_space<vmem>>, %arg8: memref<256x128xf32, #tpu.memory_space<vmem>>) attributes {dimension_semantics = [#tpu.dimension_semantics<parallel>, #tpu.dimension_semantics<arbitrary>], iteration_bounds = array<i64: 1, 1>, scalar_prefetch = 0 : i64, scratch_operands = 1 : i64, tpu.core_type = #tpu.core_type<tc>, window_params = [{transform_indices = @transform_0, window_bounds = array<i64: 2, 256, 384>}, {transform_indices = @transform_1, window_bounds = array<i64: 384, 128>}, {pipeline_mode = #tpu.pipeline_mode<synchronous>, transform_indices = @transform_2, window_bounds = array<i64: 2, 128, 128>}, {transform_indices = @transform_3, window_bounds = array<i64: 256, 128>}, {pipeline_mode = #tpu.pipeline_mode<synchronous>, transform_indices = @transform_4, window_bounds = array<i64: 128, 128>}, {transform_indices = @transform_5, window_bounds = array<i64: 256, 128>}]} {
    %c0_i32 = arith.constant 0 : i32
    %0 = arith.cmpi eq, %arg1, %c0_i32 : i32
    %1 = arith.extui %0 : i1 to i32
    %c0_i32_0 = arith.constant 0 : i32
    %2 = arith.cmpi ne, %1, %c0_i32_0 : i32
    scf.if %2 {
      %c0_22 = arith.constant 0 : index
      %c0_23 = arith.constant 0 : index
      %25 = vector.load %arg5[%c0_22, %c0_23] : memref<256x128xbf16, #tpu.memory_space<vmem>>, vector<256x128xbf16>
      %c0_24 = arith.constant 0 : index
      %c0_25 = arith.constant 0 : index
      %26 = vector.load %arg6[%c0_24, %c0_25] : memref<128x128xbf16, #tpu.memory_space<vmem>>, vector<128x128xbf16>
      %cst_26 = arith.constant dense<0.000000e+00> : vector<256x128xf32>
      %27 = tpu.matmul %25, %26, %cst_26 {dimension_numbers = #tpu.dot_dimension_numbers<[1], [0], [0], [1], [0, 0, 1, 1], [], []>} : vector<256x128xbf16>, vector<128x128xbf16>, vector<256x128xf32> -> vector<256x128xf32>
      %c0_27 = arith.constant 0 : index
      %c0_28 = arith.constant 0 : index
      %28 = vector.load %arg8[%c0_27, %c0_28] : memref<256x128xf32, #tpu.memory_space<vmem>>, vector<256x128xf32>
      tpu.vector_store %arg8[%c0_27, %c0_28], %27 {strides = array<i32>} : memref<256x128xf32, #tpu.memory_space<vmem>>, vector<256x128xf32>,
    } else {
    }
    %c0 = arith.constant 0 : index
    %c0_1 = arith.constant 0 : index
    %3 = vector.load %arg3[%c0, %c0_1] : memref<384x128xbf16, #tpu.memory_space<vmem>>, vector<384x128xbf16>
    %c0_2 = arith.constant 0 : index
    %c0_3 = arith.constant 0 : index
    %4 = vector.load %arg8[%c0_2, %c0_3] : memref<256x128xf32, #tpu.memory_space<vmem>>, vector<256x128xf32>
    %c0_4 = arith.constant 0 : index
    %c0_5 = arith.constant 0 : index
    %c0_6 = arith.constant 0 : index
    %5 = vector.load %arg4[%c0_4, %c0_5, %c0_6] : memref<2x128x128xbf16, #tpu.memory_space<vmem>>, vector<1x128x128xbf16>
    %6 = vector.shape_cast %5 : vector<1x128x128xbf16> to vector<128x128xbf16>
    %cst = arith.constant dense<0.000000e+00> : vector<384x128xf32>
    %7 = tpu.matmul %3, %6, %cst {dimension_numbers = #tpu.dot_dimension_numbers<[1], [0], [0], [1], [0, 0, 1, 1], [], []>} : vector<384x128xbf16>, vector<128x128xbf16>, vector<384x128xf32> -> vector<384x128xf32>
    %8 = arith.truncf %7 : vector<384x128xf32> to vector<384x128xbf16>
    %c0_7 = arith.constant 0 : index
    %c0_8 = arith.constant 0 : index
    %c0_9 = arith.constant 0 : index
    %9 = vector.load %arg2[%c0_7, %c0_8, %c0_9] : memref<2x256x384xbf16, #tpu.memory_space<vmem>>, vector<1x256x384xbf16>
    %10 = vector.shape_cast %9 : vector<1x256x384xbf16> to vector<256x384xbf16>
    %cst_10 = arith.constant dense<0.000000e+00> : vector<256x128xf32>
    %11 = tpu.matmul %10, %8, %cst_10 {dimension_numbers = #tpu.dot_dimension_numbers<[1], [0], [0], [1], [0, 0, 1, 1], [], []>} : vector<256x384xbf16>, vector<384x128xbf16>, vector<256x128xf32> -> vector<256x128xf32>
    %12 = arith.addf %4, %11 : vector<256x128xf32>
    %c1 = arith.constant 1 : index
    %c0_11 = arith.constant 0 : index
    %c0_12 = arith.constant 0 : index
    %13 = vector.load %arg4[%c1, %c0_11, %c0_12] : memref<2x128x128xbf16, #tpu.memory_space<vmem>>, vector<1x128x128xbf16>
    %14 = vector.shape_cast %13 : vector<1x128x128xbf16> to vector<128x128xbf16>
    %cst_13 = arith.constant dense<0.000000e+00> : vector<384x128xf32>
    %15 = tpu.matmul %3, %14, %cst_13 {dimension_numbers = #tpu.dot_dimension_numbers<[1], [0], [0], [1], [0, 0, 1, 1], [], []>} : vector<384x128xbf16>, vector<128x128xbf16>, vector<384x128xf32> -> vector<384x128xf32>
    %16 = arith.truncf %15 : vector<384x128xf32> to vector<384x128xbf16>
    %c1_14 = arith.constant 1 : index
    %c0_15 = arith.constant 0 : index
    %c0_16 = arith.constant 0 : index
    %17 = vector.load %arg2[%c1_14, %c0_15, %c0_16] : memref<2x256x384xbf16, #tpu.memory_space<vmem>>, vector<1x256x384xbf16>
    %18 = vector.shape_cast %17 : vector<1x256x384xbf16> to vector<256x384xbf16>
    %cst_17 = arith.constant dense<0.000000e+00> : vector<256x128xf32>
    %19 = tpu.matmul %18, %16, %cst_17 {dimension_numbers = #tpu.dot_dimension_numbers<[1], [0], [0], [1], [0, 0, 1, 1], [], []>} : vector<256x384xbf16>, vector<384x128xbf16>, vector<256x128xf32> -> vector<256x128xf32>
    %20 = arith.addf %12, %19 : vector<256x128xf32>
    %c0_18 = arith.constant 0 : index
    %c0_19 = arith.constant 0 : index
    %21 = vector.load %arg8[%c0_18, %c0_19] : memref<256x128xf32, #tpu.memory_space<vmem>>, vector<256x128xf32>
    tpu.vector_store %arg8[%c0_18, %c0_19], %20 {strides = array<i32>} : memref<256x128xf32, #tpu.memory_space<vmem>>, vector<256x128xf32>,
    %c0_i32_20 = arith.constant 0 : i32
    %22 = arith.cmpi eq, %arg1, %c0_i32_20 : i32
    %23 = arith.extui %22 : i1 to i32
    %c0_i32_21 = arith.constant 0 : i32
    %24 = arith.cmpi ne, %23, %c0_i32_21 : i32
    scf.if %24 {
      %cst_22 = arith.constant 0.000000e+00 : f32
      %25 = vector.broadcast %cst_22 : f32 to vector<256x128xf32>
      %26 = arith.maximumf %20, %25 : vector<256x128xf32>
      %27 = arith.truncf %26 : vector<256x128xf32> to vector<256x128xbf16>
      %c0_23 = arith.constant 0 : index
      %c0_24 = arith.constant 0 : index
      %28 = vector.load %arg7[%c0_23, %c0_24] : memref<256x128xbf16, #tpu.memory_space<vmem>>, vector<256x128xbf16>
      tpu.vector_store %arg7[%c0_23, %c0_24], %27 {strides = array<i32>} : memref<256x128xbf16, #tpu.memory_space<vmem>>, vector<256x128xbf16>,
    } else {
    }
    return
  }
  func.func @transform_0(%arg0: i32, %arg1: i32) -> (i32, i32, i32) {
    %c0_i32 = arith.constant 0 : i32
    %c0_i32_0 = arith.constant 0 : i32
    return %c0_i32, %arg0, %arg1 : i32, i32, i32
  }
  func.func @transform_1(%arg0: i32, %arg1: i32) -> (i32, i32) {
    %c0_i32 = arith.constant 0 : i32
    %c0_i32_0 = arith.constant 0 : i32
    return %arg1, %c0_i32 : i32, i32
  }
  func.func @transform_2(%arg0: i32, %arg1: i32) -> (i32, i32, i32) {
    %c0_i32 = arith.constant 0 : i32
    %c0_i32_0 = arith.constant 0 : i32
    %c0_i32_1 = arith.constant 0 : i32
    %c0_i32_2 = arith.constant 0 : i32
    return %c0_i32, %c0_i32_0, %c0_i32_1 : i32, i32, i32
  }
  func.func @transform_3(%arg0: i32, %arg1: i32) -> (i32, i32) {
    %c0_i32 = arith.constant 0 : i32
    %c0_i32_0 = arith.constant 0 : i32
    return %arg0, %c0_i32 : i32, i32
  }
  func.func @transform_4(%arg0: i32, %arg1: i32) -> (i32, i32) {
    %c0_i32 = arith.constant 0 : i32
    %c0_i32_0 = arith.constant 0 : i32
    %c0_i32_1 = arith.constant 0 : i32
    return %c0_i32, %c0_i32_0 : i32, i32
  }
  func.func @transform_5(%arg0: i32, %arg1: i32) -> (i32, i32) {
    %c0_i32 = arith.constant 0 : i32
    %c0_i32_0 = arith.constant 0 : i32
    return %arg0, %c0_i32 : i32, i32
  }
}

module attributes {stable_mosaic.version = 11 : i64} {
  func.func @_linear_kernel(%arg0: i32, %arg1: memref<256x128xbf16, #tpu.memory_space<vmem>>, %arg2: memref<128x128xbf16, #tpu.memory_space<vmem>>, %arg3: memref<256x128xbf16, #tpu.memory_space<vmem>>) attributes {dimension_semantics = [#tpu.dimension_semantics<parallel>], iteration_bounds = array<i64: 1>, scalar_prefetch = 0 : i64, scratch_operands = 0 : i64, tpu.core_type = #tpu.core_type<tc>, window_params = [{transform_indices = @transform_0, window_bounds = array<i64: 256, 128>}, {pipeline_mode = #tpu.pipeline_mode<synchronous>, transform_indices = @transform_1, window_bounds = array<i64: 128, 128>}, {transform_indices = @transform_2, window_bounds = array<i64: 256, 128>}]} {
    %c0 = arith.constant 0 : index
    %c0_0 = arith.constant 0 : index
    %0 = vector.load %arg1[%c0, %c0_0] : memref<256x128xbf16, #tpu.memory_space<vmem>>, vector<256x128xbf16>
    %c0_1 = arith.constant 0 : index
    %c0_2 = arith.constant 0 : index
    %1 = vector.load %arg2[%c0_1, %c0_2] : memref<128x128xbf16, #tpu.memory_space<vmem>>, vector<128x128xbf16>
    %cst = arith.constant dense<0.000000e+00> : vector<256x128xf32>
    %2 = tpu.matmul %0, %1, %cst {dimension_numbers = #tpu.dot_dimension_numbers<[1], [0], [0], [1], [0, 0, 1, 1], [], []>} : vector<256x128xbf16>, vector<128x128xbf16>, vector<256x128xf32> -> vector<256x128xf32>
    %3 = arith.truncf %2 : vector<256x128xf32> to vector<256x128xbf16>
    %c0_3 = arith.constant 0 : index
    %c0_4 = arith.constant 0 : index
    %4 = vector.load %arg3[%c0_3, %c0_4] : memref<256x128xbf16, #tpu.memory_space<vmem>>, vector<256x128xbf16>
    tpu.vector_store %arg3[%c0_3, %c0_4], %3 {strides = array<i32>} : memref<256x128xbf16, #tpu.memory_space<vmem>>, vector<256x128xbf16>,
    return
  }
  func.func @transform_0(%arg0: i32) -> (i32, i32) {
    %c0_i32 = arith.constant 0 : i32
    %c0_i32_0 = arith.constant 0 : i32
    return %arg0, %c0_i32 : i32, i32
  }
  func.func @transform_1(%arg0: i32) -> (i32, i32) {
    %c0_i32 = arith.constant 0 : i32
    %c0_i32_0 = arith.constant 0 : i32
    %c0_i32_1 = arith.constant 0 : i32
    return %c0_i32, %c0_i32_0 : i32, i32
  }
  func.func @transform_2(%arg0: i32) -> (i32, i32) {
    %c0_i32 = arith.constant 0 : i32
    %c0_i32_0 = arith.constant 0 : i32
    return %arg0, %c0_i32 : i32, i32
  }
}

module attributes {stable_mosaic.version = 11 : i64} {
  func.func @_linear_kernel(%arg0: i32, %arg1: memref<384x128xbf16, #tpu.memory_space<vmem>>, %arg2: memref<128x128xbf16, #tpu.memory_space<vmem>>, %arg3: memref<384x128xbf16, #tpu.memory_space<vmem>>) attributes {dimension_semantics = [#tpu.dimension_semantics<parallel>], iteration_bounds = array<i64: 1>, scalar_prefetch = 0 : i64, scratch_operands = 0 : i64, tpu.core_type = #tpu.core_type<tc>, window_params = [{transform_indices = @transform_0, window_bounds = array<i64: 384, 128>}, {pipeline_mode = #tpu.pipeline_mode<synchronous>, transform_indices = @transform_1, window_bounds = array<i64: 128, 128>}, {transform_indices = @transform_2, window_bounds = array<i64: 384, 128>}]} {
    %c0 = arith.constant 0 : index
    %c0_0 = arith.constant 0 : index
    %0 = vector.load %arg1[%c0, %c0_0] : memref<384x128xbf16, #tpu.memory_space<vmem>>, vector<384x128xbf16>
    %c0_1 = arith.constant 0 : index
    %c0_2 = arith.constant 0 : index
    %1 = vector.load %arg2[%c0_1, %c0_2] : memref<128x128xbf16, #tpu.memory_space<vmem>>, vector<128x128xbf16>
    %cst = arith.constant dense<0.000000e+00> : vector<384x128xf32>
    %2 = tpu.matmul %0, %1, %cst {dimension_numbers = #tpu.dot_dimension_numbers<[1], [0], [0], [1], [0, 0, 1, 1], [], []>} : vector<384x128xbf16>, vector<128x128xbf16>, vector<384x128xf32> -> vector<384x128xf32>
    %3 = arith.truncf %2 : vector<384x128xf32> to vector<384x128xbf16>
    %c0_3 = arith.constant 0 : index
    %c0_4 = arith.constant 0 : index
    %4 = vector.load %arg3[%c0_3, %c0_4] : memref<384x128xbf16, #tpu.memory_space<vmem>>, vector<384x128xbf16>
    tpu.vector_store %arg3[%c0_3, %c0_4], %3 {strides = array<i32>} : memref<384x128xbf16, #tpu.memory_space<vmem>>, vector<384x128xbf16>,
    return
  }
  func.func @transform_0(%arg0: i32) -> (i32, i32) {
    %c0_i32 = arith.constant 0 : i32
    %c0_i32_0 = arith.constant 0 : i32
    return %arg0, %c0_i32 : i32, i32
  }
  func.func @transform_1(%arg0: i32) -> (i32, i32) {
    %c0_i32 = arith.constant 0 : i32
    %c0_i32_0 = arith.constant 0 : i32
    %c0_i32_1 = arith.constant 0 : i32
    return %c0_i32, %c0_i32_0 : i32, i32
  }
  func.func @transform_2(%arg0: i32) -> (i32, i32) {
    %c0_i32 = arith.constant 0 : i32
    %c0_i32_0 = arith.constant 0 : i32
    return %arg0, %c0_i32 : i32, i32
  }
}

module attributes {stable_mosaic.version = 11 : i64} {
  func.func @_decoder_kernel(%arg0: i32, %arg1: memref<128x128xbf16, #tpu.memory_space<vmem>>, %arg2: memref<128x128xbf16, #tpu.memory_space<vmem>>, %arg3: memref<128x2xbf16, #tpu.memory_space<vmem>>, %arg4: memref<128x2xf32, #tpu.memory_space<vmem>>) attributes {dimension_semantics = [#tpu.dimension_semantics<parallel>], iteration_bounds = array<i64: 1>, scalar_prefetch = 0 : i64, scratch_operands = 0 : i64, tpu.core_type = #tpu.core_type<tc>, window_params = [{transform_indices = @transform_0, window_bounds = array<i64: 128, 128>}, {transform_indices = @transform_1, window_bounds = array<i64: 128, 128>}, {pipeline_mode = #tpu.pipeline_mode<synchronous>, transform_indices = @transform_2, window_bounds = array<i64: 128, 2>}, {transform_indices = @transform_3, window_bounds = array<i64: 128, 2>}]} {
    %c0 = arith.constant 0 : index
    %c0_0 = arith.constant 0 : index
    %0 = vector.load %arg1[%c0, %c0_0] : memref<128x128xbf16, #tpu.memory_space<vmem>>, vector<128x128xbf16>
    %c0_1 = arith.constant 0 : index
    %c0_2 = arith.constant 0 : index
    %1 = vector.load %arg2[%c0_1, %c0_2] : memref<128x128xbf16, #tpu.memory_space<vmem>>, vector<128x128xbf16>
    %2 = arith.mulf %0, %1 : vector<128x128xbf16>
    %c0_3 = arith.constant 0 : index
    %c0_4 = arith.constant 0 : index
    %3 = vector.load %arg3[%c0_3, %c0_4] : memref<128x2xbf16, #tpu.memory_space<vmem>>, vector<128x2xbf16>
    %cst = arith.constant dense<0.000000e+00> : vector<128x2xf32>
    %4 = tpu.matmul %2, %3, %cst {dimension_numbers = #tpu.dot_dimension_numbers<[1], [0], [0], [1], [0, 0, 1, 1], [], []>} : vector<128x128xbf16>, vector<128x2xbf16>, vector<128x2xf32> -> vector<128x2xf32>
    %c0_5 = arith.constant 0 : index
    %c0_6 = arith.constant 0 : index
    %5 = vector.load %arg4[%c0_5, %c0_6] : memref<128x2xf32, #tpu.memory_space<vmem>>, vector<128x2xf32>
    tpu.vector_store %arg4[%c0_5, %c0_6], %4 {strides = array<i32>} : memref<128x2xf32, #tpu.memory_space<vmem>>, vector<128x2xf32>,
    return
  }
  func.func @transform_0(%arg0: i32) -> (i32, i32) {
    %c0_i32 = arith.constant 0 : i32
    %c0_i32_0 = arith.constant 0 : i32
    return %arg0, %c0_i32 : i32, i32
  }
  func.func @transform_1(%arg0: i32) -> (i32, i32) {
    %c0_i32 = arith.constant 0 : i32
    %c0_i32_0 = arith.constant 0 : i32
    return %arg0, %c0_i32 : i32, i32
  }
  func.func @transform_2(%arg0: i32) -> (i32, i32) {
    %c0_i32 = arith.constant 0 : i32
    %c0_i32_0 = arith.constant 0 : i32
    %c0_i32_1 = arith.constant 0 : i32
    return %c0_i32, %c0_i32_0 : i32, i32
  }
  func.func @transform_3(%arg0: i32) -> (i32, i32) {
    %c0_i32 = arith.constant 0 : i32
    %c0_i32_0 = arith.constant 0 : i32
    return %arg0, %c0_i32 : i32, i32
  }
}

</mosaic_0001>

<bundles_post_ra>
// kernel: graph_matrix_completion_forward.11
= control target key start
LH: loop header
LB: loop body
LE: loop exit
PB: predicated region body
PF: predicated region fallthrough
CT: control target
= control target key end

     0   :  { %s959_s1 = inlined_call_operand.vmem [shape: bf16[128,128], index: 1, kind: input, shape index: {}]   ;;  %s960_s0 = inlined_call_operand.vmem [shape: bf16[256,128], index: 0, kind: input, shape index: {}]   ;;  %s961_s2 = inlined_call_operand.vmem [shape: bf16[256,128], index: 2, kind: output, shape index: {}]  }
   0x1   :  { %v800_v0 = vld [vmem:[%s959_s1] sm:$0xff]   ;;  %v801_v1 = vld [vmem:[%s959_s1 + $0x8] sm:$0xff]   ;;  %v802_v2 = vld [vmem:[%s959_s1 + $0x10] sm:$0xff]  }
   0x2   :  { %736 = vmatprep.subr.bf16.mxu0 %v800_v0  ;;  %784 = vmatprep.subr.bf16.mxu1 %v800_v0  ;;  %v803_v3 = vld [vmem:[%s959_s1 + $0x18] sm:$0xff]   ;;  %v808_v4 = vld [vmem:[%s960_s0] sm:$0xff]   ;;  %v805_v7 = vld [vmem:[%s959_s1 + $0x28] sm:$0xff]  }
   0x3   :  { %737 = vmatpush3.bf16.msra.mxu0 %v800_v0  ;;  %792 = vmatpush3.bf16.msra.mxu1 %v800_v0  ;;  %v809_v5 = vld [vmem:[%s960_s0 + $0x40] sm:$0xff]   ;;  %v806_v8 = vld [vmem:[%s959_s1 + $0x30] sm:$0xff]   ;;  %v807_v9 = vld [vmem:[%s959_s1 + $0x38] sm:$0xff]  }
   0x4   :  { %738 = vmatprep.subr.bf16.mxu0 %v801_v1  ;;  %785 = vmatprep.subr.bf16.mxu1 %v801_v1  ;;  %v804_v6 = vld [vmem:[%s959_s1 + $0x20] sm:$0xff]   ;;  %v810_v10 = vld [vmem:[%s960_s0 + $0x8] sm:$0xff]   ;;  %v812_v12 = vld [vmem:[%s960_s0 + $0x10] sm:$0xff]  }
   0x5   :  { %752 = vmatprep.mubr.bf16.mxu0 %v808_v4  ;;  %768 = vmatprep.mubr.bf16.mxu1 %v809_v5  ;;  %v811_v11 = vld [vmem:[%s960_s0 + $0x48] sm:$0xff]   ;;  %v813_v13 = vld [vmem:[%s960_s0 + $0x50] sm:$0xff]   ;;  %v814_v14 = vld [vmem:[%s960_s0 + $0x18] sm:$0xff]  }
   0x6   :  { %v815_v15 = vld [vmem:[%s960_s0 + $0x58] sm:$0xff]   ;;  %v816_v16 = vld [vmem:[%s960_s0 + $0x20] sm:$0xff]   ;;  %v818_v18 = vld [vmem:[%s960_s0 + $0x28] sm:$0xff]  }
   0x7   :  { %739 = vmatpush3.bf16.msra.mxu0 %v801_v1  ;;  %793 = vmatpush3.bf16.msra.mxu1 %v801_v1  ;;  %v817_v17 = vld [vmem:[%s960_s0 + $0x60] sm:$0xff]   ;;  %v819_v19 = vld [vmem:[%s960_s0 + $0x68] sm:$0xff]   ;;  %v820_v20 = vld [vmem:[%s960_s0 + $0x30] sm:$0xff]  }
   0x8   :  { %740 = vmatprep.subr.bf16.mxu0 %v802_v2  ;;  %786 = vmatprep.subr.bf16.mxu1 %v802_v2  ;;  %v821_v21 = vld [vmem:[%s960_s0 + $0x70] sm:$0xff]   ;;  %v822_v22 = vld [vmem:[%s960_s0 + $0x38] sm:$0xff]  }
   0x9   :  { %v823_v23 = vld [vmem:[%s960_s0 + $0x78] sm:$0xff]  }
   0xb   :  { %741 = vmatpush3.bf16.msra.mxu0 %v802_v2  ;;  %794 = vmatpush3.bf16.msra.mxu1 %v802_v2 }
   0xc   :  { %742 = vmatprep.subr.bf16.mxu0 %v803_v3  ;;  %787 = vmatprep.subr.bf16.mxu1 %v803_v3 }
   0xf   :  { %743 = vmatpush3.bf16.msra.mxu0 %v803_v3  ;;  %795 = vmatpush3.bf16.msra.mxu1 %v803_v3 }
  0x10   :  { %744 = vmatprep.subr.bf16.mxu0 %v804_v6  ;;  %788 = vmatprep.subr.bf16.mxu1 %v804_v6 }
  0x13   :  { %745 = vmatpush3.bf16.msra.mxu0 %v804_v6  ;;  %796 = vmatpush3.bf16.msra.mxu1 %v804_v6 }
  0x14   :  { %746 = vmatprep.subr.bf16.mxu0 %v805_v7  ;;  %789 = vmatprep.subr.bf16.mxu1 %v805_v7 }
  0x17   :  { %747 = vmatpush3.bf16.msra.mxu0 %v805_v7  ;;  %797 = vmatpush3.bf16.msra.mxu1 %v805_v7 }
  0x18   :  { %748 = vmatprep.subr.bf16.mxu0 %v806_v8  ;;  %790 = vmatprep.subr.bf16.mxu1 %v806_v8 }
  0x1b   :  { %749 = vmatpush3.bf16.msra.mxu0 %v806_v8  ;;  %798 = vmatpush3.bf16.msra.mxu1 %v806_v8 }
  0x1c   :  { %750 = vmatprep.subr.bf16.mxu0 %v807_v9  ;;  %791 = vmatprep.subr.bf16.mxu1 %v807_v9 }
  0x1f   :  { %751 = vmatpush3.bf16.msra.mxu0 %v807_v9  ;;  %799 = vmatpush3.bf16.msra.mxu1 %v807_v9 }
  0x22   :  { %753 = vmatmul.mubr.bf16.vlgmr.msra.gmra.mrb[0].mxu0 %v810_v10  ;;  %769 = vmatmul.mubr.bf16.vlgmr.msra.gmra.mrb[0].mxu1 %v811_v11 }
  0x23   :  { %756 = vmatprep.mubr.bf16.mxu0 %v812_v12  ;;  %772 = vmatprep.mubr.bf16.mxu1 %v813_v13 }
  0x2a   :  { %757 = vmatmul.mubr.bf16.gmra.mrb[4].mxu0 %v814_v14  ;;  %773 = vmatmul.mubr.bf16.gmra.mrb[4].mxu1 %v815_v15 }
  0x2b   :  { %760 = vmatprep.mubr.bf16.mxu0 %v816_v16  ;;  %776 = vmatprep.mubr.bf16.mxu1 %v817_v17 }
  0x32   :  { %761 = vmatmul.mubr.bf16.gmra.mrb[8].mxu0 %v818_v18  ;;  %777 = vmatmul.mubr.bf16.gmra.mrb[8].mxu1 %v819_v19 }
  0x33   :  { %764 = vmatprep.mubr.bf16.mxu0 %v820_v20  ;;  %780 = vmatprep.mubr.bf16.mxu1 %v821_v21 }
  0x3a   :  { %765 = vmatmul.mubr.bf16.gmra.mrb[12].mxu0 %v822_v22  ;;  %781 = vmatmul.mubr.bf16.gmra.mrb[12].mxu1 %v823_v23 }
  0xf5   :  { %v754_v24 = vpop.f32.mrb[0].mxu0  ;;  %v770_v25 = vpop.f32.mrb[0].mxu1 }
  0xf6   :  { %v238_v26 = vpop.f32.mrb[1].mxu0  ;;  %v302_v27 = vpop.f32.mrb[1].mxu1 }
  0xf7   :  { %v755_v28 = vpop.f32.mrb[2].mxu0  ;;  %v771_v29 = vpop.f32.mrb[2].mxu1 }
  0xf8   :  { %v625_v30 = vpack.c.bf16 %v755_v28, %v754_v24  ;;  %v665_v31 = vpack.c.bf16 %v771_v29, %v770_v25  ;;  %v241_v32 = vpop.f32.mrb[3].mxu0  ;;  %v305_v33 = vpop.f32.mrb[3].mxu1 }
  0xf9   :  { %v620_v34 = vpack.c.bf16 %v241_v32, %v238_v26  ;;  %v660_v35 = vpack.c.bf16 %v305_v33, %v302_v27 }
  0xfa   :  { %697 = vst [vmem:[%s961_s2 + $0x8] sm:$0xff] %v625_v30   ;;  %705 = vst [vmem:[%s961_s2 + $0x48] sm:$0xff] %v665_v31  }
  0xfb   :  { %621 = vst [vmem:[%s961_s2] sm:$0xff] %v620_v34   ;;  %704 = vst [vmem:[%s961_s2 + $0x40] sm:$0xff] %v660_v35  }
  0xfd   :  { %v758_v36 = vpop.f32.mrb[4].mxu0  ;;  %v774_v37 = vpop.f32.mrb[4].mxu1 }
  0xfe   :  { %v254_v38 = vpop.f32.mrb[5].mxu0  ;;  %v318_v39 = vpop.f32.mrb[5].mxu1 }
  0xff   :  { %v759_v40 = vpop.f32.mrb[6].mxu0  ;;  %v775_v41 = vpop.f32.mrb[6].mxu1 }
 0x100   :  { %v635_v42 = vpack.c.bf16 %v759_v40, %v758_v36  ;;  %v675_v43 = vpack.c.bf16 %v775_v41, %v774_v37  ;;  %v257_v44 = vpop.f32.mrb[7].mxu0  ;;  %v321_v45 = vpop.f32.mrb[7].mxu1 }
 0x101   :  { %v630_v46 = vpack.c.bf16 %v257_v44, %v254_v38  ;;  %v670_v47 = vpack.c.bf16 %v321_v45, %v318_v39 }
 0x102   :  { %699 = vst [vmem:[%s961_s2 + $0x18] sm:$0xff] %v635_v42   ;;  %707 = vst [vmem:[%s961_s2 + $0x58] sm:$0xff] %v675_v43  }
 0x103   :  { %698 = vst [vmem:[%s961_s2 + $0x10] sm:$0xff] %v630_v46   ;;  %706 = vst [vmem:[%s961_s2 + $0x50] sm:$0xff] %v670_v47  }
 0x105   :  { %v762_v48 = vpop.f32.mrb[8].mxu0  ;;  %v778_v49 = vpop.f32.mrb[8].mxu1 }
 0x106   :  { %v270_v50 = vpop.f32.mrb[9].mxu0  ;;  %v334_v51 = vpop.f32.mrb[9].mxu1 }
 0x107   :  { %v763_v52 = vpop.f32.mrb[10].mxu0  ;;  %v779_v53 = vpop.f32.mrb[10].mxu1 }
 0x108   :  { %v645_v54 = vpack.c.bf16 %v763_v52, %v762_v48  ;;  %v685_v55 = vpack.c.bf16 %v779_v53, %v778_v49  ;;  %v273_v56 = vpop.f32.mrb[11].mxu0  ;;  %v337_v57 = vpop.f32.mrb[11].mxu1 }
 0x109   :  { %v640_v58 = vpack.c.bf16 %v273_v56, %v270_v50  ;;  %v680_v59 = vpack.c.bf16 %v337_v57, %v334_v51 }
 0x10a   :  { %701 = vst [vmem:[%s961_s2 + $0x28] sm:$0xff] %v645_v54   ;;  %709 = vst [vmem:[%s961_s2 + $0x68] sm:$0xff] %v685_v55  }
 0x10b   :  { %700 = vst [vmem:[%s961_s2 + $0x20] sm:$0xff] %v640_v58   ;;  %708 = vst [vmem:[%s961_s2 + $0x60] sm:$0xff] %v680_v59  }
 0x10d   :  { %v766_v60 = vpop.f32.mrb[12].mxu0  ;;  %v782_v61 = vpop.f32.mrb[12].mxu1 }
 0x10e   :  { %v286_v62 = vpop.f32.mrb[13].mxu0  ;;  %v350_v63 = vpop.f32.mrb[13].mxu1 }
 0x10f   :  { %v767_v0 = vpop.f32.mrb[14].mxu0  ;;  %v783_v1 = vpop.f32.mrb[14].mxu1 }
 0x110   :  { %v655_v2 = vpack.c.bf16 %v767_v0, %v766_v60  ;;  %v695_v3 = vpack.c.bf16 %v783_v1, %v782_v61  ;;  %v289_v4 = vpop.f32.mrb[15].mxu0  ;;  %v353_v5 = vpop.f32.mrb[15].mxu1 }
 0x111   :  { %v650_v6 = vpack.c.bf16 %v289_v4, %v286_v62  ;;  %v690_v7 = vpack.c.bf16 %v353_v5, %v350_v63 }
 0x112   :  { %703 = vst [vmem:[%s961_s2 + $0x38] sm:$0xff] %v655_v2   ;;  %711 = vst [vmem:[%s961_s2 + $0x78] sm:$0xff] %v695_v3  }
 0x113   :  { %702 = vst [vmem:[%s961_s2 + $0x30] sm:$0xff] %v650_v6   ;;  %710 = vst [vmem:[%s961_s2 + $0x70] sm:$0xff] %v690_v7  }

// kernel: graph_matrix_completion_forward.12
= control target key start
LH: loop header
LB: loop body
LE: loop exit
PB: predicated region body
PF: predicated region fallthrough
CT: control target
= control target key end

     0   :  { %s1335_s1 = inlined_call_operand.vmem [shape: bf16[128,128], index: 1, kind: input, shape index: {}]   ;;  %s1336_s0 = inlined_call_operand.vmem [shape: bf16[384,128], index: 0, kind: input, shape index: {}]   ;;  %s1337_s2 = inlined_call_operand.vmem [shape: bf16[384,128], index: 2, kind: output, shape index: {}]  }
   0x1   :  { %v1120_v0 = vld [vmem:[%s1335_s1] sm:$0xff]   ;;  %v1121_v1 = vld [vmem:[%s1335_s1 + $0x8] sm:$0xff]   ;;  %v1122_v2 = vld [vmem:[%s1335_s1 + $0x10] sm:$0xff]  }
   0x2   :  { %1040 = vmatprep.subr.bf16.mxu0 %v1120_v0  ;;  %1104 = vmatprep.subr.bf16.mxu1 %v1120_v0  ;;  %v1123_v3 = vld [vmem:[%s1335_s1 + $0x18] sm:$0xff]   ;;  %v1128_v4 = vld [vmem:[%s1336_s0] sm:$0xff]   ;;  %v1125_v7 = vld [vmem:[%s1335_s1 + $0x28] sm:$0xff]  }
   0x3   :  { %1041 = vmatpush3.bf16.msra.mxu0 %v1120_v0  ;;  %1112 = vmatpush3.bf16.msra.mxu1 %v1120_v0  ;;  %v1129_v5 = vld [vmem:[%s1336_s0 + $0x60] sm:$0xff]   ;;  %v1126_v8 = vld [vmem:[%s1335_s1 + $0x30] sm:$0xff]   ;;  %v1127_v9 = vld [vmem:[%s1335_s1 + $0x38] sm:$0xff]  }
   0x4   :  { %1042 = vmatprep.subr.bf16.mxu0 %v1121_v1  ;;  %1105 = vmatprep.subr.bf16.mxu1 %v1121_v1  ;;  %v1124_v6 = vld [vmem:[%s1335_s1 + $0x20] sm:$0xff]   ;;  %v1130_v10 = vld [vmem:[%s1336_s0 + $0x8] sm:$0xff]   ;;  %v1132_v12 = vld [vmem:[%s1336_s0 + $0x10] sm:$0xff]  }
   0x5   :  { %1056 = vmatprep.mubr.bf16.mxu0 %v1128_v4  ;;  %1080 = vmatprep.mubr.bf16.mxu1 %v1129_v5  ;;  %v1131_v11 = vld [vmem:[%s1336_s0 + $0x68] sm:$0xff]   ;;  %v1133_v13 = vld [vmem:[%s1336_s0 + $0x70] sm:$0xff]   ;;  %v1134_v14 = vld [vmem:[%s1336_s0 + $0x18] sm:$0xff]  }
   0x6   :  { %v1135_v15 = vld [vmem:[%s1336_s0 + $0x78] sm:$0xff]   ;;  %v1136_v16 = vld [vmem:[%s1336_s0 + $0x20] sm:$0xff]   ;;  %v1138_v18 = vld [vmem:[%s1336_s0 + $0x28] sm:$0xff]  }
   0x7   :  { %1043 = vmatpush3.bf16.msra.mxu0 %v1121_v1  ;;  %1113 = vmatpush3.bf16.msra.mxu1 %v1121_v1  ;;  %v1137_v17 = vld [vmem:[%s1336_s0 + $0x80] sm:$0xff]   ;;  %v1139_v19 = vld [vmem:[%s1336_s0 + $0x88] sm:$0xff]   ;;  %v1140_v20 = vld [vmem:[%s1336_s0 + $0x30] sm:$0xff]  }
   0x8   :  { %1044 = vmatprep.subr.bf16.mxu0 %v1122_v2  ;;  %1106 = vmatprep.subr.bf16.mxu1 %v1122_v2  ;;  %v1141_v21 = vld [vmem:[%s1336_s0 + $0x90] sm:$0xff]   ;;  %v1142_v22 = vld [vmem:[%s1336_s0 + $0x38] sm:$0xff]   ;;  %v1144_v24 = vld [vmem:[%s1336_s0 + $0x40] sm:$0xff]  }
   0x9   :  { %v1143_v23 = vld [vmem:[%s1336_s0 + $0x98] sm:$0xff]   ;;  %v1145_v25 = vld [vmem:[%s1336_s0 + $0xa0] sm:$0xff]   ;;  %v1146_v26 = vld [vmem:[%s1336_s0 + $0x48] sm:$0xff]  }
   0xa   :  { %v1147_v27 = vld [vmem:[%s1336_s0 + $0xa8] sm:$0xff]   ;;  %v1148_v28 = vld [vmem:[%s1336_s0 + $0x50] sm:$0xff]   ;;  %v1150_v30 = vld [vmem:[%s1336_s0 + $0x58] sm:$0xff]  }
   0xb   :  { %1045 = vmatpush3.bf16.msra.mxu0 %v1122_v2  ;;  %1114 = vmatpush3.bf16.msra.mxu1 %v1122_v2  ;;  %v1149_v29 = vld [vmem:[%s1336_s0 + $0xb0] sm:$0xff]   ;;  %v1151_v31 = vld [vmem:[%s1336_s0 + $0xb8] sm:$0xff]  }
   0xc   :  { %1046 = vmatprep.subr.bf16.mxu0 %v1123_v3  ;;  %1107 = vmatprep.subr.bf16.mxu1 %v1123_v3 }
   0xf   :  { %1047 = vmatpush3.bf16.msra.mxu0 %v1123_v3  ;;  %1115 = vmatpush3.bf16.msra.mxu1 %v1123_v3 }
  0x10   :  { %1048 = vmatprep.subr.bf16.mxu0 %v1124_v6  ;;  %1108 = vmatprep.subr.bf16.mxu1 %v1124_v6 }
  0x13   :  { %1049 = vmatpush3.bf16.msra.mxu0 %v1124_v6  ;;  %1116 = vmatpush3.bf16.msra.mxu1 %v1124_v6 }
  0x14   :  { %1050 = vmatprep.subr.bf16.mxu0 %v1125_v7  ;;  %1109 = vmatprep.subr.bf16.mxu1 %v1125_v7 }
  0x17   :  { %1051 = vmatpush3.bf16.msra.mxu0 %v1125_v7  ;;  %1117 = vmatpush3.bf16.msra.mxu1 %v1125_v7 }
  0x18   :  { %1052 = vmatprep.subr.bf16.mxu0 %v1126_v8  ;;  %1110 = vmatprep.subr.bf16.mxu1 %v1126_v8 }
  0x1b   :  { %1053 = vmatpush3.bf16.msra.mxu0 %v1126_v8  ;;  %1118 = vmatpush3.bf16.msra.mxu1 %v1126_v8 }
  0x1c   :  { %1054 = vmatprep.subr.bf16.mxu0 %v1127_v9  ;;  %1111 = vmatprep.subr.bf16.mxu1 %v1127_v9 }
  0x1f   :  { %1055 = vmatpush3.bf16.msra.mxu0 %v1127_v9  ;;  %1119 = vmatpush3.bf16.msra.mxu1 %v1127_v9 }
  0x22   :  { %1057 = vmatmul.mubr.bf16.vlgmr.msra.gmra.mrb[0].mxu0 %v1130_v10  ;;  %1081 = vmatmul.mubr.bf16.vlgmr.msra.gmra.mrb[0].mxu1 %v1131_v11 }
  0x23   :  { %1060 = vmatprep.mubr.bf16.mxu0 %v1132_v12  ;;  %1084 = vmatprep.mubr.bf16.mxu1 %v1133_v13 }
  0x2a   :  { %1061 = vmatmul.mubr.bf16.gmra.mrb[4].mxu0 %v1134_v14  ;;  %1085 = vmatmul.mubr.bf16.gmra.mrb[4].mxu1 %v1135_v15 }
  0x2b   :  { %1064 = vmatprep.mubr.bf16.mxu0 %v1136_v16  ;;  %1088 = vmatprep.mubr.bf16.mxu1 %v1137_v17 }
  0x32   :  { %1065 = vmatmul.mubr.bf16.gmra.mrb[8].mxu0 %v1138_v18  ;;  %1089 = vmatmul.mubr.bf16.gmra.mrb[8].mxu1 %v1139_v19 }
  0x33   :  { %1068 = vmatprep.mubr.bf16.mxu0 %v1140_v20  ;;  %1092 = vmatprep.mubr.bf16.mxu1 %v1141_v21 }
  0x3a   :  { %1069 = vmatmul.mubr.bf16.gmra.mrb[12].mxu0 %v1142_v22  ;;  %1093 = vmatmul.mubr.bf16.gmra.mrb[12].mxu1 %v1143_v23 }
  0x3b   :  { %1072 = vmatprep.mubr.bf16.mxu0 %v1144_v24  ;;  %1096 = vmatprep.mubr.bf16.mxu1 %v1145_v25 }
  0x42   :  { %1073 = vmatmul.mubr.bf16.gmra.mrb[16].mxu0 %v1146_v26  ;;  %1097 = vmatmul.mubr.bf16.gmra.mrb[16].mxu1 %v1147_v27 }
  0x43   :  { %1076 = vmatprep.mubr.bf16.mxu0 %v1148_v28  ;;  %1100 = vmatprep.mubr.bf16.mxu1 %v1149_v29 }
  0x4a   :  { %1077 = vmatmul.mubr.bf16.gmra.mrb[20].mxu0 %v1150_v30  ;;  %1101 = vmatmul.mubr.bf16.gmra.mrb[20].mxu1 %v1151_v31 }
  0xf5   :  { %v1058_v32 = vpop.f32.mrb[0].mxu0  ;;  %v1082_v33 = vpop.f32.mrb[0].mxu1 }
  0xf6   :  { %v302_v34 = vpop.f32.mrb[1].mxu0  ;;  %v398_v35 = vpop.f32.mrb[1].mxu1 }
  0xf7   :  { %v1059_v36 = vpop.f32.mrb[2].mxu0  ;;  %v1083_v37 = vpop.f32.mrb[2].mxu1 }
  0xf8   :  { %v873_v38 = vpack.c.bf16 %v1059_v36, %v1058_v32  ;;  %v933_v39 = vpack.c.bf16 %v1083_v37, %v1082_v33  ;;  %v305_v40 = vpop.f32.mrb[3].mxu0  ;;  %v401_v41 = vpop.f32.mrb[3].mxu1 }
  0xf9   :  { %v868_v42 = vpack.c.bf16 %v305_v40, %v302_v34  ;;  %v928_v43 = vpack.c.bf16 %v401_v41, %v398_v35 }
  0xfa   :  { %985 = vst [vmem:[%s1337_s2 + $0x8] sm:$0xff] %v873_v38   ;;  %997 = vst [vmem:[%s1337_s2 + $0x68] sm:$0xff] %v933_v39  }
  0xfb   :  { %869 = vst [vmem:[%s1337_s2] sm:$0xff] %v868_v42   ;;  %996 = vst [vmem:[%s1337_s2 + $0x60] sm:$0xff] %v928_v43  }
  0xfd   :  { %v1062_v44 = vpop.f32.mrb[4].mxu0  ;;  %v1086_v45 = vpop.f32.mrb[4].mxu1 }
  0xfe   :  { %v318_v46 = vpop.f32.mrb[5].mxu0  ;;  %v414_v47 = vpop.f32.mrb[5].mxu1 }
  0xff   :  { %v1063_v48 = vpop.f32.mrb[6].mxu0  ;;  %v1087_v49 = vpop.f32.mrb[6].mxu1 }
 0x100   :  { %v883_v50 = vpack.c.bf16 %v1063_v48, %v1062_v44  ;;  %v943_v51 = vpack.c.bf16 %v1087_v49, %v1086_v45  ;;  %v321_v52 = vpop.f32.mrb[7].mxu0  ;;  %v417_v53 = vpop.f32.mrb[7].mxu1 }
 0x101   :  { %v878_v54 = vpack.c.bf16 %v321_v52, %v318_v46  ;;  %v938_v55 = vpack.c.bf16 %v417_v53, %v414_v47 }
 0x102   :  { %987 = vst [vmem:[%s1337_s2 + $0x18] sm:$0xff] %v883_v50   ;;  %999 = vst [vmem:[%s1337_s2 + $0x78] sm:$0xff] %v943_v51  }
 0x103   :  { %986 = vst [vmem:[%s1337_s2 + $0x10] sm:$0xff] %v878_v54   ;;  %998 = vst [vmem:[%s1337_s2 + $0x70] sm:$0xff] %v938_v55  }
 0x105   :  { %v1066_v56 = vpop.f32.mrb[8].mxu0  ;;  %v1090_v57 = vpop.f32.mrb[8].mxu1 }
 0x106   :  { %v334_v58 = vpop.f32.mrb[9].mxu0  ;;  %v430_v59 = vpop.f32.mrb[9].mxu1 }
 0x107   :  { %v1067_v60 = vpop.f32.mrb[10].mxu0  ;;  %v1091_v61 = vpop.f32.mrb[10].mxu1 }
 0x108   :  { %v893_v62 = vpack.c.bf16 %v1067_v60, %v1066_v56  ;;  %v953_v63 = vpack.c.bf16 %v1091_v61, %v1090_v57  ;;  %v337_v0 = vpop.f32.mrb[11].mxu0  ;;  %v433_v1 = vpop.f32.mrb[11].mxu1 }
 0x109   :  { %v888_v2 = vpack.c.bf16 %v337_v0, %v334_v58  ;;  %v948_v3 = vpack.c.bf16 %v433_v1, %v430_v59 }
 0x10a   :  { %989 = vst [vmem:[%s1337_s2 + $0x28] sm:$0xff] %v893_v62   ;;  %1001 = vst [vmem:[%s1337_s2 + $0x88] sm:$0xff] %v953_v63  }
 0x10b   :  { %988 = vst [vmem:[%s1337_s2 + $0x20] sm:$0xff] %v888_v2   ;;  %1000 = vst [vmem:[%s1337_s2 + $0x80] sm:$0xff] %v948_v3  }
 0x10d   :  { %v1070_v4 = vpop.f32.mrb[12].mxu0  ;;  %v1094_v5 = vpop.f32.mrb[12].mxu1 }
 0x10e   :  { %v350_v6 = vpop.f32.mrb[13].mxu0  ;;  %v446_v7 = vpop.f32.mrb[13].mxu1 }
 0x10f   :  { %v1071_v8 = vpop.f32.mrb[14].mxu0  ;;  %v1095_v9 = vpop.f32.mrb[14].mxu1 }
 0x110   :  { %v903_v10 = vpack.c.bf16 %v1071_v8, %v1070_v4  ;;  %v963_v11 = vpack.c.bf16 %v1095_v9, %v1094_v5  ;;  %v353_v12 = vpop.f32.mrb[15].mxu0  ;;  %v449_v13 = vpop.f32.mrb[15].mxu1 }
 0x111   :  { %v898_v14 = vpack.c.bf16 %v353_v12, %v350_v6  ;;  %v958_v15 = vpack.c.bf16 %v449_v13, %v446_v7 }
 0x112   :  { %991 = vst [vmem:[%s1337_s2 + $0x38] sm:$0xff] %v903_v10   ;;  %1003 = vst [vmem:[%s1337_s2 + $0x98] sm:$0xff] %v963_v11  }
 0x113   :  { %990 = vst [vmem:[%s1337_s2 + $0x30] sm:$0xff] %v898_v14   ;;  %1002 = vst [vmem:[%s1337_s2 + $0x90] sm:$0xff] %v958_v15  }
 0x115   :  { %v1074_v16 = vpop.f32.mrb[16].mxu0  ;;  %v1098_v17 = vpop.f32.mrb[16].mxu1 }
 0x116   :  { %v366_v18 = vpop.f32.mrb[17].mxu0  ;;  %v462_v19 = vpop.f32.mrb[17].mxu1 }
 0x117   :  { %v1075_v20 = vpop.f32.mrb[18].mxu0  ;;  %v1099_v21 = vpop.f32.mrb[18].mxu1 }
 0x118   :  { %v913_v22 = vpack.c.bf16 %v1075_v20, %v1074_v16  ;;  %v973_v23 = vpack.c.bf16 %v1099_v21, %v1098_v17  ;;  %v369_v24 = vpop.f32.mrb[19].mxu0  ;;  %v465_v25 = vpop.f32.mrb[19].mxu1 }
 0x119   :  { %v908_v26 = vpack.c.bf16 %v369_v24, %v366_v18  ;;  %v968_v27 = vpack.c.bf16 %v465_v25, %v462_v19 }
 0x11a   :  { %993 = vst [vmem:[%s1337_s2 + $0x48] sm:$0xff] %v913_v22   ;;  %1005 = vst [vmem:[%s1337_s2 + $0xa8] sm:$0xff] %v973_v23  }
 0x11b   :  { %992 = vst [vmem:[%s1337_s2 + $0x40] sm:$0xff] %v908_v26   ;;  %1004 = vst [vmem:[%s1337_s2 + $0xa0] sm:$0xff] %v968_v27  }
 0x11d   :  { %v1078_v28 = vpop.f32.mrb[20].mxu0  ;;  %v1102_v29 = vpop.f32.mrb[20].mxu1 }
 0x11e   :  { %v382_v30 = vpop.f32.mrb[21].mxu0  ;;  %v478_v31 = vpop.f32.mrb[21].mxu1 }
 0x11f   :  { %v1079_v32 = vpop.f32.mrb[22].mxu0  ;;  %v1103_v33 = vpop.f32.mrb[22].mxu1 }
 0x120   :  { %v923_v34 = vpack.c.bf16 %v1079_v32, %v1078_v28  ;;  %v983_v35 = vpack.c.bf16 %v1103_v33, %v1102_v29  ;;  %v385_v36 = vpop.f32.mrb[23].mxu0  ;;  %v481_v37 = vpop.f32.mrb[23].mxu1 }
 0x121   :  { %v918_v38 = vpack.c.bf16 %v385_v36, %v382_v30  ;;  %v978_v39 = vpack.c.bf16 %v481_v37, %v478_v31 }
 0x122   :  { %995 = vst [vmem:[%s1337_s2 + $0x58] sm:$0xff] %v923_v34   ;;  %1007 = vst [vmem:[%s1337_s2 + $0xb8] sm:$0xff] %v983_v35  }
 0x123   :  { %994 = vst [vmem:[%s1337_s2 + $0x50] sm:$0xff] %v918_v38   ;;  %1006 = vst [vmem:[%s1337_s2 + $0xb0] sm:$0xff] %v978_v39  }

// kernel: graph_matrix_completion_forward.8
= control target key start
LH: loop header
LB: loop body
LE: loop exit
PB: predicated region body
PF: predicated region fallthrough
CT: control target
= control target key end

     0   :  { %s4366_s4 = inlined_call_operand.vmem [shape: bf16[128,128], index: 4, kind: input, shape index: {}]   ;;  %s4367_s3 = inlined_call_operand.vmem [shape: bf16[384,128], index: 3, kind: input, shape index: {}]   ;;  %s4368_s2 = inlined_call_operand.vmem [shape: bf16[2,128,128], index: 2, kind: input, shape index: {}]   ;;  %s4369_s1 = inlined_call_operand.vmem [shape: bf16[256,128], index: 1, kind: input, shape index: {}]   ;;  %s4370_s0 = inlined_call_operand.vmem [shape: bf16[2,384,256], index: 0, kind: input, shape index: {}]   ;;  %s4371_s5 = inlined_call_operand.vmem [shape: bf16[384,128], index: 5, kind: output, shape index: {}]  }
   0x1   :  { %v3399_v0 = vld [vmem:[%s4366_s4] sm:$0xff]   ;;  %v3400_v1 = vld [vmem:[%s4366_s4 + $0x8] sm:$0xff]   ;;  %v3401_v2 = vld [vmem:[%s4366_s4 + $0x10] sm:$0xff]  }
   0x2   :  { %3222 = vmatprep.subr.bf16.mxu0 %v3399_v0  ;;  %3382 = vmatprep.subr.bf16.mxu1 %v3399_v0  ;;  %v3402_v3 = vld [vmem:[%s4366_s4 + $0x18] sm:$0xff]   ;;  %v3407_v4 = vld [vmem:[%s4367_s3] sm:$0xff]   ;;  %v3404_v7 = vld [vmem:[%s4366_s4 + $0x28] sm:$0xff]  }
   0x3   :  { %3223 = vmatpush3.bf16.msra.mxu0 %v3399_v0  ;;  %3390 = vmatpush3.bf16.msra.mxu1 %v3399_v0  ;;  %v3408_v5 = vld [vmem:[%s4367_s3 + $0x60] sm:$0xff]   ;;  %v3405_v8 = vld [vmem:[%s4366_s4 + $0x30] sm:$0xff]   ;;  %v3406_v9 = vld [vmem:[%s4366_s4 + $0x38] sm:$0xff]   ;;  %v3607_v0 = vmov 0  }
   0x4   :  { %3224 = vmatprep.subr.bf16.mxu0 %v3400_v1  ;;  %3383 = vmatprep.subr.bf16.mxu1 %v3400_v1  ;;  %v3403_v6 = vld [vmem:[%s4366_s4 + $0x20] sm:$0xff]   ;;  %v3409_v11 = vld [vmem:[%s4367_s3 + $0x8] sm:$0xff]   ;;  %v3414_v15 = vld [vmem:[%s4367_s3 + $0x10] sm:$0xff]  }
   0x5   :  { %3238 = vmatprep.mubr.bf16.mxu0 %v3407_v4  ;;  %3262 = vmatprep.mubr.bf16.mxu1 %v3408_v5  ;;  %v3411_v10 = vld [vmem:[%s4368_s2] sm:$0xff]   ;;  %v3410_v13 = vld [vmem:[%s4367_s3 + $0x68] sm:$0xff]   ;;  %v3415_v16 = vld [vmem:[%s4367_s3 + $0x70] sm:$0xff]  }
   0x6   :  { %v3412_v12 = vld [vmem:[%s4368_s2 + $0x40] sm:$0xff]   ;;  %v3413_v14 = vld [vmem:[%s4368_s2 + $0x8] sm:$0xff]   ;;  %v3419_v18 = vld [vmem:[%s4368_s2 + $0x10] sm:$0xff]  }
   0x7   :  { %3225 = vmatpush3.bf16.msra.mxu0 %v3400_v1  ;;  %3391 = vmatpush3.bf16.msra.mxu1 %v3400_v1  ;;  %v3418_v17 = vld [vmem:[%s4368_s2 + $0x48] sm:$0xff]   ;;  %v3416_v19 = vld [vmem:[%s4367_s3 + $0x18] sm:$0xff]   ;;  %v3420_v20 = vld [vmem:[%s4368_s2 + $0x50] sm:$0xff]  }
   0x8   :  { %3226 = vmatprep.subr.bf16.mxu0 %v3401_v2  ;;  %3384 = vmatprep.subr.bf16.mxu1 %v3401_v2  ;;  %v3417_v21 = vld [vmem:[%s4367_s3 + $0x78] sm:$0xff]   ;;  %v3421_v22 = vld [vmem:[%s4367_s3 + $0x20] sm:$0xff]   ;;  %v3423_v26 = vld [vmem:[%s4367_s3 + $0x28] sm:$0xff]  }
   0x9   :  { %v3422_v23 = vld [vmem:[%s4367_s3 + $0x80] sm:$0xff]   ;;  %v3425_v24 = vld [vmem:[%s4368_s2 + $0x18] sm:$0xff]   ;;  %v3424_v27 = vld [vmem:[%s4367_s3 + $0x88] sm:$0xff]  }
   0xa   :  { %v3426_v25 = vld [vmem:[%s4368_s2 + $0x58] sm:$0xff]   ;;  %v3431_v28 = vld [vmem:[%s4368_s2 + $0x20] sm:$0xff]   ;;  %v3427_v30 = vld [vmem:[%s4367_s3 + $0x30] sm:$0xff]  }
   0xb   :  { %3227 = vmatpush3.bf16.msra.mxu0 %v3401_v2  ;;  %3392 = vmatpush3.bf16.msra.mxu1 %v3401_v2  ;;  %v3432_v29 = vld [vmem:[%s4368_s2 + $0x60] sm:$0xff]   ;;  %v3428_v31 = vld [vmem:[%s4367_s3 + $0x90] sm:$0xff]   ;;  %v3433_v32 = vld [vmem:[%s4368_s2 + $0x28] sm:$0xff]  }
   0xc   :  { %3228 = vmatprep.subr.bf16.mxu0 %v3402_v3  ;;  %3385 = vmatprep.subr.bf16.mxu1 %v3402_v3  ;;  %v3438_v33 = vld [vmem:[%s4368_s2 + $0x68] sm:$0xff]   ;;  %v3429_v34 = vld [vmem:[%s4367_s3 + $0x38] sm:$0xff]   ;;  %v3439_v36 = vld [vmem:[%s4368_s2 + $0x30] sm:$0xff]  }
   0xd   :  { %v3430_v35 = vld [vmem:[%s4367_s3 + $0x98] sm:$0xff]   ;;  %v3440_v37 = vld [vmem:[%s4368_s2 + $0x70] sm:$0xff]   ;;  %v3434_v38 = vld [vmem:[%s4367_s3 + $0x40] sm:$0xff]  }
   0xe   :  { %v3435_v39 = vld [vmem:[%s4367_s3 + $0xa0] sm:$0xff]   ;;  %v3445_v40 = vld [vmem:[%s4368_s2 + $0x38] sm:$0xff]   ;;  %v3436_v42 = vld [vmem:[%s4367_s3 + $0x48] sm:$0xff]  }
   0xf   :  { %3229 = vmatpush3.bf16.msra.mxu0 %v3402_v3  ;;  %3393 = vmatpush3.bf16.msra.mxu1 %v3402_v3  ;;  %v3446_v41 = vld [vmem:[%s4368_s2 + $0x78] sm:$0xff]   ;;  %v3437_v43 = vld [vmem:[%s4367_s3 + $0xa8] sm:$0xff]   ;;  %v3441_v44 = vld [vmem:[%s4367_s3 + $0x50] sm:$0xff]  }
  0x10   :  { %3230 = vmatprep.subr.bf16.mxu0 %v3403_v6  ;;  %3386 = vmatprep.subr.bf16.mxu1 %v3403_v6  ;;  %v3442_v45 = vld [vmem:[%s4367_s3 + $0xb0] sm:$0xff]   ;;  %v3443_v46 = vld [vmem:[%s4367_s3 + $0x58] sm:$0xff]   ;;  %v3447_v48 = vld [vmem:[%s4369_s1] sm:$0xff]  }
  0x11   :  { %v3444_v47 = vld [vmem:[%s4367_s3 + $0xb8] sm:$0xff]   ;;  %v3448_v49 = vld [vmem:[%s4369_s1 + $0x8] sm:$0xff]   ;;  %v3449_v50 = vld [vmem:[%s4369_s1 + $0x10] sm:$0xff]  }
  0x12   :  { %v3450_v51 = vld [vmem:[%s4369_s1 + $0x18] sm:$0xff]   ;;  %v3451_v52 = vld [vmem:[%s4369_s1 + $0x20] sm:$0xff]   ;;  %v3452_v53 = vld [vmem:[%s4369_s1 + $0x28] sm:$0xff]  }
  0x13   :  { %3231 = vmatpush3.bf16.msra.mxu0 %v3403_v6  ;;  %3394 = vmatpush3.bf16.msra.mxu1 %v3403_v6  ;;  %v3453_v54 = vld [vmem:[%s4369_s1 + $0x30] sm:$0xff]   ;;  %v3454_v55 = vld [vmem:[%s4369_s1 + $0x38] sm:$0xff]   ;;  %v3455_v56 = vld [vmem:[%s4369_s1 + $0x40] sm:$0xff]  }
  0x14   :  { %3232 = vmatprep.subr.bf16.mxu0 %v3404_v7  ;;  %3387 = vmatprep.subr.bf16.mxu1 %v3404_v7  ;;  %v3456_v57 = vld [vmem:[%s4369_s1 + $0x48] sm:$0xff]   ;;  %v3457_v58 = vld [vmem:[%s4369_s1 + $0x50] sm:$0xff]   ;;  %v3458_v59 = vld [vmem:[%s4369_s1 + $0x58] sm:$0xff]  }
  0x15   :  { %v3459_v60 = vld [vmem:[%s4369_s1 + $0x60] sm:$0xff]   ;;  %v3460_v61 = vld [vmem:[%s4369_s1 + $0x68] sm:$0xff]   ;;  %v3461_v62 = vld [vmem:[%s4369_s1 + $0x70] sm:$0xff]  }
  0x16   :  { %v3462_v63 = vld [vmem:[%s4369_s1 + $0x78] sm:$0xff]   ;;  %v3465_v1 = vld [vmem:[%s4370_s0 + $0x4] ss:$8 sps:$4 sm:$0xff]  }
  0x17   :  { %3233 = vmatpush3.bf16.msra.mxu0 %v3404_v7  ;;  %3395 = vmatpush3.bf16.msra.mxu1 %v3404_v7  ;;  %v3468_v2 = vld [vmem:[%s4370_s0 + $0x184] ss:$8 sps:$4 sm:$0xff]  }
  0x18   :  { %3234 = vmatprep.subr.bf16.mxu0 %v3405_v8  ;;  %3388 = vmatprep.subr.bf16.mxu1 %v3405_v8 }
  0x1b   :  { %3235 = vmatpush3.bf16.msra.mxu0 %v3405_v8  ;;  %3396 = vmatpush3.bf16.msra.mxu1 %v3405_v8 }
  0x1c   :  { %3236 = vmatprep.subr.bf16.mxu0 %v3406_v9  ;;  %3389 = vmatprep.subr.bf16.mxu1 %v3406_v9 }
  0x1f   :  { %3237 = vmatpush3.bf16.msra.mxu0 %v3406_v9  ;;  %3397 = vmatpush3.bf16.msra.mxu1 %v3406_v9 }
  0x20   :  { %3286 = vmatprep.subr.bf16.mxu1 %v3411_v10  ;;  %3334 = vmatprep.subr.bf16.mxu0 %v3412_v12 }
  0x22   :  { %3239 = vmatmul.mubr.bf16.vlgmr.msra.gmra.mrb[0].mxu0 %v3409_v11  ;;  %3263 = vmatmul.mubr.bf16.vlgmr.msra.gmra.mrb[0].mxu1 %v3410_v13 }
  0x23   :  { %3287 = vmatpush3.bf16.msra.mxu1 %v3411_v10  ;;  %3335 = vmatpush3.bf16.msra.mxu0 %v3412_v12 }
  0x24   :  { %3288 = vmatprep.subr.bf16.mxu1 %v3413_v14  ;;  %3242 = vmatprep.mubr.bf16.mxu0 %v3414_v15 }
  0x25   :  { %3266 = vmatprep.mubr.bf16.mxu1 %v3415_v16  ;;  %3336 = vmatprep.subr.bf16.mxu0 %v3418_v17 }
  0x27   :  { %3289 = vmatpush3.bf16.msra.mxu1 %v3413_v14  ;;  %3337 = vmatpush3.bf16.msra.mxu0 %v3418_v17 }
  0x28   :  { %3290 = vmatprep.subr.bf16.mxu1 %v3419_v18  ;;  %3338 = vmatprep.subr.bf16.mxu0 %v3420_v20 }
  0x2a   :  { %3243 = vmatmul.mubr.bf16.gmra.mrb[4].mxu0 %v3416_v19  ;;  %3267 = vmatmul.mubr.bf16.gmra.mrb[4].mxu1 %v3417_v21 }
  0x2b   :  { %3291 = vmatpush3.bf16.msra.mxu1 %v3419_v18  ;;  %3246 = vmatprep.mubr.bf16.mxu0 %v3421_v22 }
  0x2c   :  { %3270 = vmatprep.mubr.bf16.mxu1 %v3422_v23  ;;  %3339 = vmatpush3.bf16.msra.mxu0 %v3420_v20 }
  0x2d   :  { %3292 = vmatprep.subr.bf16.mxu1 %v3425_v24  ;;  %3340 = vmatprep.subr.bf16.mxu0 %v3426_v25 }
  0x2f   :  { %3293 = vmatpush3.bf16.msra.mxu1 %v3425_v24 }
  0x30   :  { %3341 = vmatpush3.bf16.msra.mxu0 %v3426_v25  ;;  %3294 = vmatprep.subr.bf16.mxu1 %v3431_v28 }
  0x31   :  { %3342 = vmatprep.subr.bf16.mxu0 %v3432_v29 }
  0x32   :  { %3247 = vmatmul.mubr.bf16.gmra.mrb[8].mxu0 %v3423_v26  ;;  %3271 = vmatmul.mubr.bf16.gmra.mrb[8].mxu1 %v3424_v27 }
  0x33   :  { %3250 = vmatprep.mubr.bf16.mxu0 %v3427_v30  ;;  %3274 = vmatprep.mubr.bf16.mxu1 %v3428_v31 }
  0x34   :  { %3295 = vmatpush3.bf16.msra.mxu1 %v3431_v28  ;;  %3343 = vmatpush3.bf16.msra.mxu0 %v3432_v29 }
  0x35   :  { %3296 = vmatprep.subr.bf16.mxu1 %v3433_v32  ;;  %3344 = vmatprep.subr.bf16.mxu0 %v3438_v33 }
  0x38   :  { %3297 = vmatpush3.bf16.msra.mxu1 %v3433_v32  ;;  %3345 = vmatpush3.bf16.msra.mxu0 %v3438_v33 }
  0x39   :  { %3298 = vmatprep.subr.bf16.mxu1 %v3439_v36  ;;  %3346 = vmatprep.subr.bf16.mxu0 %v3440_v37 }
  0x3a   :  { %3251 = vmatmul.mubr.bf16.gmra.mrb[12].mxu0 %v3429_v34  ;;  %3275 = vmatmul.mubr.bf16.gmra.mrb[12].mxu1 %v3430_v35 }
  0x3b   :  { %3254 = vmatprep.mubr.bf16.mxu0 %v3434_v38  ;;  %3278 = vmatprep.mubr.bf16.mxu1 %v3435_v39 }
  0x3c   :  { %3299 = vmatpush3.bf16.msra.mxu1 %v3439_v36  ;;  %3347 = vmatpush3.bf16.msra.mxu0 %v3440_v37 }
  0x3d   :  { %3300 = vmatprep.subr.bf16.mxu1 %v3445_v40  ;;  %3348 = vmatprep.subr.bf16.mxu0 %v3446_v41 }
  0x40   :  { %3301 = vmatpush3.bf16.msra.mxu1 %v3445_v40  ;;  %3349 = vmatpush3.bf16.msra.mxu0 %v3446_v41 }
  0x41   :  { %1259 = vmatprep.subr.bf16.mxu1 %v3607_v0  ;;  %2063 = vmatprep.subr.bf16.mxu0 %v3607_v0 }
  0x42   :  { %3255 = vmatmul.mubr.bf16.gmra.mrb[16].mxu0 %v3436_v42  ;;  %3279 = vmatmul.mubr.bf16.gmra.mrb[16].mxu1 %v3437_v43 }
  0x43   :  { %3258 = vmatprep.mubr.bf16.mxu0 %v3441_v44  ;;  %3282 = vmatprep.mubr.bf16.mxu1 %v3442_v45 }
  0x4a   :  { %3259 = vmatmul.mubr.bf16.gmra.mrb[20].mxu0 %v3443_v46  ;;  %3283 = vmatmul.mubr.bf16.gmra.mrb[20].mxu1 %v3444_v47 }
  0x4b   :  { %3302 = vmatprep.mubr.bf16.mxu1 %v3447_v48  ;;  %3350 = vmatprep.mubr.bf16.mxu0 %v3447_v48 }
  0x52   :  { %3303 = vmatmul.mubr.bf16.vlgmr.msra.gmra.mrb[24].mxu1 %v3448_v49  ;;  %3351 = vmatmul.mubr.bf16.vlgmr.msra.gmra.mrb[24].mxu0 %v3448_v49 }
  0x53   :  { %3306 = vmatprep.mubr.bf16.mxu1 %v3449_v50  ;;  %3354 = vmatprep.mubr.bf16.mxu0 %v3449_v50 }
  0x5a   :  { %3307 = vmatmul.mubr.bf16.gmra.mrb[28].mxu1 %v3450_v51  ;;  %3355 = vmatmul.mubr.bf16.gmra.mrb[28].mxu0 %v3450_v51 }
  0x5b   :  { %3310 = vmatprep.mubr.bf16.mxu1 %v3451_v52  ;;  %3358 = vmatprep.mubr.bf16.mxu0 %v3451_v52 }
  0x62   :  { %3311 = vmatmul.mubr.bf16.gmra.mrb[32].mxu1 %v3452_v53  ;;  %3359 = vmatmul.mubr.bf16.gmra.mrb[32].mxu0 %v3452_v53 }
  0x63   :  { %3314 = vmatprep.mubr.bf16.mxu1 %v3453_v54  ;;  %3362 = vmatprep.mubr.bf16.mxu0 %v3453_v54 }
  0x6a   :  { %3315 = vmatmul.mubr.bf16.gmra.mrb[36].mxu1 %v3454_v55  ;;  %3363 = vmatmul.mubr.bf16.gmra.mrb[36].mxu0 %v3454_v55 }
  0x6b   :  { %3318 = vmatprep.mubr.bf16.mxu1 %v3455_v56  ;;  %3366 = vmatprep.mubr.bf16.mxu0 %v3455_v56 }
  0x72   :  { %3319 = vmatmul.mubr.bf16.gmra.mrb[40].mxu1 %v3456_v57  ;;  %3367 = vmatmul.mubr.bf16.gmra.mrb[40].mxu0 %v3456_v57 }
  0x73   :  { %3322 = vmatprep.mubr.bf16.mxu1 %v3457_v58  ;;  %3370 = vmatprep.mubr.bf16.mxu0 %v3457_v58 }
  0x7a   :  { %3323 = vmatmul.mubr.bf16.gmra.mrb[44].mxu1 %v3458_v59  ;;  %3371 = vmatmul.mubr.bf16.gmra.mrb[44].mxu0 %v3458_v59 }
  0x7b   :  { %3326 = vmatprep.mubr.bf16.mxu1 %v3459_v60  ;;  %3374 = vmatprep.mubr.bf16.mxu0 %v3459_v60 }
  0x82   :  { %3327 = vmatmul.mubr.bf16.gmra.mrb[48].mxu1 %v3460_v61  ;;  %3375 = vmatmul.mubr.bf16.gmra.mrb[48].mxu0 %v3460_v61 }
  0x83   :  { %3330 = vmatprep.mubr.bf16.mxu1 %v3461_v62  ;;  %3378 = vmatprep.mubr.bf16.mxu0 %v3461_v62 }
  0x8a   :  { %3331 = vmatmul.mubr.bf16.gmra.mrb[52].mxu1 %v3462_v63  ;;  %3379 = vmatmul.mubr.bf16.gmra.mrb[52].mxu0 %v3462_v63 }
  0x8b   :  { %1291 = vmatprep.mubr.bf16.mxu1 %v3465_v1  ;;  %2095 = vmatprep.mubr.bf16.mxu0 %v3468_v2 }
  0xf5   :  { %v3838_v3 = vpop.f32.mrb[0].mxu0  ;;  %v3840_v4 = vpop.f32.mrb[0].mxu1 }
  0xf6   :  { %v3842_v5 = vpop.f32.mrb[1].mxu0  ;;  %v3844_v6 = vpop.f32.mrb[1].mxu1 }
  0xf7   :  { %v3846_v7 = vpop.f32.mrb[2].mxu0  ;;  %v3848_v8 = vpop.f32.mrb[2].mxu1 }
  0xf8   :  { %v3850_v9 = vpop.f32.mrb[3].mxu0  ;;  %v3852_v10 = vpop.f32.mrb[3].mxu1 }
  0xfd   :  { %v3854_v11 = vpop.f32.mrb[4].mxu0  ;;  %v3856_v12 = vpop.f32.mrb[4].mxu1 }
  0xfe   :  { %v3858_v13 = vpop.f32.mrb[5].mxu0  ;;  %v3860_v14 = vpop.f32.mrb[5].mxu1 }
  0xff   :  { %v3862_v15 = vpop.f32.mrb[6].mxu0  ;;  %v3864_v16 = vpop.f32.mrb[6].mxu1 }
 0x100   :  { %v3866_v17 = vpop.f32.mrb[7].mxu0  ;;  %v3868_v18 = vpop.f32.mrb[7].mxu1 }
 0x105   :  { %v3870_v19 = vpop.f32.mrb[8].mxu0  ;;  %v3872_v20 = vpop.f32.mrb[8].mxu1 }
 0x106   :  { %v3874_v21 = vpop.f32.mrb[9].mxu0  ;;  %v3876_v22 = vpop.f32.mrb[9].mxu1 }
 0x107   :  { %v3878_v23 = vpop.f32.mrb[10].mxu0  ;;  %v3880_v24 = vpop.f32.mrb[10].mxu1 }
 0x108   :  { %v3882_v25 = vpop.f32.mrb[11].mxu0  ;;  %v3884_v26 = vpop.f32.mrb[11].mxu1 }
 0x10d   :  { %v3886_v27 = vpop.f32.mrb[12].mxu0  ;;  %v3888_v28 = vpop.f32.mrb[12].mxu1 }
 0x10e   :  { %v3890_v29 = vpop.f32.mrb[13].mxu0  ;;  %v3892_v30 = vpop.f32.mrb[13].mxu1 }
 0x10f   :  { %v3894_v31 = vpop.f32.mrb[14].mxu0  ;;  %v3896_v32 = vpop.f32.mrb[14].mxu1 }
 0x110   :  { %v3898_v33 = vpop.f32.mrb[15].mxu0  ;;  %v3900_v34 = vpop.f32.mrb[15].mxu1 }
 0x115   :  { %v3902_v35 = vpop.f32.mrb[16].mxu0  ;;  %v3904_v36 = vpop.f32.mrb[16].mxu1 }
 0x116   :  { %v3906_v37 = vpop.f32.mrb[17].mxu0  ;;  %v3908_v38 = vpop.f32.mrb[17].mxu1 }
 0x117   :  { %v3910_v39 = vpop.f32.mrb[18].mxu0  ;;  %v3912_v40 = vpop.f32.mrb[18].mxu1 }
 0x118   :  { %v3914_v41 = vpop.f32.mrb[19].mxu0  ;;  %v3916_v42 = vpop.f32.mrb[19].mxu1 }
 0x11d   :  { %v3918_v43 = vpop.f32.mrb[20].mxu0  ;;  %v3920_v44 = vpop.f32.mrb[20].mxu1 }
 0x11e   :  { %4372 = vst [vmem:[#allocation3_spill] sm:$0xff] %v3920_v44  ;;  %v3922_v45 = vpop.f32.mrb[21].mxu0  ;;  %v3924_v46 = vpop.f32.mrb[21].mxu1 }
 0x11f   :  { %4373 = vst [vmem:[#allocation4_spill] sm:$0xff] %v3924_v46  ;;  %v3926_v47 = vpop.f32.mrb[22].mxu0  ;;  %v3928_v48 = vpop.f32.mrb[22].mxu1 }
 0x120   :  { %4374 = vst [vmem:[#allocation5_spill] sm:$0xff] %v3928_v48  ;;  %v3930_v49 = vpop.f32.mrb[23].mxu0  ;;  %v3932_v50 = vpop.f32.mrb[23].mxu1 }
 0x121   :  { %4375 = vst [vmem:[#allocation6_spill] sm:$0xff] %v3932_v50 }
 0x125   :  { %v3304_v51 = vpop.f32.mrb[24].mxu1  ;;  %v3352_v52 = vpop.f32.mrb[24].mxu0 }
 0x126   :  { %v828_v53 = vpop.f32.mrb[25].mxu1  ;;  %v1631_v54 = vpop.f32.mrb[25].mxu0 }
 0x127   :  { %v3305_v55 = vpop.f32.mrb[26].mxu1  ;;  %v3353_v56 = vpop.f32.mrb[26].mxu0 }
 0x128   :  { %v956_v57 = vpack.c.bf16 %v3305_v55, %v3304_v51  ;;  %v1759_v58 = vpack.c.bf16 %v3353_v56, %v3352_v52  ;;  %v831_v59 = vpop.f32.mrb[27].mxu1  ;;  %v1634_v60 = vpop.f32.mrb[27].mxu0 }
 0x129   :  { %v955_v61 = vpack.c.bf16 %v831_v59, %v828_v53  ;;  %v1758_v62 = vpack.c.bf16 %v1634_v60, %v1631_v54 }
 0x12b   :  { %1260 = vmatpush1.bf16.msra.mxu1 %v955_v61  ;;  %2064 = vmatpush1.bf16.msra.mxu0 %v1758_v62 }
 0x12c   :  { %1261 = vmatprep.subr.bf16.mxu1 %v3607_v0  ;;  %2065 = vmatprep.subr.bf16.mxu0 %v3607_v0 }
 0x12d   :  { %v3308_v63 = vpop.f32.mrb[28].mxu1  ;;  %v3356_v1 = vpop.f32.mrb[28].mxu0 }
 0x12e   :  { %v844_v2 = vpop.f32.mrb[29].mxu1  ;;  %v1647_v48 = vpop.f32.mrb[29].mxu0 }
 0x12f   :  { %v3309_v44 = vpop.f32.mrb[30].mxu1  ;;  %1262 = vmatpush1.bf16.msra.mxu1 %v956_v57  ;;  %v3357_v50 = vpop.f32.mrb[30].mxu0  ;;  %2066 = vmatpush1.bf16.msra.mxu0 %v1759_v58 }
 0x130   :  { %v958_v51 = vpack.c.bf16 %v3309_v44, %v3308_v63  ;;  %v1761_v52 = vpack.c.bf16 %v3357_v50, %v3356_v1  ;;  %v847_v55 = vpop.f32.mrb[31].mxu1  ;;  %v1650_v56 = vpop.f32.mrb[31].mxu0  ;;  %1263 = vmatprep.subr.bf16.mxu1 %v3607_v0  ;;  %2067 = vmatprep.subr.bf16.mxu0 %v3607_v0 }
 0x131   :  { %v957_v53 = vpack.c.bf16 %v847_v55, %v844_v2  ;;  %v1760_v54 = vpack.c.bf16 %v1650_v56, %v1647_v48 }
 0x133   :  { %1264 = vmatpush1.bf16.msra.mxu1 %v957_v53  ;;  %2068 = vmatpush1.bf16.msra.mxu0 %v1760_v54 }
 0x134   :  { %1265 = vmatprep.subr.bf16.mxu1 %v3607_v0  ;;  %2069 = vmatprep.subr.bf16.mxu0 %v3607_v0 }
 0x135   :  { %v3312_v59 = vpop.f32.mrb[32].mxu1  ;;  %v3360_v57 = vpop.f32.mrb[32].mxu0 }
 0x136   :  { %v860_v60 = vpop.f32.mrb[33].mxu1  ;;  %v1663_v58 = vpop.f32.mrb[33].mxu0 }
 0x137   :  { %v3313_v44 = vpop.f32.mrb[34].mxu1  ;;  %1266 = vmatpush1.bf16.msra.mxu1 %v958_v51  ;;  %v3361_v50 = vpop.f32.mrb[34].mxu0  ;;  %2070 = vmatpush1.bf16.msra.mxu0 %v1761_v52 }
 0x138   :  { %v960_v61 = vpack.c.bf16 %v3313_v44, %v3312_v59  ;;  %v1763_v62 = vpack.c.bf16 %v3361_v50, %v3360_v57  ;;  %v863_v63 = vpop.f32.mrb[35].mxu1  ;;  %v1666_v1 = vpop.f32.mrb[35].mxu0  ;;  %1267 = vmatprep.subr.bf16.mxu1 %v3607_v0  ;;  %2071 = vmatprep.subr.bf16.mxu0 %v3607_v0 }
 0x139   :  { %v959_v48 = vpack.c.bf16 %v863_v63, %v860_v60  ;;  %v1762_v2 = vpack.c.bf16 %v1666_v1, %v1663_v58 }
 0x13b   :  { %1268 = vmatpush1.bf16.msra.mxu1 %v959_v48  ;;  %2072 = vmatpush1.bf16.msra.mxu0 %v1762_v2 }
 0x13c   :  { %1269 = vmatprep.subr.bf16.mxu1 %v3607_v0  ;;  %2073 = vmatprep.subr.bf16.mxu0 %v3607_v0 }
 0x13d   :  { %v3316_v55 = vpop.f32.mrb[36].mxu1  ;;  %v3364_v51 = vpop.f32.mrb[36].mxu0 }
 0x13e   :  { %v876_v56 = vpop.f32.mrb[37].mxu1  ;;  %v1679_v52 = vpop.f32.mrb[37].mxu0 }
 0x13f   :  { %v3317_v53 = vpop.f32.mrb[38].mxu1  ;;  %1270 = vmatpush1.bf16.msra.mxu1 %v960_v61  ;;  %v3365_v54 = vpop.f32.mrb[38].mxu0  ;;  %2074 = vmatpush1.bf16.msra.mxu0 %v1763_v62 }
 0x140   :  { %v962_v59 = vpack.c.bf16 %v3317_v53, %v3316_v55  ;;  %v1765_v57 = vpack.c.bf16 %v3365_v54, %v3364_v51  ;;  %v879_v44 = vpop.f32.mrb[39].mxu1  ;;  %v1682_v50 = vpop.f32.mrb[39].mxu0  ;;  %1271 = vmatprep.subr.bf16.mxu1 %v3607_v0  ;;  %2075 = vmatprep.subr.bf16.mxu0 %v3607_v0 }
 0x141   :  { %v961_v60 = vpack.c.bf16 %v879_v44, %v876_v56  ;;  %v1764_v58 = vpack.c.bf16 %v1682_v50, %v1679_v52 }
 0x143   :  { %1272 = vmatpush1.bf16.msra.mxu1 %v961_v60  ;;  %2076 = vmatpush1.bf16.msra.mxu0 %v1764_v58 }
 0x144   :  { %1273 = vmatprep.subr.bf16.mxu1 %v3607_v0  ;;  %2077 = vmatprep.subr.bf16.mxu0 %v3607_v0 }
 0x145   :  { %v3320_v63 = vpop.f32.mrb[40].mxu1  ;;  %v3368_v61 = vpop.f32.mrb[40].mxu0 }
 0x146   :  { %v892_v1 = vpop.f32.mrb[41].mxu1  ;;  %v1695_v62 = vpop.f32.mrb[41].mxu0 }
 0x147   :  { %v3321_v48 = vpop.f32.mrb[42].mxu1  ;;  %1274 = vmatpush1.bf16.msra.mxu1 %v962_v59  ;;  %v3369_v2 = vpop.f32.mrb[42].mxu0  ;;  %2078 = vmatpush1.bf16.msra.mxu0 %v1765_v57 }
 0x148   :  { %v964_v55 = vpack.c.bf16 %v3321_v48, %v3320_v63  ;;  %v1767_v51 = vpack.c.bf16 %v3369_v2, %v3368_v61  ;;  %v895_v53 = vpop.f32.mrb[43].mxu1  ;;  %v1698_v54 = vpop.f32.mrb[43].mxu0  ;;  %1275 = vmatprep.subr.bf16.mxu1 %v3607_v0  ;;  %2079 = vmatprep.subr.bf16.mxu0 %v3607_v0 }
 0x149   :  { %v963_v56 = vpack.c.bf16 %v895_v53, %v892_v1  ;;  %v1766_v52 = vpack.c.bf16 %v1698_v54, %v1695_v62 }
 0x14b   :  { %1276 = vmatpush1.bf16.msra.mxu1 %v963_v56  ;;  %2080 = vmatpush1.bf16.msra.mxu0 %v1766_v52 }
 0x14c   :  { %1277 = vmatprep.subr.bf16.mxu1 %v3607_v0  ;;  %2081 = vmatprep.subr.bf16.mxu0 %v3607_v0 }
 0x14d   :  { %v3324_v44 = vpop.f32.mrb[44].mxu1  ;;  %v3372_v59 = vpop.f32.mrb[44].mxu0 }
 0x14e   :  { %v908_v50 = vpop.f32.mrb[45].mxu1  ;;  %v1711_v57 = vpop.f32.mrb[45].mxu0 }
 0x14f   :  { %v3325_v60 = vpop.f32.mrb[46].mxu1  ;;  %1278 = vmatpush1.bf16.msra.mxu1 %v964_v55  ;;  %v3373_v58 = vpop.f32.mrb[46].mxu0  ;;  %2082 = vmatpush1.bf16.msra.mxu0 %v1767_v51 }
 0x150   :  { %v966_v63 = vpack.c.bf16 %v3325_v60, %v3324_v44  ;;  %v1769_v61 = vpack.c.bf16 %v3373_v58, %v3372_v59  ;;  %v911_v48 = vpop.f32.mrb[47].mxu1  ;;  %v1714_v2 = vpop.f32.mrb[47].mxu0  ;;  %1279 = vmatprep.subr.bf16.mxu1 %v3607_v0  ;;  %2083 = vmatprep.subr.bf16.mxu0 %v3607_v0 }
 0x151   :  { %v965_v1 = vpack.c.bf16 %v911_v48, %v908_v50  ;;  %v1768_v62 = vpack.c.bf16 %v1714_v2, %v1711_v57 }
 0x153   :  { %1280 = vmatpush1.bf16.msra.mxu1 %v965_v1  ;;  %2084 = vmatpush1.bf16.msra.mxu0 %v1768_v62 }
 0x154   :  { %1281 = vmatprep.subr.bf16.mxu1 %v3607_v0  ;;  %2085 = vmatprep.subr.bf16.mxu0 %v3607_v0 }
 0x155   :  { %v3328_v53 = vpop.f32.mrb[48].mxu1  ;;  %v3376_v55 = vpop.f32.mrb[48].mxu0 }
 0x156   :  { %v924_v54 = vpop.f32.mrb[49].mxu1  ;;  %v1727_v51 = vpop.f32.mrb[49].mxu0 }
 0x157   :  { %v3329_v56 = vpop.f32.mrb[50].mxu1  ;;  %1282 = vmatpush1.bf16.msra.mxu1 %v966_v63  ;;  %v3377_v52 = vpop.f32.mrb[50].mxu0  ;;  %2086 = vmatpush1.bf16.msra.mxu0 %v1769_v61 }
 0x158   :  { %v968_v44 = vpack.c.bf16 %v3329_v56, %v3328_v53  ;;  %v1771_v59 = vpack.c.bf16 %v3377_v52, %v3376_v55  ;;  %v927_v60 = vpop.f32.mrb[51].mxu1  ;;  %v1730_v58 = vpop.f32.mrb[51].mxu0  ;;  %1283 = vmatprep.subr.bf16.mxu1 %v3607_v0  ;;  %2087 = vmatprep.subr.bf16.mxu0 %v3607_v0 }
 0x159   :  { %v967_v50 = vpack.c.bf16 %v927_v60, %v924_v54  ;;  %v1770_v57 = vpack.c.bf16 %v1730_v58, %v1727_v51  ;;  %v3469_v60 = vld [vmem:[%s4370_s0 + $0x14] ss:$8 sps:$4 sm:$0xff]  }
 0x15a   :  { %v3471_v58 = vld [vmem:[%s4370_s0 + $0x194] ss:$8 sps:$4 sm:$0xff]  }
 0x15b   :  { %1284 = vmatpush1.bf16.msra.mxu1 %v967_v50  ;;  %2088 = vmatpush1.bf16.msra.mxu0 %v1770_v57  ;;  %v3474_v50 = vld [vmem:[%s4370_s0 + $0x190] ss:$8 sps:$4 sm:$0xff]   ;;  %v3475_v57 = vld [vmem:[%s4370_s0 + $0x24] ss:$8 sps:$4 sm:$0xff]  }
 0x15c   :  { %1285 = vmatprep.subr.bf16.mxu1 %v3607_v0  ;;  %2089 = vmatprep.subr.bf16.mxu0 %v3607_v0 }
 0x15d   :  { %v3332_v48 = vpop.f32.mrb[52].mxu1  ;;  %v3380_v63 = vpop.f32.mrb[52].mxu0 }
 0x15e   :  { %v940_v2 = vpop.f32.mrb[53].mxu1  ;;  %v1743_v61 = vpop.f32.mrb[53].mxu0 }
 0x15f   :  { %v3333_v1 = vpop.f32.mrb[54].mxu1  ;;  %1286 = vmatpush1.bf16.msra.mxu1 %v968_v44  ;;  %v3381_v62 = vpop.f32.mrb[54].mxu0  ;;  %2090 = vmatpush1.bf16.msra.mxu0 %v1771_v59  ;;  %v3463_v44 = vld [vmem:[%s4370_s0] ss:$8 sps:$4 sm:$0xff]  }
 0x160   :  { %v970_v53 = vpack.c.bf16 %v3333_v1, %v3332_v48  ;;  %v1773_v55 = vpack.c.bf16 %v3381_v62, %v3380_v63  ;;  %v943_v56 = vpop.f32.mrb[55].mxu1  ;;  %v1746_v52 = vpop.f32.mrb[55].mxu0  ;;  %1287 = vmatprep.subr.bf16.mxu1 %v3607_v0  ;;  %2091 = vmatprep.subr.bf16.mxu0 %v3607_v0  ;;  %v3466_v59 = vld [vmem:[%s4370_s0 + $0x180] ss:$8 sps:$4 sm:$0xff]   ;;  %v3477_v48 = vld [vmem:[%s4370_s0 + $0x1a4] ss:$8 sps:$4 sm:$0xff]  }
 0x161   :  { %v969_v54 = vpack.c.bf16 %v943_v56, %v940_v2  ;;  %v1772_v51 = vpack.c.bf16 %v1746_v52, %v1743_v61  ;;  %v3479_v63 = vld [vmem:[%s4370_s0 + $0x20] ss:$8 sps:$4 sm:$0xff]   ;;  %v3481_v61 = vld [vmem:[%s4370_s0 + $0x34] ss:$8 sps:$4 sm:$0xff]   ;;  %v3485_v62 = vld [vmem:[%s4370_s0 + $0x30] ss:$8 sps:$4 sm:$0xff]  }
 0x162   :  { %v3480_v2 = vld [vmem:[%s4370_s0 + $0x1a0] ss:$8 sps:$4 sm:$0xff]   ;;  %v3483_v1 = vld [vmem:[%s4370_s0 + $0x1b4] ss:$8 sps:$4 sm:$0xff]   ;;  %v3489_v56 = vld [vmem:[%s4370_s0 + $0x1c4] ss:$8 sps:$4 sm:$0xff]  }
 0x163   :  { %1288 = vmatpush1.bf16.msra.mxu1 %v969_v54  ;;  %2092 = vmatpush1.bf16.msra.mxu0 %v1772_v51  ;;  %v3491_v52 = vld [vmem:[%s4370_s0 + $0x40] ss:$8 sps:$4 sm:$0xff]   ;;  %v3493_v51 = vld [vmem:[%s4370_s0 + $0x54] ss:$8 sps:$4 sm:$0xff]  }
 0x164   :  { %1289 = vmatprep.subr.bf16.mxu1 %v3607_v0  ;;  %2093 = vmatprep.subr.bf16.mxu0 %v3607_v0  ;;  %v3473_v0 = vld [vmem:[%s4370_s0 + $0x10] ss:$8 sps:$4 sm:$0xff]   ;;  %v3492_v54 = vld [vmem:[%s4370_s0 + $0x1c0] ss:$8 sps:$4 sm:$0xff]  }
 0x167   :  { %1290 = vmatpush1.bf16.msra.mxu1 %v970_v53  ;;  %2094 = vmatpush1.bf16.msra.mxu0 %v1773_v55  ;;  %v3486_v53 = vld [vmem:[%s4370_s0 + $0x1b0] ss:$8 sps:$4 sm:$0xff]   ;;  %v3487_v55 = vld [vmem:[%s4370_s0 + $0x44] ss:$8 sps:$4 sm:$0xff]  }
 0x16a   :  { %1292 = vmatmul.mubr.bf16.vlgmr.msra.gmra.mrb[56].mxu1 %v3463_v44  ;;  %2096 = vmatmul.mubr.bf16.vlgmr.msra.gmra.mrb[56].mxu0 %v3466_v59  ;;  %v3495_v44 = vld [vmem:[%s4370_s0 + $0x1d4] ss:$8 sps:$4 sm:$0xff]   ;;  %v3497_v59 = vld [vmem:[%s4370_s0 + $0x50] ss:$8 sps:$4 sm:$0xff]  }
 0x16b   :  { %1299 = vmatprep.mubr.bf16.mxu1 %v3469_v60  ;;  %2103 = vmatprep.mubr.bf16.mxu0 %v3471_v58  ;;  %v3498_v60 = vld [vmem:[%s4370_s0 + $0x1d0] ss:$8 sps:$4 sm:$0xff]   ;;  %v3499_v58 = vld [vmem:[%s4370_s0 + $0x64] ss:$8 sps:$4 sm:$0xff]  }
 0x172   :  { %1300 = vmatmul.mubr.bf16.gmra.mrb[60].mxu1 %v3473_v0  ;;  %2104 = vmatmul.mubr.bf16.gmra.mrb[60].mxu0 %v3474_v50  ;;  %v3501_v0 = vld [vmem:[%s4370_s0 + $0x1e4] ss:$8 sps:$4 sm:$0xff]   ;;  %v3503_v50 = vld [vmem:[%s4370_s0 + $0x60] ss:$8 sps:$4 sm:$0xff]  }
 0x173   :  { %1307 = vmatprep.mubr.bf16.mxu1 %v3475_v57  ;;  %2111 = vmatprep.mubr.bf16.mxu0 %v3477_v48  ;;  %v3504_v57 = vld [vmem:[%s4370_s0 + $0x1e0] ss:$8 sps:$4 sm:$0xff]   ;;  %v3505_v48 = vld [vmem:[%s4370_s0 + $0x74] ss:$8 sps:$4 sm:$0xff]  }
 0x17a   :  { %1308 = vmatmul.mubr.bf16.gmra.mrb[64].mxu1 %v3479_v63  ;;  %2112 = vmatmul.mubr.bf16.gmra.mrb[64].mxu0 %v3480_v2  ;;  %v3507_v63 = vld [vmem:[%s4370_s0 + $0x1f4] ss:$8 sps:$4 sm:$0xff]   ;;  %v3509_v2 = vld [vmem:[%s4370_s0 + $0x70] ss:$8 sps:$4 sm:$0xff]  }
 0x17b   :  { %1315 = vmatprep.mubr.bf16.mxu1 %v3481_v61  ;;  %2119 = vmatprep.mubr.bf16.mxu0 %v3483_v1  ;;  %v3510_v61 = vld [vmem:[%s4370_s0 + $0x1f0] ss:$8 sps:$4 sm:$0xff]   ;;  %v3511_v1 = vld [vmem:[%s4370_s0 + $0x84] ss:$8 sps:$4 sm:$0xff]  }
 0x182   :  { %1316 = vmatmul.mubr.bf16.gmra.mrb[68].mxu1 %v3485_v62  ;;  %2120 = vmatmul.mubr.bf16.gmra.mrb[68].mxu0 %v3486_v53  ;;  %v3513_v62 = vld [vmem:[%s4370_s0 + $0x204] ss:$8 sps:$4 sm:$0xff]   ;;  %v3515_v53 = vld [vmem:[%s4370_s0 + $0x80] ss:$8 sps:$4 sm:$0xff]  }
 0x183   :  { %1323 = vmatprep.mubr.bf16.mxu1 %v3487_v55  ;;  %2127 = vmatprep.mubr.bf16.mxu0 %v3489_v56  ;;  %v3516_v55 = vld [vmem:[%s4370_s0 + $0x200] ss:$8 sps:$4 sm:$0xff]   ;;  %v3517_v56 = vld [vmem:[%s4370_s0 + $0x94] ss:$8 sps:$4 sm:$0xff]  }
 0x18a   :  { %1324 = vmatmul.mubr.bf16.gmra.mrb[72].mxu1 %v3491_v52  ;;  %2128 = vmatmul.mubr.bf16.gmra.mrb[72].mxu0 %v3492_v54  ;;  %v3519_v52 = vld [vmem:[%s4370_s0 + $0x214] ss:$8 sps:$4 sm:$0xff]   ;;  %v3521_v54 = vld [vmem:[%s4370_s0 + $0x90] ss:$8 sps:$4 sm:$0xff]  }
 0x18b   :  { %1331 = vmatprep.mubr.bf16.mxu1 %v3493_v51  ;;  %2135 = vmatprep.mubr.bf16.mxu0 %v3495_v44  ;;  %v3522_v51 = vld [vmem:[%s4370_s0 + $0x210] ss:$8 sps:$4 sm:$0xff]   ;;  %v3523_v44 = vld [vmem:[%s4370_s0 + $0xa4] ss:$8 sps:$4 sm:$0xff]  }
 0x192   :  { %1332 = vmatmul.mubr.bf16.gmra.mrb[76].mxu1 %v3497_v59  ;;  %2136 = vmatmul.mubr.bf16.gmra.mrb[76].mxu0 %v3498_v60  ;;  %v3525_v59 = vld [vmem:[%s4370_s0 + $0x224] ss:$8 sps:$4 sm:$0xff]   ;;  %v3527_v60 = vld [vmem:[%s4370_s0 + $0xa0] ss:$8 sps:$4 sm:$0xff]  }
 0x193   :  { %1339 = vmatprep.mubr.bf16.mxu1 %v3499_v58  ;;  %2143 = vmatprep.mubr.bf16.mxu0 %v3501_v0  ;;  %v3528_v58 = vld [vmem:[%s4370_s0 + $0x220] ss:$8 sps:$4 sm:$0xff]   ;;  %v3529_v0 = vld [vmem:[%s4370_s0 + $0xb4] ss:$8 sps:$4 sm:$0xff]  }
 0x19a   :  { %1340 = vmatmul.mubr.bf16.gmra.mrb[80].mxu1 %v3503_v50  ;;  %2144 = vmatmul.mubr.bf16.gmra.mrb[80].mxu0 %v3504_v57  ;;  %v3531_v50 = vld [vmem:[%s4370_s0 + $0x234] ss:$8 sps:$4 sm:$0xff]   ;;  %v3533_v57 = vld [vmem:[%s4370_s0 + $0xb0] ss:$8 sps:$4 sm:$0xff]  }
 0x19b   :  { %1347 = vmatprep.mubr.bf16.mxu1 %v3505_v48  ;;  %2151 = vmatprep.mubr.bf16.mxu0 %v3507_v63  ;;  %v3534_v48 = vld [vmem:[%s4370_s0 + $0x230] ss:$8 sps:$4 sm:$0xff]   ;;  %v3535_v63 = vld [vmem:[%s4370_s0 + $0xc4] ss:$8 sps:$4 sm:$0xff]  }
 0x1a2   :  { %1348 = vmatmul.mubr.bf16.gmra.mrb[84].mxu1 %v3509_v2  ;;  %2152 = vmatmul.mubr.bf16.gmra.mrb[84].mxu0 %v3510_v61  ;;  %v3537_v2 = vld [vmem:[%s4370_s0 + $0x244] ss:$8 sps:$4 sm:$0xff]   ;;  %v3539_v61 = vld [vmem:[%s4370_s0 + $0xc0] ss:$8 sps:$4 sm:$0xff]  }
 0x1a3   :  { %1355 = vmatprep.mubr.bf16.mxu1 %v3511_v1  ;;  %2159 = vmatprep.mubr.bf16.mxu0 %v3513_v62  ;;  %v3540_v1 = vld [vmem:[%s4370_s0 + $0x240] ss:$8 sps:$4 sm:$0xff]   ;;  %v3541_v62 = vld [vmem:[%s4370_s0 + $0xd4] ss:$8 sps:$4 sm:$0xff]  }
 0x1aa   :  { %1356 = vmatmul.mubr.bf16.gmra.mrb[88].mxu1 %v3515_v53  ;;  %2160 = vmatmul.mubr.bf16.gmra.mrb[88].mxu0 %v3516_v55  ;;  %v3543_v53 = vld [vmem:[%s4370_s0 + $0x254] ss:$8 sps:$4 sm:$0xff]   ;;  %v3545_v55 = vld [vmem:[%s4370_s0 + $0xd0] ss:$8 sps:$4 sm:$0xff]  }
 0x1ab   :  { %1363 = vmatprep.mubr.bf16.mxu1 %v3517_v56  ;;  %2167 = vmatprep.mubr.bf16.mxu0 %v3519_v52  ;;  %v3546_v56 = vld [vmem:[%s4370_s0 + $0x250] ss:$8 sps:$4 sm:$0xff]   ;;  %v3547_v52 = vld [vmem:[%s4370_s0 + $0xe4] ss:$8 sps:$4 sm:$0xff]  }
 0x1b2   :  { %1364 = vmatmul.mubr.bf16.gmra.mrb[92].mxu1 %v3521_v54  ;;  %2168 = vmatmul.mubr.bf16.gmra.mrb[92].mxu0 %v3522_v51  ;;  %v3549_v54 = vld [vmem:[%s4370_s0 + $0x264] ss:$8 sps:$4 sm:$0xff]   ;;  %v3551_v51 = vld [vmem:[%s4370_s0 + $0xe0] ss:$8 sps:$4 sm:$0xff]  }
 0x1b3   :  { %1371 = vmatprep.mubr.bf16.mxu1 %v3523_v44  ;;  %2175 = vmatprep.mubr.bf16.mxu0 %v3525_v59  ;;  %v3552_v44 = vld [vmem:[%s4370_s0 + $0x260] ss:$8 sps:$4 sm:$0xff]   ;;  %v3553_v59 = vld [vmem:[%s4370_s0 + $0xf4] ss:$8 sps:$4 sm:$0xff]  }
 0x1ba   :  { %1372 = vmatmul.mubr.bf16.gmra.mrb[96].mxu1 %v3527_v60  ;;  %2176 = vmatmul.mubr.bf16.gmra.mrb[96].mxu0 %v3528_v58  ;;  %v3555_v60 = vld [vmem:[%s4370_s0 + $0x274] ss:$8 sps:$4 sm:$0xff]   ;;  %v3557_v58 = vld [vmem:[%s4370_s0 + $0xf0] ss:$8 sps:$4 sm:$0xff]  }
 0x1bb   :  { %1379 = vmatprep.mubr.bf16.mxu1 %v3529_v0  ;;  %2183 = vmatprep.mubr.bf16.mxu0 %v3531_v50  ;;  %v3558_v0 = vld [vmem:[%s4370_s0 + $0x270] ss:$8 sps:$4 sm:$0xff]   ;;  %v3559_v50 = vld [vmem:[%s4370_s0 + $0x104] ss:$8 sps:$4 sm:$0xff]  }
 0x1c2   :  { %1380 = vmatmul.mubr.bf16.gmra.mrb[100].mxu1 %v3533_v57  ;;  %2184 = vmatmul.mubr.bf16.gmra.mrb[100].mxu0 %v3534_v48  ;;  %v3561_v57 = vld [vmem:[%s4370_s0 + $0x284] ss:$8 sps:$4 sm:$0xff]   ;;  %v3563_v48 = vld [vmem:[%s4370_s0 + $0x100] ss:$8 sps:$4 sm:$0xff]  }
 0x1c3   :  { %1387 = vmatprep.mubr.bf16.mxu1 %v3535_v63  ;;  %2191 = vmatprep.mubr.bf16.mxu0 %v3537_v2  ;;  %v3564_v63 = vld [vmem:[%s4370_s0 + $0x280] ss:$8 sps:$4 sm:$0xff]   ;;  %v3565_v2 = vld [vmem:[%s4370_s0 + $0x114] ss:$8 sps:$4 sm:$0xff]  }
 0x1ca   :  { %1388 = vmatmul.mubr.bf16.gmra.mrb[104].mxu1 %v3539_v61  ;;  %2192 = vmatmul.mubr.bf16.gmra.mrb[104].mxu0 %v3540_v1  ;;  %v3567_v61 = vld [vmem:[%s4370_s0 + $0x294] ss:$8 sps:$4 sm:$0xff]   ;;  %v3569_v1 = vld [vmem:[%s4370_s0 + $0x110] ss:$8 sps:$4 sm:$0xff]  }
 0x1cb   :  { %1395 = vmatprep.mubr.bf16.mxu1 %v3541_v62  ;;  %2199 = vmatprep.mubr.bf16.mxu0 %v3543_v53  ;;  %v3570_v62 = vld [vmem:[%s4370_s0 + $0x290] ss:$8 sps:$4 sm:$0xff]   ;;  %v3571_v53 = vld [vmem:[%s4370_s0 + $0x124] ss:$8 sps:$4 sm:$0xff]  }
 0x1d2   :  { %1396 = vmatmul.mubr.bf16.gmra.mrb[108].mxu1 %v3545_v55  ;;  %2200 = vmatmul.mubr.bf16.gmra.mrb[108].mxu0 %v3546_v56  ;;  %v3573_v55 = vld [vmem:[%s4370_s0 + $0x2a4] ss:$8 sps:$4 sm:$0xff]   ;;  %v3575_v56 = vld [vmem:[%s4370_s0 + $0x120] ss:$8 sps:$4 sm:$0xff]  }
 0x1d3   :  { %1403 = vmatprep.mubr.bf16.mxu1 %v3547_v52  ;;  %2207 = vmatprep.mubr.bf16.mxu0 %v3549_v54  ;;  %v3576_v52 = vld [vmem:[%s4370_s0 + $0x2a0] ss:$8 sps:$4 sm:$0xff]   ;;  %v3577_v54 = vld [vmem:[%s4370_s0 + $0x134] ss:$8 sps:$4 sm:$0xff]  }
 0x1da   :  { %1404 = vmatmul.mubr.bf16.gmra.mrb[112].mxu1 %v3551_v51  ;;  %2208 = vmatmul.mubr.bf16.gmra.mrb[112].mxu0 %v3552_v44  ;;  %v3579_v51 = vld [vmem:[%s4370_s0 + $0x2b4] ss:$8 sps:$4 sm:$0xff]   ;;  %v3581_v44 = vld [vmem:[%s4370_s0 + $0x130] ss:$8 sps:$4 sm:$0xff]  }
 0x1db   :  { %1411 = vmatprep.mubr.bf16.mxu1 %v3553_v59  ;;  %2215 = vmatprep.mubr.bf16.mxu0 %v3555_v60  ;;  %v3582_v59 = vld [vmem:[%s4370_s0 + $0x2b0] ss:$8 sps:$4 sm:$0xff]   ;;  %v3583_v60 = vld [vmem:[%s4370_s0 + $0x144] ss:$8 sps:$4 sm:$0xff]  }
 0x1e2   :  { %1412 = vmatmul.mubr.bf16.gmra.mrb[116].mxu1 %v3557_v58  ;;  %2216 = vmatmul.mubr.bf16.gmra.mrb[116].mxu0 %v3558_v0  ;;  %v3585_v58 = vld [vmem:[%s4370_s0 + $0x2c4] ss:$8 sps:$4 sm:$0xff]   ;;  %v3587_v0 = vld [vmem:[%s4370_s0 + $0x140] ss:$8 sps:$4 sm:$0xff]  }
 0x1e3   :  { %1419 = vmatprep.mubr.bf16.mxu1 %v3559_v50  ;;  %2223 = vmatprep.mubr.bf16.mxu0 %v3561_v57  ;;  %v3588_v50 = vld [vmem:[%s4370_s0 + $0x2c0] ss:$8 sps:$4 sm:$0xff]   ;;  %v3589_v57 = vld [vmem:[%s4370_s0 + $0x154] ss:$8 sps:$4 sm:$0xff]  }
 0x1ea   :  { %1420 = vmatmul.mubr.bf16.gmra.mrb[120].mxu1 %v3563_v48  ;;  %2224 = vmatmul.mubr.bf16.gmra.mrb[120].mxu0 %v3564_v63  ;;  %v3591_v48 = vld [vmem:[%s4370_s0 + $0x2d4] ss:$8 sps:$4 sm:$0xff]   ;;  %v3593_v63 = vld [vmem:[%s4370_s0 + $0x150] ss:$8 sps:$4 sm:$0xff]  }
 0x1eb   :  { %1427 = vmatprep.mubr.bf16.mxu1 %v3565_v2  ;;  %2231 = vmatprep.mubr.bf16.mxu0 %v3567_v61  ;;  %v3594_v2 = vld [vmem:[%s4370_s0 + $0x2d0] ss:$8 sps:$4 sm:$0xff]   ;;  %v3595_v61 = vld [vmem:[%s4370_s0 + $0x164] ss:$8 sps:$4 sm:$0xff]  }
 0x1f2   :  { %1428 = vmatmul.mubr.bf16.gmra.mrb[124].mxu1 %v3569_v1  ;;  %2232 = vmatmul.mubr.bf16.gmra.mrb[124].mxu0 %v3570_v62  ;;  %v3597_v1 = vld [vmem:[%s4370_s0 + $0x2e4] ss:$8 sps:$4 sm:$0xff]   ;;  %v3599_v62 = vld [vmem:[%s4370_s0 + $0x160] ss:$8 sps:$4 sm:$0xff]  }
 0x1f3   :  { %1435 = vmatprep.mubr.bf16.mxu1 %v3571_v53  ;;  %2239 = vmatprep.mubr.bf16.mxu0 %v3573_v55  ;;  %v3600_v53 = vld [vmem:[%s4370_s0 + $0x2e0] ss:$8 sps:$4 sm:$0xff]   ;;  %v3601_v55 = vld [vmem:[%s4370_s0 + $0x174] ss:$8 sps:$4 sm:$0xff]  }
 0x1fa   :  { %1436 = vmatmul.mubr.bf16.gmra.mrb[128].mxu1 %v3575_v56  ;;  %2240 = vmatmul.mubr.bf16.gmra.mrb[128].mxu0 %v3576_v52  ;;  %v3603_v56 = vld [vmem:[%s4370_s0 + $0x2f4] ss:$8 sps:$4 sm:$0xff]   ;;  %v3605_v52 = vld [vmem:[%s4370_s0 + $0x170] ss:$8 sps:$4 sm:$0xff]  }
 0x1fb   :  { %1443 = vmatprep.mubr.bf16.mxu1 %v3577_v54  ;;  %2247 = vmatprep.mubr.bf16.mxu0 %v3579_v51  ;;  %v3606_v54 = vld [vmem:[%s4370_s0 + $0x2f0] ss:$8 sps:$4 sm:$0xff]  }
 0x202   :  { %1444 = vmatmul.mubr.bf16.gmra.mrb[132].mxu1 %v3581_v44  ;;  %2248 = vmatmul.mubr.bf16.gmra.mrb[132].mxu0 %v3582_v59 }
 0x203   :  { %1451 = vmatprep.mubr.bf16.mxu1 %v3583_v60  ;;  %2255 = vmatprep.mubr.bf16.mxu0 %v3585_v58 }
 0x20a   :  { %1452 = vmatmul.mubr.bf16.gmra.mrb[136].mxu1 %v3587_v0  ;;  %2256 = vmatmul.mubr.bf16.gmra.mrb[136].mxu0 %v3588_v50 }
 0x20b   :  { %1459 = vmatprep.mubr.bf16.mxu1 %v3589_v57  ;;  %2263 = vmatprep.mubr.bf16.mxu0 %v3591_v48 }
 0x212   :  { %1460 = vmatmul.mubr.bf16.gmra.mrb[140].mxu1 %v3593_v63  ;;  %2264 = vmatmul.mubr.bf16.gmra.mrb[140].mxu0 %v3594_v2 }
 0x213   :  { %1467 = vmatprep.mubr.bf16.mxu1 %v3595_v61  ;;  %2271 = vmatprep.mubr.bf16.mxu0 %v3597_v1 }
 0x21a   :  { %1468 = vmatmul.mubr.bf16.gmra.mrb[144].mxu1 %v3599_v62  ;;  %2272 = vmatmul.mubr.bf16.gmra.mrb[144].mxu0 %v3600_v53 }
 0x21b   :  { %1475 = vmatprep.mubr.bf16.mxu1 %v3601_v55  ;;  %2279 = vmatprep.mubr.bf16.mxu0 %v3603_v56 }
 0x222   :  { %1476 = vmatmul.mubr.bf16.gmra.mrb[148].mxu1 %v3605_v52  ;;  %2280 = vmatmul.mubr.bf16.gmra.mrb[148].mxu0 %v3606_v54 }
 0x23d   :  { %v1293_v51 = vpop.f32.mrb[56].mxu1  ;;  %v2097_v44 = vpop.f32.mrb[56].mxu0 }
 0x23e   :  { %v1484_v59 = vadd.f32 %v1293_v51, %v3842_v5  ;;  %v1295_v60 = vpop.f32.mrb[57].mxu1  ;;  %v2099_v58 = vpop.f32.mrb[57].mxu0 }
 0x23f   :  { %v1296_v0 = vpop.f32.mrb[58].mxu1  ;;  %v2100_v50 = vpop.f32.mrb[58].mxu0 }
 0x240   :  { %v2288_v57 = vadd.f32 %v2097_v44, %v1484_v59  ;;  %v1485_v48 = vadd.f32 %v1296_v0, %v3850_v9  ;;  %v1298_v63 = vpop.f32.mrb[59].mxu1  ;;  %v2102_v2 = vpop.f32.mrb[59].mxu0 }
 0x242   :  { %v2289_v61 = vadd.f32 %v2100_v50, %v1485_v48  ;;  %v2387_v1 = vmax.f32 %v2288_v57, 0.0 }
 0x244   :  { %v2388_v62 = vmax.f32 %v2289_v61, 0.0 }
 0x245   :  { %v1301_v53 = vpop.f32.mrb[60].mxu1  ;;  %v2105_v55 = vpop.f32.mrb[60].mxu0 }
 0x246   :  { %v3002_v56 = vpack.c.bf16 %v2388_v62, %v2387_v1  ;;  %v1486_v52 = vadd.f32 %v3838_v3, %v1301_v53  ;;  %v1303_v54 = vpop.f32.mrb[61].mxu1  ;;  %v2107_v46 = vpop.f32.mrb[61].mxu0 }
 0x247   :  { %v1304_v5 = vpop.f32.mrb[62].mxu1  ;;  %v2108_v51 = vpop.f32.mrb[62].mxu0 }
 0x248   :  { %3003 = vst [vmem:[%s4371_s5] sm:$0xff] %v3002_v56   ;;  %v2290_v44 = vadd.f32 %v2105_v55, %v1486_v52  ;;  %v1487_v9 = vadd.f32 %v3846_v7, %v1304_v5  ;;  %v1306_v59 = vpop.f32.mrb[63].mxu1  ;;  %v2110_v60 = vpop.f32.mrb[63].mxu0 }
 0x24a   :  { %v2291_v58 = vadd.f32 %v2108_v51, %v1487_v9  ;;  %v2389_v0 = vmax.f32 %v2290_v44, 0.0 }
 0x24c   :  { %v2390_v50 = vmax.f32 %v2291_v58, 0.0 }
 0x24d   :  { %v1309_v57 = vpop.f32.mrb[64].mxu1  ;;  %v2113_v48 = vpop.f32.mrb[64].mxu0 }
 0x24e   :  { %v3007_v63 = vpack.c.bf16 %v2390_v50, %v2389_v0  ;;  %v1488_v3 = vadd.f32 %v1309_v57, %v3858_v13  ;;  %v1311_v46 = vpop.f32.mrb[65].mxu1  ;;  %v2115_v2 = vpop.f32.mrb[65].mxu0 }
 0x24f   :  { %v1312_v61 = vpop.f32.mrb[66].mxu1  ;;  %v2116_v1 = vpop.f32.mrb[66].mxu0 }
 0x250   :  { %3119 = vst [vmem:[%s4371_s5 + $0x8] sm:$0xff] %v3007_v63   ;;  %v2292_v62 = vadd.f32 %v2113_v48, %v1488_v3  ;;  %v1489_v7 = vadd.f32 %v1312_v61, %v3866_v17  ;;  %v1314_v53 = vpop.f32.mrb[67].mxu1  ;;  %v2118_v55 = vpop.f32.mrb[67].mxu0 }
 0x252   :  { %v2293_v56 = vadd.f32 %v2116_v1, %v1489_v7  ;;  %v2391_v52 = vmax.f32 %v2292_v62, 0.0 }
 0x254   :  { %v2392_v54 = vmax.f32 %v2293_v56, 0.0 }
 0x255   :  { %v1317_v5 = vpop.f32.mrb[68].mxu1  ;;  %v2121_v51 = vpop.f32.mrb[68].mxu0 }
 0x256   :  { %v3012_v44 = vpack.c.bf16 %v2392_v54, %v2391_v52  ;;  %v1490_v13 = vadd.f32 %v3854_v11, %v1317_v5  ;;  %v1319_v9 = vpop.f32.mrb[69].mxu1  ;;  %v2123_v59 = vpop.f32.mrb[69].mxu0 }
 0x257   :  { %v1320_v60 = vpop.f32.mrb[70].mxu1  ;;  %v2124_v58 = vpop.f32.mrb[70].mxu0 }
 0x258   :  { %3120 = vst [vmem:[%s4371_s5 + $0x10] sm:$0xff] %v3012_v44   ;;  %v2294_v0 = vadd.f32 %v2121_v51, %v1490_v13  ;;  %v1491_v17 = vadd.f32 %v3862_v15, %v1320_v60  ;;  %v1322_v50 = vpop.f32.mrb[71].mxu1  ;;  %v2126_v57 = vpop.f32.mrb[71].mxu0 }
 0x25a   :  { %v2295_v48 = vadd.f32 %v2124_v58, %v1491_v17  ;;  %v2393_v63 = vmax.f32 %v2294_v0, 0.0 }
 0x25c   :  { %v2394_v3 = vmax.f32 %v2295_v48, 0.0 }
 0x25d   :  { %v1325_v46 = vpop.f32.mrb[72].mxu1  ;;  %v2129_v2 = vpop.f32.mrb[72].mxu0 }
 0x25e   :  { %v3017_v61 = vpack.c.bf16 %v2394_v3, %v2393_v63  ;;  %v1492_v11 = vadd.f32 %v1325_v46, %v3874_v21  ;;  %v1327_v1 = vpop.f32.mrb[73].mxu1  ;;  %v2131_v62 = vpop.f32.mrb[73].mxu0 }
 0x25f   :  { %v1328_v7 = vpop.f32.mrb[74].mxu1  ;;  %v2132_v53 = vpop.f32.mrb[74].mxu0 }
 0x260   :  { %3121 = vst [vmem:[%s4371_s5 + $0x18] sm:$0xff] %v3017_v61   ;;  %v2296_v55 = vadd.f32 %v2129_v2, %v1492_v11  ;;  %v1493_v15 = vadd.f32 %v1328_v7, %v3882_v25  ;;  %v1330_v56 = vpop.f32.mrb[75].mxu1  ;;  %v2134_v52 = vpop.f32.mrb[75].mxu0 }
 0x262   :  { %v2297_v54 = vadd.f32 %v2132_v53, %v1493_v15  ;;  %v2395_v5 = vmax.f32 %v2296_v55, 0.0 }
 0x264   :  { %v2396_v51 = vmax.f32 %v2297_v54, 0.0 }
 0x265   :  { %v1333_v44 = vpop.f32.mrb[76].mxu1  ;;  %v2137_v13 = vpop.f32.mrb[76].mxu0 }
 0x266   :  { %v3022_v9 = vpack.c.bf16 %v2396_v51, %v2395_v5  ;;  %v1494_v21 = vadd.f32 %v3870_v19, %v1333_v44  ;;  %v1335_v59 = vpop.f32.mrb[77].mxu1  ;;  %v2139_v60 = vpop.f32.mrb[77].mxu0 }
 0x267   :  { %v1336_v58 = vpop.f32.mrb[78].mxu1  ;;  %v2140_v0 = vpop.f32.mrb[78].mxu0 }
 0x268   :  { %3122 = vst [vmem:[%s4371_s5 + $0x20] sm:$0xff] %v3022_v9   ;;  %v2298_v17 = vadd.f32 %v2137_v13, %v1494_v21  ;;  %v1495_v25 = vadd.f32 %v3878_v23, %v1336_v58  ;;  %v1338_v50 = vpop.f32.mrb[79].mxu1  ;;  %v2142_v57 = vpop.f32.mrb[79].mxu0 }
 0x26a   :  { %v2299_v48 = vadd.f32 %v2140_v0, %v1495_v25  ;;  %v2397_v63 = vmax.f32 %v2298_v17, 0.0 }
 0x26c   :  { %v2398_v3 = vmax.f32 %v2299_v48, 0.0 }
 0x26d   :  { %v1341_v46 = vpop.f32.mrb[80].mxu1  ;;  %v2145_v2 = vpop.f32.mrb[80].mxu0 }
 0x26e   :  { %v3027_v61 = vpack.c.bf16 %v2398_v3, %v2397_v63  ;;  %v1496_v19 = vadd.f32 %v1341_v46, %v3890_v29  ;;  %v1343_v11 = vpop.f32.mrb[81].mxu1  ;;  %v2147_v1 = vpop.f32.mrb[81].mxu0 }
 0x26f   :  { %v1344_v62 = vpop.f32.mrb[82].mxu1  ;;  %v2148_v7 = vpop.f32.mrb[82].mxu0 }
 0x270   :  { %3123 = vst [vmem:[%s4371_s5 + $0x28] sm:$0xff] %v3027_v61   ;;  %v2300_v53 = vadd.f32 %v2145_v2, %v1496_v19  ;;  %v1497_v23 = vadd.f32 %v1344_v62, %v3898_v33  ;;  %v1346_v55 = vpop.f32.mrb[83].mxu1  ;;  %v2150_v15 = vpop.f32.mrb[83].mxu0 }
 0x272   :  { %v2301_v56 = vadd.f32 %v2148_v7, %v1497_v23  ;;  %v2399_v52 = vmax.f32 %v2300_v53, 0.0 }
 0x274   :  { %v2400_v54 = vmax.f32 %v2301_v56, 0.0 }
 0x275   :  { %v1349_v5 = vpop.f32.mrb[84].mxu1  ;;  %v2153_v51 = vpop.f32.mrb[84].mxu0 }
 0x276   :  { %v3032_v44 = vpack.c.bf16 %v2400_v54, %v2399_v52  ;;  %v1498_v29 = vadd.f32 %v3886_v27, %v1349_v5  ;;  %v1351_v13 = vpop.f32.mrb[85].mxu1  ;;  %v2155_v9 = vpop.f32.mrb[85].mxu0 }
 0x277   :  { %v1352_v21 = vpop.f32.mrb[86].mxu1  ;;  %v2156_v59 = vpop.f32.mrb[86].mxu0 }
 0x278   :  { %3124 = vst [vmem:[%s4371_s5 + $0x30] sm:$0xff] %v3032_v44   ;;  %v2302_v60 = vadd.f32 %v2153_v51, %v1498_v29  ;;  %v1499_v33 = vadd.f32 %v3894_v31, %v1352_v21  ;;  %v1354_v58 = vpop.f32.mrb[87].mxu1  ;;  %v2158_v0 = vpop.f32.mrb[87].mxu0 }
 0x27a   :  { %v2303_v17 = vadd.f32 %v2156_v59, %v1499_v33  ;;  %v2401_v25 = vmax.f32 %v2302_v60, 0.0 }
 0x27c   :  { %v2402_v50 = vmax.f32 %v2303_v17, 0.0 }
 0x27d   :  { %v1357_v57 = vpop.f32.mrb[88].mxu1  ;;  %v2161_v48 = vpop.f32.mrb[88].mxu0 }
 0x27e   :  { %v3037_v63 = vpack.c.bf16 %v2402_v50, %v2401_v25  ;;  %v1500_v27 = vadd.f32 %v1357_v57, %v3906_v37  ;;  %v1359_v3 = vpop.f32.mrb[89].mxu1  ;;  %v2163_v46 = vpop.f32.mrb[89].mxu0 }
 0x27f   :  { %v1360_v2 = vpop.f32.mrb[90].mxu1  ;;  %v2164_v61 = vpop.f32.mrb[90].mxu0 }
 0x280   :  { %3125 = vst [vmem:[%s4371_s5 + $0x38] sm:$0xff] %v3037_v63   ;;  %v2304_v19 = vadd.f32 %v2161_v48, %v1500_v27  ;;  %v1501_v31 = vadd.f32 %v1360_v2, %v3914_v41  ;;  %v1362_v11 = vpop.f32.mrb[91].mxu1  ;;  %v2166_v1 = vpop.f32.mrb[91].mxu0 }
 0x282   :  { %v2305_v62 = vadd.f32 %v2164_v61, %v1501_v31  ;;  %v2403_v7 = vmax.f32 %v2304_v19, 0.0 }
 0x284   :  { %v2404_v53 = vmax.f32 %v2305_v62, 0.0 }
 0x285   :  { %v1365_v23 = vpop.f32.mrb[92].mxu1  ;;  %v2169_v55 = vpop.f32.mrb[92].mxu0 }
 0x286   :  { %v3042_v15 = vpack.c.bf16 %v2404_v53, %v2403_v7  ;;  %v1502_v37 = vadd.f32 %v3902_v35, %v1365_v23  ;;  %v1367_v56 = vpop.f32.mrb[93].mxu1  ;;  %v2171_v52 = vpop.f32.mrb[93].mxu0 }
 0x287   :  { %v1368_v54 = vpop.f32.mrb[94].mxu1  ;;  %v2172_v5 = vpop.f32.mrb[94].mxu0 }
 0x288   :  { %3126 = vst [vmem:[%s4371_s5 + $0x40] sm:$0xff] %v3042_v15   ;;  %v2306_v51 = vadd.f32 %v2169_v55, %v1502_v37  ;;  %v1503_v41 = vadd.f32 %v3910_v39, %v1368_v54  ;;  %v1370_v44 = vpop.f32.mrb[95].mxu1  ;;  %v2174_v29 = vpop.f32.mrb[95].mxu0 }
 0x28a   :  { %v2307_v13 = vadd.f32 %v2172_v5, %v1503_v41  ;;  %v2405_v9 = vmax.f32 %v2306_v51, 0.0 }
 0x28c   :  { %v2406_v21 = vmax.f32 %v2307_v13, 0.0 }
 0x28d   :  { %v1373_v59 = vpop.f32.mrb[96].mxu1  ;;  %v2177_v60 = vpop.f32.mrb[96].mxu0 }
 0x28e   :  { %v3047_v33 = vpack.c.bf16 %v2406_v21, %v2405_v9  ;;  %v1504_v35 = vadd.f32 %v1373_v59, %v3922_v45  ;;  %v1375_v58 = vpop.f32.mrb[97].mxu1  ;;  %v2179_v0 = vpop.f32.mrb[97].mxu0 }
 0x28f   :  { %v1376_v17 = vpop.f32.mrb[98].mxu1  ;;  %v2180_v25 = vpop.f32.mrb[98].mxu0 }
 0x290   :  { %3127 = vst [vmem:[%s4371_s5 + $0x48] sm:$0xff] %v3047_v33   ;;  %v2308_v50 = vadd.f32 %v2177_v60, %v1504_v35  ;;  %v1505_v39 = vadd.f32 %v1376_v17, %v3930_v49  ;;  %v1378_v57 = vpop.f32.mrb[99].mxu1  ;;  %v2182_v48 = vpop.f32.mrb[99].mxu0 }
 0x292   :  { %v2309_v63 = vadd.f32 %v2180_v25, %v1505_v39  ;;  %v2407_v27 = vmax.f32 %v2308_v50, 0.0 }
 0x294   :  { %v2408_v3 = vmax.f32 %v2309_v63, 0.0 }
 0x295   :  { %v1381_v46 = vpop.f32.mrb[100].mxu1  ;;  %v2185_v2 = vpop.f32.mrb[100].mxu0 }
 0x296   :  { %v3052_v61 = vpack.c.bf16 %v2408_v3, %v2407_v27  ;;  %v1506_v45 = vadd.f32 %v3918_v43, %v1381_v46  ;;  %v1383_v19 = vpop.f32.mrb[101].mxu1  ;;  %v2187_v31 = vpop.f32.mrb[101].mxu0 }
 0x297   :  { %v1384_v11 = vpop.f32.mrb[102].mxu1  ;;  %v2188_v1 = vpop.f32.mrb[102].mxu0 }
 0x298   :  { %3128 = vst [vmem:[%s4371_s5 + $0x50] sm:$0xff] %v3052_v61   ;;  %v2310_v62 = vadd.f32 %v2185_v2, %v1506_v45  ;;  %v1507_v49 = vadd.f32 %v3926_v47, %v1384_v11  ;;  %v1386_v7 = vpop.f32.mrb[103].mxu1  ;;  %v2190_v53 = vpop.f32.mrb[103].mxu0 }
 0x29a   :  { %v2311_v23 = vadd.f32 %v2188_v1, %v1507_v49  ;;  %v2409_v55 = vmax.f32 %v2310_v62, 0.0 }
 0x29c   :  { %v2410_v15 = vmax.f32 %v2311_v23, 0.0 }
 0x29d   :  { %v1389_v37 = vpop.f32.mrb[104].mxu1  ;;  %v2193_v56 = vpop.f32.mrb[104].mxu0 }
 0x29e   :  { %v3057_v52 = vpack.c.bf16 %v2410_v15, %v2409_v55  ;;  %v1508_v43 = vadd.f32 %v1389_v37, %v3844_v6  ;;  %v1391_v54 = vpop.f32.mrb[105].mxu1  ;;  %v2195_v5 = vpop.f32.mrb[105].mxu0 }
 0x29f   :  { %v1392_v51 = vpop.f32.mrb[106].mxu1  ;;  %v2196_v41 = vpop.f32.mrb[106].mxu0 }
 0x2a0   :  { %3129 = vst [vmem:[%s4371_s5 + $0x58] sm:$0xff] %v3057_v52   ;;  %v2312_v44 = vadd.f32 %v2193_v56, %v1508_v43  ;;  %v1509_v47 = vadd.f32 %v1392_v51, %v3852_v10  ;;  %v1394_v29 = vpop.f32.mrb[107].mxu1  ;;  %v2198_v13 = vpop.f32.mrb[107].mxu0 }
 0x2a2   :  { %v2313_v9 = vadd.f32 %v2196_v41, %v1509_v47  ;;  %v2411_v21 = vmax.f32 %v2312_v44, 0.0 }
 0x2a4   :  { %v2412_v59 = vmax.f32 %v2313_v9, 0.0 }
 0x2a5   :  { %v1397_v60 = vpop.f32.mrb[108].mxu1  ;;  %v2201_v33 = vpop.f32.mrb[108].mxu0 }
 0x2a6   :  { %v3062_v35 = vpack.c.bf16 %v2412_v59, %v2411_v21  ;;  %v1510_v6 = vadd.f32 %v3840_v4, %v1397_v60  ;;  %v1399_v58 = vpop.f32.mrb[109].mxu1  ;;  %v2203_v0 = vpop.f32.mrb[109].mxu0 }
 0x2a7   :  { %v1400_v17 = vpop.f32.mrb[110].mxu1  ;;  %v2204_v25 = vpop.f32.mrb[110].mxu0 }
 0x2a8   :  { %3130 = vst [vmem:[%s4371_s5 + $0x60] sm:$0xff] %v3062_v35   ;;  %v2314_v50 = vadd.f32 %v2201_v33, %v1510_v6  ;;  %v1511_v10 = vadd.f32 %v3848_v8, %v1400_v17  ;;  %v1402_v39 = vpop.f32.mrb[111].mxu1  ;;  %v2206_v57 = vpop.f32.mrb[111].mxu0 }
 0x2aa   :  { %v2315_v48 = vadd.f32 %v2204_v25, %v1511_v10  ;;  %v2413_v63 = vmax.f32 %v2314_v50, 0.0 }
 0x2ac   :  { %v2414_v27 = vmax.f32 %v2315_v48, 0.0 }
 0x2ad   :  { %v1405_v3 = vpop.f32.mrb[112].mxu1  ;;  %v2209_v46 = vpop.f32.mrb[112].mxu0 }
 0x2ae   :  { %v3067_v2 = vpack.c.bf16 %v2414_v27, %v2413_v63  ;;  %v1512_v4 = vadd.f32 %v1405_v3, %v3860_v14  ;;  %v1407_v61 = vpop.f32.mrb[113].mxu1  ;;  %v2211_v45 = vpop.f32.mrb[113].mxu0 }
 0x2af   :  { %v1408_v19 = vpop.f32.mrb[114].mxu1  ;;  %v2212_v31 = vpop.f32.mrb[114].mxu0 }
 0x2b0   :  { %3131 = vst [vmem:[%s4371_s5 + $0x68] sm:$0xff] %v3067_v2   ;;  %v2316_v11 = vadd.f32 %v2209_v46, %v1512_v4  ;;  %v1513_v8 = vadd.f32 %v1408_v19, %v3868_v18  ;;  %v1410_v1 = vpop.f32.mrb[115].mxu1  ;;  %v2214_v62 = vpop.f32.mrb[115].mxu0 }
 0x2b2   :  { %v2317_v49 = vadd.f32 %v2212_v31, %v1513_v8  ;;  %v2415_v7 = vmax.f32 %v2316_v11, 0.0 }
 0x2b4   :  { %v2416_v53 = vmax.f32 %v2317_v49, 0.0 }
 0x2b5   :  { %v1413_v23 = vpop.f32.mrb[116].mxu1  ;;  %v2217_v55 = vpop.f32.mrb[116].mxu0 }
 0x2b6   :  { %v3072_v15 = vpack.c.bf16 %v2416_v53, %v2415_v7  ;;  %v1514_v14 = vadd.f32 %v3856_v12, %v1413_v23  ;;  %v1415_v37 = vpop.f32.mrb[117].mxu1  ;;  %v2219_v56 = vpop.f32.mrb[117].mxu0 }
 0x2b7   :  { %v1416_v52 = vpop.f32.mrb[118].mxu1  ;;  %v2220_v43 = vpop.f32.mrb[118].mxu0 }
 0x2b8   :  { %3132 = vst [vmem:[%s4371_s5 + $0x70] sm:$0xff] %v3072_v15   ;;  %v2318_v54 = vadd.f32 %v2217_v55, %v1514_v14  ;;  %v1515_v18 = vadd.f32 %v3864_v16, %v1416_v52  ;;  %v1418_v5 = vpop.f32.mrb[119].mxu1  ;;  %v2222_v51 = vpop.f32.mrb[119].mxu0 }
 0x2ba   :  { %v2319_v41 = vadd.f32 %v2220_v43, %v1515_v18  ;;  %v2417_v44 = vmax.f32 %v2318_v54, 0.0 }
 0x2bc   :  { %v2418_v47 = vmax.f32 %v2319_v41, 0.0 }
 0x2bd   :  { %v1421_v29 = vpop.f32.mrb[120].mxu1  ;;  %v2225_v13 = vpop.f32.mrb[120].mxu0 }
 0x2be   :  { %v3077_v9 = vpack.c.bf16 %v2418_v47, %v2417_v44  ;;  %v1516_v12 = vadd.f32 %v1421_v29, %v3876_v22  ;;  %v1423_v21 = vpop.f32.mrb[121].mxu1  ;;  %v2227_v59 = vpop.f32.mrb[121].mxu0 }
 0x2bf   :  { %v1424_v60 = vpop.f32.mrb[122].mxu1  ;;  %v2228_v33 = vpop.f32.mrb[122].mxu0 }
 0x2c0   :  { %3133 = vst [vmem:[%s4371_s5 + $0x78] sm:$0xff] %v3077_v9   ;;  %v2320_v35 = vadd.f32 %v2225_v13, %v1516_v12  ;;  %v1517_v16 = vadd.f32 %v1424_v60, %v3884_v26  ;;  %v1426_v6 = vpop.f32.mrb[123].mxu1  ;;  %v2230_v58 = vpop.f32.mrb[123].mxu0 }
 0x2c2   :  { %v2321_v0 = vadd.f32 %v2228_v33, %v1517_v16  ;;  %v2419_v17 = vmax.f32 %v2320_v35, 0.0 }
 0x2c4   :  { %v2420_v25 = vmax.f32 %v2321_v0, 0.0 }
 0x2c5   :  { %v1429_v50 = vpop.f32.mrb[124].mxu1  ;;  %v2233_v10 = vpop.f32.mrb[124].mxu0 }
 0x2c6   :  { %v3082_v39 = vpack.c.bf16 %v2420_v25, %v2419_v17  ;;  %v1518_v22 = vadd.f32 %v3872_v20, %v1429_v50  ;;  %v1431_v57 = vpop.f32.mrb[125].mxu1  ;;  %v2235_v48 = vpop.f32.mrb[125].mxu0 }
 0x2c7   :  { %v1432_v63 = vpop.f32.mrb[126].mxu1  ;;  %v2236_v27 = vpop.f32.mrb[126].mxu0 }
 0x2c8   :  { %3134 = vst [vmem:[%s4371_s5 + $0x80] sm:$0xff] %v3082_v39   ;;  %v2322_v3 = vadd.f32 %v2233_v10, %v1518_v22  ;;  %v1519_v26 = vadd.f32 %v3880_v24, %v1432_v63  ;;  %v1434_v46 = vpop.f32.mrb[127].mxu1  ;;  %v2238_v2 = vpop.f32.mrb[127].mxu0 }
 0x2ca   :  { %v2323_v4 = vadd.f32 %v2236_v27, %v1519_v26  ;;  %v2421_v61 = vmax.f32 %v2322_v3, 0.0 }
 0x2cc   :  { %v2422_v45 = vmax.f32 %v2323_v4, 0.0 }
 0x2cd   :  { %v1437_v19 = vpop.f32.mrb[128].mxu1  ;;  %v2241_v31 = vpop.f32.mrb[128].mxu0 }
 0x2ce   :  { %v3087_v11 = vpack.c.bf16 %v2422_v45, %v2421_v61  ;;  %v1520_v20 = vadd.f32 %v1437_v19, %v3892_v30  ;;  %v1439_v8 = vpop.f32.mrb[129].mxu1  ;;  %v2243_v1 = vpop.f32.mrb[129].mxu0 }
 0x2cf   :  { %v1440_v62 = vpop.f32.mrb[130].mxu1  ;;  %v2244_v49 = vpop.f32.mrb[130].mxu0 }
 0x2d0   :  { %3135 = vst [vmem:[%s4371_s5 + $0x88] sm:$0xff] %v3087_v11   ;;  %v2324_v7 = vadd.f32 %v2241_v31, %v1520_v20  ;;  %v1521_v24 = vadd.f32 %v1440_v62, %v3900_v34  ;;  %v1442_v53 = vpop.f32.mrb[131].mxu1  ;;  %v2246_v23 = vpop.f32.mrb[131].mxu0 }
 0x2d2   :  { %v2325_v55 = vadd.f32 %v2244_v49, %v1521_v24  ;;  %v2423_v15 = vmax.f32 %v2324_v7, 0.0 }
 0x2d4   :  { %v2424_v14 = vmax.f32 %v2325_v55, 0.0 }
 0x2d5   :  { %v1445_v37 = vpop.f32.mrb[132].mxu1  ;;  %v2249_v56 = vpop.f32.mrb[132].mxu0 }
 0x2d6   :  { %v3092_v52 = vpack.c.bf16 %v2424_v14, %v2423_v15  ;;  %v1522_v30 = vadd.f32 %v3888_v28, %v1445_v37  ;;  %v1447_v43 = vpop.f32.mrb[133].mxu1  ;;  %v2251_v54 = vpop.f32.mrb[133].mxu0 }
 0x2d7   :  { %v1448_v18 = vpop.f32.mrb[134].mxu1  ;;  %v2252_v5 = vpop.f32.mrb[134].mxu0 }
 0x2d8   :  { %3136 = vst [vmem:[%s4371_s5 + $0x90] sm:$0xff] %v3092_v52   ;;  %v2326_v51 = vadd.f32 %v2249_v56, %v1522_v30  ;;  %v1523_v34 = vadd.f32 %v3896_v32, %v1448_v18  ;;  %v1450_v41 = vpop.f32.mrb[135].mxu1  ;;  %v2254_v44 = vpop.f32.mrb[135].mxu0  ;;  %v4378_v56 = vld [vmem:[#allocation3_spill] sm:$0xff] }
 0x2da   :  { %v2327_v47 = vadd.f32 %v2252_v5, %v1523_v34  ;;  %v2425_v29 = vmax.f32 %v2326_v51, 0.0  ;;  %v4379_v51 = vld [vmem:[#allocation5_spill] sm:$0xff] }
 0x2dc   :  { %v2426_v13 = vmax.f32 %v2327_v47, 0.0 }
 0x2dd   :  { %v1453_v9 = vpop.f32.mrb[136].mxu1  ;;  %v2257_v12 = vpop.f32.mrb[136].mxu0 }
 0x2de   :  { %v3097_v21 = vpack.c.bf16 %v2426_v13, %v2425_v29  ;;  %v1524_v28 = vadd.f32 %v1453_v9, %v3908_v38  ;;  %v1455_v59 = vpop.f32.mrb[137].mxu1  ;;  %v2259_v60 = vpop.f32.mrb[137].mxu0 }
 0x2df   :  { %v1456_v33 = vpop.f32.mrb[138].mxu1  ;;  %v2260_v35 = vpop.f32.mrb[138].mxu0 }
 0x2e0   :  { %3137 = vst [vmem:[%s4371_s5 + $0x98] sm:$0xff] %v3097_v21   ;;  %v2328_v16 = vadd.f32 %v2257_v12, %v1524_v28  ;;  %v1525_v32 = vadd.f32 %v1456_v33, %v3916_v42  ;;  %v1458_v6 = vpop.f32.mrb[139].mxu1  ;;  %v2262_v58 = vpop.f32.mrb[139].mxu0 }
 0x2e2   :  { %v2329_v0 = vadd.f32 %v2260_v35, %v1525_v32  ;;  %v2427_v17 = vmax.f32 %v2328_v16, 0.0 }
 0x2e4   :  { %v2428_v25 = vmax.f32 %v2329_v0, 0.0 }
 0x2e5   :  { %v1461_v50 = vpop.f32.mrb[140].mxu1  ;;  %v2265_v10 = vpop.f32.mrb[140].mxu0 }
 0x2e6   :  { %v3102_v39 = vpack.c.bf16 %v2428_v25, %v2427_v17  ;;  %v1526_v38 = vadd.f32 %v3904_v36, %v1461_v50  ;;  %v1463_v22 = vpop.f32.mrb[141].mxu1  ;;  %v2267_v57 = vpop.f32.mrb[141].mxu0  ;;  %v4376_v36 = vld [vmem:[#allocation4_spill] sm:$0xff] }
 0x2e7   :  { %v1464_v48 = vpop.f32.mrb[142].mxu1  ;;  %v2268_v63 = vpop.f32.mrb[142].mxu0 }
 0x2e8   :  { %3138 = vst [vmem:[%s4371_s5 + $0xa0] sm:$0xff] %v3102_v39   ;;  %v2330_v27 = vadd.f32 %v2265_v10, %v1526_v38  ;;  %v1527_v42 = vadd.f32 %v3912_v40, %v1464_v48  ;;  %v1466_v3 = vpop.f32.mrb[143].mxu1  ;;  %v2270_v26 = vpop.f32.mrb[143].mxu0  ;;  %v4377_v40 = vld [vmem:[#allocation6_spill] sm:$0xff] }
 0x2ea   :  { %v2331_v46 = vadd.f32 %v2268_v63, %v1527_v42  ;;  %v2429_v2 = vmax.f32 %v2330_v27, 0.0 }
 0x2ec   :  { %v2430_v4 = vmax.f32 %v2331_v46, 0.0 }
 0x2ed   :  { %v1469_v61 = vpop.f32.mrb[144].mxu1  ;;  %v2273_v45 = vpop.f32.mrb[144].mxu0 }
 0x2ee   :  { %v3107_v19 = vpack.c.bf16 %v2430_v4, %v2429_v2  ;;  %v1528_v31 = vadd.f32 %v1469_v61, %v4376_v36  ;;  %v1471_v11 = vpop.f32.mrb[145].mxu1  ;;  %v2275_v20 = vpop.f32.mrb[145].mxu0 }
 0x2ef   :  { %v1472_v8 = vpop.f32.mrb[146].mxu1  ;;  %v2276_v1 = vpop.f32.mrb[146].mxu0 }
 0x2f0   :  { %3139 = vst [vmem:[%s4371_s5 + $0xa8] sm:$0xff] %v3107_v19   ;;  %v2332_v62 = vadd.f32 %v2273_v45, %v1528_v31  ;;  %v1529_v49 = vadd.f32 %v1472_v8, %v4377_v40  ;;  %v1474_v7 = vpop.f32.mrb[147].mxu1  ;;  %v2278_v24 = vpop.f32.mrb[147].mxu0 }
 0x2f2   :  { %v2333_v53 = vadd.f32 %v2276_v1, %v1529_v49  ;;  %v2431_v23 = vmax.f32 %v2332_v62, 0.0 }
 0x2f4   :  { %v2432_v55 = vmax.f32 %v2333_v53, 0.0 }
 0x2f5   :  { %v1477_v15 = vpop.f32.mrb[148].mxu1  ;;  %v2281_v14 = vpop.f32.mrb[148].mxu0 }
 0x2f6   :  { %v3112_v37 = vpack.c.bf16 %v2432_v55, %v2431_v23  ;;  %v1530_v52 = vadd.f32 %v4378_v56, %v1477_v15  ;;  %v1479_v30 = vpop.f32.mrb[149].mxu1  ;;  %v2283_v43 = vpop.f32.mrb[149].mxu0 }
 0x2f7   :  { %v1480_v54 = vpop.f32.mrb[150].mxu1  ;;  %v2284_v18 = vpop.f32.mrb[150].mxu0 }
 0x2f8   :  { %3140 = vst [vmem:[%s4371_s5 + $0xb0] sm:$0xff] %v3112_v37   ;;  %v2334_v5 = vadd.f32 %v2281_v14, %v1530_v52  ;;  %v1531_v34 = vadd.f32 %v4379_v51, %v1480_v54  ;;  %v1482_v41 = vpop.f32.mrb[151].mxu1  ;;  %v2286_v44 = vpop.f32.mrb[151].mxu0 }
 0x2fa   :  { %v2335_v47 = vadd.f32 %v2284_v18, %v1531_v34  ;;  %v2433_v29 = vmax.f32 %v2334_v5, 0.0 }
 0x2fc   :  { %v2434_v13 = vmax.f32 %v2335_v47, 0.0 }
 0x2fe   :  { %v3117_v9 = vpack.c.bf16 %v2434_v13, %v2433_v29 }
 0x300   :  { %3141 = vst [vmem:[%s4371_s5 + $0xb8] sm:$0xff] %v3117_v9  }

// kernel: graph_matrix_completion_forward.9
= control target key start
LH: loop header
LB: loop body
LE: loop exit
PB: predicated region body
PF: predicated region fallthrough
CT: control target
= control target key end

     0   :  { %s5050_s2 = inlined_call_operand.vmem [shape: bf16[2,128,128], index: 2, kind: input, shape index: {}]   ;;  %s5051_s1 = inlined_call_operand.vmem [shape: bf16[384,128], index: 1, kind: input, shape index: {}]   ;;  %s5052_s4 = inlined_call_operand.vmem [shape: bf16[128,128], index: 4, kind: input, shape index: {}]   ;;  %s5053_s3 = inlined_call_operand.vmem [shape: bf16[256,128], index: 3, kind: input, shape index: {}]   ;;  %s5054_s0 = inlined_call_operand.vmem [shape: bf16[2,256,384], index: 0, kind: input, shape index: {}]   ;;  %s5055_s5 = inlined_call_operand.vmem [shape: bf16[256,128], index: 5, kind: output, shape index: {}]  }
   0x1   :  { %v4000_v0 = vld [vmem:[%s5050_s2] sm:$0xff]   ;;  %v4001_v1 = vld [vmem:[%s5050_s2 + $0x8] sm:$0xff]   ;;  %v4002_v2 = vld [vmem:[%s5050_s2 + $0x10] sm:$0xff]  }
   0x2   :  { %3648 = vmatprep.subr.bf16.mxu1 %v4000_v0  ;;  %v4003_v3 = vld [vmem:[%s5050_s2 + $0x18] sm:$0xff]   ;;  %v4237_v4 = vld [vmem:[%s5051_s1] sm:$0xff]   ;;  %v4005_v6 = vld [vmem:[%s5050_s2 + $0x28] sm:$0xff]  }
   0x3   :  { %3649 = vmatpush3.bf16.msra.mxu1 %v4000_v0  ;;  %3664 = vmatprep.mubr.bf16.mxu1 %v4237_v4  ;;  %v4004_v5 = vld [vmem:[%s5050_s2 + $0x20] sm:$0xff]   ;;  %v4006_v7 = vld [vmem:[%s5050_s2 + $0x30] sm:$0xff]   ;;  %v4007_v8 = vld [vmem:[%s5050_s2 + $0x38] sm:$0xff]  }
   0x4   :  { %3650 = vmatprep.subr.bf16.mxu1 %v4001_v1  ;;  %v4026_v9 = vld [vmem:[%s5050_s2 + $0x40] sm:$0xff]   ;;  %v4258_v10 = vld [vmem:[%s5051_s1 + $0x8] sm:$0xff]   ;;  %v4263_v11 = vld [vmem:[%s5051_s1 + $0x10] sm:$0xff]  }
   0x5   :  { %v4027_v12 = vld [vmem:[%s5050_s2 + $0x48] sm:$0xff]   ;;  %v4030_v13 = vld [vmem:[%s5050_s2 + $0x50] sm:$0xff]   ;;  %v4276_v14 = vld [vmem:[%s5051_s1 + $0x18] sm:$0xff]  }
   0x6   :  { %v4281_v15 = vld [vmem:[%s5051_s1 + $0x20] sm:$0xff]   ;;  %v4031_v16 = vld [vmem:[%s5050_s2 + $0x58] sm:$0xff]   ;;  %v4294_v18 = vld [vmem:[%s5051_s1 + $0x28] sm:$0xff]  }
   0x7   :  { %3651 = vmatpush3.bf16.msra.mxu1 %v4001_v1  ;;  %v4034_v17 = vld [vmem:[%s5050_s2 + $0x60] sm:$0xff]   ;;  %v4299_v19 = vld [vmem:[%s5051_s1 + $0x30] sm:$0xff]   ;;  %v4035_v20 = vld [vmem:[%s5050_s2 + $0x68] sm:$0xff]  }
   0x8   :  { %3652 = vmatprep.subr.bf16.mxu1 %v4002_v2  ;;  %v4038_v21 = vld [vmem:[%s5050_s2 + $0x70] sm:$0xff]   ;;  %v4312_v22 = vld [vmem:[%s5051_s1 + $0x38] sm:$0xff]   ;;  %v4317_v23 = vld [vmem:[%s5051_s1 + $0x40] sm:$0xff]  }
   0x9   :  { %v4039_v24 = vld [vmem:[%s5050_s2 + $0x78] sm:$0xff]   ;;  %v4040_v25 = vld [vmem:[%s5052_s4] sm:$0xff]   ;;  %v4041_v26 = vld [vmem:[%s5052_s4 + $0x8] sm:$0xff]  }
   0xa   :  { %v4333_v27 = vld [vmem:[%s5051_s1 + $0x48] sm:$0xff]   ;;  %3600 = vmatprep.subr.bf16.mxu0 %v4040_v25  ;;  %v4338_v28 = vld [vmem:[%s5051_s1 + $0x50] sm:$0xff]   ;;  %v4043_v30 = vld [vmem:[%s5052_s4 + $0x18] sm:$0xff]  }
   0xb   :  { %3653 = vmatpush3.bf16.msra.mxu1 %v4002_v2  ;;  %3601 = vmatpush3.bf16.msra.mxu0 %v4040_v25  ;;  %v4042_v29 = vld [vmem:[%s5052_s4 + $0x10] sm:$0xff]   ;;  %v4351_v31 = vld [vmem:[%s5051_s1 + $0x58] sm:$0xff]   ;;  %v4356_v32 = vld [vmem:[%s5051_s1 + $0x60] sm:$0xff]  }
   0xc   :  { %3654 = vmatprep.subr.bf16.mxu1 %v4003_v3  ;;  %3602 = vmatprep.subr.bf16.mxu0 %v4041_v26  ;;  %v4044_v33 = vld [vmem:[%s5052_s4 + $0x20] sm:$0xff]   ;;  %v4045_v34 = vld [vmem:[%s5052_s4 + $0x28] sm:$0xff]   ;;  %v4374_v36 = vld [vmem:[%s5051_s1 + $0x70] sm:$0xff]  }
   0xd   :  { %v4369_v35 = vld [vmem:[%s5051_s1 + $0x68] sm:$0xff]   ;;  %v4046_v37 = vld [vmem:[%s5052_s4 + $0x30] sm:$0xff]   ;;  %v4384_v38 = vld [vmem:[%s5051_s1 + $0x78] sm:$0xff]  }
   0xe   :  { %v4389_v39 = vld [vmem:[%s5051_s1 + $0x80] sm:$0xff]   ;;  %v4396_v40 = vld [vmem:[%s5051_s1 + $0x88] sm:$0xff]   ;;  %v4401_v41 = vld [vmem:[%s5051_s1 + $0x90] sm:$0xff]  }
   0xf   :  { %3655 = vmatpush3.bf16.msra.mxu1 %v4003_v3  ;;  %3603 = vmatpush3.bf16.msra.mxu0 %v4041_v26  ;;  %v4408_v42 = vld [vmem:[%s5051_s1 + $0x98] sm:$0xff]   ;;  %v4413_v43 = vld [vmem:[%s5051_s1 + $0xa0] sm:$0xff]   ;;  %v4420_v44 = vld [vmem:[%s5051_s1 + $0xa8] sm:$0xff]  }
  0x10   :  { %3656 = vmatprep.subr.bf16.mxu1 %v4004_v5  ;;  %3604 = vmatprep.subr.bf16.mxu0 %v4042_v29  ;;  %v4425_v45 = vld [vmem:[%s5051_s1 + $0xb0] sm:$0xff]   ;;  %v4047_v46 = vld [vmem:[%s5052_s4 + $0x38] sm:$0xff]   ;;  %v4048_v48 = vld [vmem:[%s5053_s3] sm:$0xff]  }
  0x11   :  { %v4037_v47 = vld [vmem:[%s5051_s1 + $0xb8] sm:$0xff]   ;;  %v4049_v49 = vld [vmem:[%s5053_s3 + $0x8] sm:$0xff]   ;;  %3616 = vmatprep.mubr.bf16.mxu0 %v4048_v48  ;;  %v4050_v50 = vld [vmem:[%s5053_s3 + $0x10] sm:$0xff]  }
  0x12   :  { %v4051_v51 = vld [vmem:[%s5053_s3 + $0x18] sm:$0xff]   ;;  %v4052_v52 = vld [vmem:[%s5053_s3 + $0x20] sm:$0xff]   ;;  %v4053_v53 = vld [vmem:[%s5053_s3 + $0x28] sm:$0xff]  }
  0x13   :  { %3657 = vmatpush3.bf16.msra.mxu1 %v4004_v5  ;;  %3605 = vmatpush3.bf16.msra.mxu0 %v4042_v29  ;;  %v4054_v54 = vld [vmem:[%s5053_s3 + $0x30] sm:$0xff]   ;;  %v4055_v55 = vld [vmem:[%s5053_s3 + $0x38] sm:$0xff]   ;;  %v4056_v56 = vld [vmem:[%s5053_s3 + $0x40] sm:$0xff]  }
  0x14   :  { %3658 = vmatprep.subr.bf16.mxu1 %v4005_v6  ;;  %3606 = vmatprep.subr.bf16.mxu0 %v4043_v30  ;;  %v4057_v57 = vld [vmem:[%s5053_s3 + $0x48] sm:$0xff]   ;;  %v4058_v58 = vld [vmem:[%s5053_s3 + $0x50] sm:$0xff]   ;;  %v4059_v59 = vld [vmem:[%s5053_s3 + $0x58] sm:$0xff]  }
  0x15   :  { %v4060_v60 = vld [vmem:[%s5053_s3 + $0x60] sm:$0xff]   ;;  %v4061_v61 = vld [vmem:[%s5053_s3 + $0x68] sm:$0xff]   ;;  %v4062_v62 = vld [vmem:[%s5053_s3 + $0x70] sm:$0xff]  }
  0x16   :  { %v4063_v63 = vld [vmem:[%s5053_s3 + $0x78] sm:$0xff]   ;;  %v4066_v0 = vld [vmem:[%s5054_s0 + $0x4] ss:$12 sps:$4 sm:$0xff]  }
  0x17   :  { %3659 = vmatpush3.bf16.msra.mxu1 %v4005_v6  ;;  %3607 = vmatpush3.bf16.msra.mxu0 %v4043_v30 }
  0x18   :  { %3660 = vmatprep.subr.bf16.mxu1 %v4006_v7  ;;  %3608 = vmatprep.subr.bf16.mxu0 %v4044_v33 }
  0x1b   :  { %3661 = vmatpush3.bf16.msra.mxu1 %v4006_v7  ;;  %3609 = vmatpush3.bf16.msra.mxu0 %v4044_v33 }
  0x1c   :  { %3662 = vmatprep.subr.bf16.mxu1 %v4007_v8  ;;  %3610 = vmatprep.subr.bf16.mxu0 %v4045_v34 }
  0x1f   :  { %3663 = vmatpush3.bf16.msra.mxu1 %v4007_v8  ;;  %3611 = vmatpush3.bf16.msra.mxu0 %v4045_v34 }
  0x20   :  { %3760 = vmatprep.subr.bf16.mxu1 %v4026_v9  ;;  %3612 = vmatprep.subr.bf16.mxu0 %v4046_v37 }
  0x22   :  { %3665 = vmatmul.mubr.bf16.vlgmr.msra.gmra.mrb[0].mxu1 %v4258_v10 }
  0x23   :  { %3668 = vmatprep.mubr.bf16.mxu1 %v4263_v11  ;;  %3761 = vmatpush3.bf16.msra.mxu1 %v4026_v9 }
  0x24   :  { %3762 = vmatprep.subr.bf16.mxu1 %v4027_v12  ;;  %3613 = vmatpush3.bf16.msra.mxu0 %v4046_v37 }
  0x25   :  { %3614 = vmatprep.subr.bf16.mxu0 %v4047_v46 }
  0x27   :  { %3763 = vmatpush3.bf16.msra.mxu1 %v4027_v12 }
  0x28   :  { %3764 = vmatprep.subr.bf16.mxu1 %v4030_v13  ;;  %3615 = vmatpush3.bf16.msra.mxu0 %v4047_v46 }
  0x2a   :  { %3669 = vmatmul.mubr.bf16.gmra.mrb[4].mxu1 %v4276_v14 }
  0x2b   :  { %3672 = vmatprep.mubr.bf16.mxu1 %v4281_v15  ;;  %3765 = vmatpush3.bf16.msra.mxu1 %v4030_v13 }
  0x2c   :  { %3766 = vmatprep.subr.bf16.mxu1 %v4031_v16  ;;  %3617 = vmatmul.mubr.bf16.vlgmr.msra.gmra.mrb[0].mxu0 %v4049_v49 }
  0x2d   :  { %3620 = vmatprep.mubr.bf16.mxu0 %v4050_v50 }
  0x2f   :  { %3767 = vmatpush3.bf16.msra.mxu1 %v4031_v16 }
  0x30   :  { %3768 = vmatprep.subr.bf16.mxu1 %v4034_v17 }
  0x32   :  { %3673 = vmatmul.mubr.bf16.gmra.mrb[8].mxu1 %v4294_v18 }
  0x33   :  { %3676 = vmatprep.mubr.bf16.mxu1 %v4299_v19  ;;  %3769 = vmatpush3.bf16.msra.mxu1 %v4034_v17 }
  0x34   :  { %3770 = vmatprep.subr.bf16.mxu1 %v4035_v20  ;;  %3621 = vmatmul.mubr.bf16.gmra.mrb[4].mxu0 %v4051_v51 }
  0x35   :  { %3624 = vmatprep.mubr.bf16.mxu0 %v4052_v52 }
  0x37   :  { %3771 = vmatpush3.bf16.msra.mxu1 %v4035_v20 }
  0x38   :  { %3772 = vmatprep.subr.bf16.mxu1 %v4038_v21 }
  0x3a   :  { %3677 = vmatmul.mubr.bf16.gmra.mrb[12].mxu1 %v4312_v22 }
  0x3b   :  { %3680 = vmatprep.mubr.bf16.mxu1 %v4317_v23  ;;  %3773 = vmatpush3.bf16.msra.mxu1 %v4038_v21 }
  0x3c   :  { %3774 = vmatprep.subr.bf16.mxu1 %v4039_v24  ;;  %3625 = vmatmul.mubr.bf16.gmra.mrb[8].mxu0 %v4053_v53  ;;  %v4064_v53 = vld [vmem:[%s5054_s0] ss:$12 sps:$4 sm:$0xff]  }
  0x3d   :  { %3628 = vmatprep.mubr.bf16.mxu0 %v4054_v54 }
  0x3f   :  { %3775 = vmatpush3.bf16.msra.mxu1 %v4039_v24 }
  0x42   :  { %3681 = vmatmul.mubr.bf16.gmra.mrb[16].mxu1 %v4333_v27 }
  0x43   :  { %3684 = vmatprep.mubr.bf16.mxu1 %v4338_v28 }
  0x44   :  { %3629 = vmatmul.mubr.bf16.gmra.mrb[12].mxu0 %v4055_v55 }
  0x45   :  { %3632 = vmatprep.mubr.bf16.mxu0 %v4056_v56  ;;  %v4067_v56 = vld [vmem:[%s5054_s0 + $0x1c] ss:$12 sps:$4 sm:$0xff]  }
  0x4a   :  { %3685 = vmatmul.mubr.bf16.gmra.mrb[20].mxu1 %v4351_v31 }
  0x4b   :  { %3688 = vmatprep.mubr.bf16.mxu1 %v4356_v32 }
  0x4c   :  { %3633 = vmatmul.mubr.bf16.gmra.mrb[16].mxu0 %v4057_v57 }
  0x4d   :  { %3636 = vmatprep.mubr.bf16.mxu0 %v4058_v58 }
  0x52   :  { %3689 = vmatmul.mubr.bf16.gmra.mrb[24].mxu1 %v4369_v35 }
  0x53   :  { %3692 = vmatprep.mubr.bf16.mxu1 %v4374_v36 }
  0x54   :  { %3637 = vmatmul.mubr.bf16.gmra.mrb[20].mxu0 %v4059_v59 }
  0x55   :  { %3640 = vmatprep.mubr.bf16.mxu0 %v4060_v60 }
  0x5a   :  { %3693 = vmatmul.mubr.bf16.gmra.mrb[28].mxu1 %v4384_v38 }
  0x5b   :  { %3696 = vmatprep.mubr.bf16.mxu1 %v4389_v39 }
  0x5c   :  { %3641 = vmatmul.mubr.bf16.gmra.mrb[24].mxu0 %v4061_v61  ;;  %v4069_v61 = vld [vmem:[%s5054_s0 + $0x18] ss:$12 sps:$4 sm:$0xff]  }
  0x5d   :  { %3644 = vmatprep.mubr.bf16.mxu0 %v4062_v62 }
  0x62   :  { %3697 = vmatmul.mubr.bf16.gmra.mrb[32].mxu1 %v4396_v40 }
  0x63   :  { %3700 = vmatprep.mubr.bf16.mxu1 %v4401_v41 }
  0x64   :  { %3645 = vmatmul.mubr.bf16.gmra.mrb[28].mxu0 %v4063_v63 }
  0x65   :  { %1299 = vmatprep.mubr.bf16.mxu0 %v4066_v0  ;;  %v4070_v0 = vld [vmem:[%s5054_s0 + $0x34] ss:$12 sps:$4 sm:$0xff]  }
  0x6a   :  { %3701 = vmatmul.mubr.bf16.gmra.mrb[36].mxu1 %v4408_v42 }
  0x6b   :  { %3704 = vmatprep.mubr.bf16.mxu1 %v4413_v43 }
  0x72   :  { %3705 = vmatmul.mubr.bf16.gmra.mrb[40].mxu1 %v4420_v44 }
  0x73   :  { %3708 = vmatprep.mubr.bf16.mxu1 %v4425_v45 }
  0x7a   :  { %3709 = vmatmul.mubr.bf16.gmra.mrb[44].mxu1 %v4037_v47 }
  0x7b   :  { %3776 = vmatprep.mubr.bf16.mxu1 %v4237_v4 }
  0x82   :  { %3777 = vmatmul.mubr.bf16.vlgmr.msra.gmra.mrb[48].mxu1 %v4258_v10 }
  0x83   :  { %3780 = vmatprep.mubr.bf16.mxu1 %v4263_v11 }
  0x8a   :  { %3781 = vmatmul.mubr.bf16.gmra.mrb[52].mxu1 %v4276_v14 }
  0x8b   :  { %3784 = vmatprep.mubr.bf16.mxu1 %v4281_v15 }
  0x92   :  { %3785 = vmatmul.mubr.bf16.gmra.mrb[56].mxu1 %v4294_v18 }
  0x93   :  { %3788 = vmatprep.mubr.bf16.mxu1 %v4299_v19 }
  0x9a   :  { %3789 = vmatmul.mubr.bf16.gmra.mrb[60].mxu1 %v4312_v22 }
  0x9b   :  { %3792 = vmatprep.mubr.bf16.mxu1 %v4317_v23 }
  0xa2   :  { %3793 = vmatmul.mubr.bf16.gmra.mrb[64].mxu1 %v4333_v27 }
  0xa3   :  { %3796 = vmatprep.mubr.bf16.mxu1 %v4338_v28 }
  0xaa   :  { %3797 = vmatmul.mubr.bf16.gmra.mrb[68].mxu1 %v4351_v31  ;;  %v4104_v31 = vld [vmem:[%s5054_s0 + $0x184] ss:$12 sps:$4 sm:$0xff]  }
  0xab   :  { %3800 = vmatprep.mubr.bf16.mxu1 %v4356_v32 }
  0xb2   :  { %3801 = vmatmul.mubr.bf16.gmra.mrb[72].mxu1 %v4369_v35 }
  0xb3   :  { %3804 = vmatprep.mubr.bf16.mxu1 %v4374_v36 }
  0xba   :  { %3805 = vmatmul.mubr.bf16.gmra.mrb[76].mxu1 %v4384_v38 }
  0xbb   :  { %3808 = vmatprep.mubr.bf16.mxu1 %v4389_v39 }
  0xc2   :  { %3809 = vmatmul.mubr.bf16.gmra.mrb[80].mxu1 %v4396_v40 }
  0xc3   :  { %3812 = vmatprep.mubr.bf16.mxu1 %v4401_v41 }
  0xca   :  { %3813 = vmatmul.mubr.bf16.gmra.mrb[84].mxu1 %v4408_v42 }
  0xcb   :  { %3816 = vmatprep.mubr.bf16.mxu1 %v4413_v43 }
  0xd2   :  { %3817 = vmatmul.mubr.bf16.gmra.mrb[88].mxu1 %v4420_v44 }
  0xd3   :  { %3820 = vmatprep.mubr.bf16.mxu1 %v4425_v45 }
  0xda   :  { %3821 = vmatmul.mubr.bf16.gmra.mrb[92].mxu1 %v4037_v47 }
  0xdb   :  { %2288 = vmatprep.mubr.bf16.mxu1 %v4104_v31 }
  0xf5   :  { %v3666_v1 = vpop.f32.mrb[0].mxu1 }
  0xf6   :  { %v732_v2 = vpop.f32.mrb[1].mxu1 }
  0xf7   :  { %v3667_v3 = vpop.f32.mrb[2].mxu1 }
  0xf8   :  { %v924_v4 = vpack.c.bf16 %v3667_v3, %v3666_v1  ;;  %v735_v5 = vpop.f32.mrb[3].mxu1 }
  0xf9   :  { %v923_v6 = vpack.c.bf16 %v735_v5, %v732_v2  ;;  %v4072_v5 = vld [vmem:[%s5054_s0 + $0x30] ss:$12 sps:$4 sm:$0xff]  }
  0xfd   :  { %v3670_v7 = vpop.f32.mrb[4].mxu1 }
  0xfe   :  { %v748_v8 = vpop.f32.mrb[5].mxu1 }
  0xff   :  { %v3671_v9 = vpop.f32.mrb[6].mxu1 }
 0x100   :  { %v926_v10 = vpack.c.bf16 %v3671_v9, %v3670_v7  ;;  %v751_v11 = vpop.f32.mrb[7].mxu1 }
 0x101   :  { %v925_v12 = vpack.c.bf16 %v751_v11, %v748_v8  ;;  %v4073_v8 = vld [vmem:[%s5054_s0 + $0x4c] ss:$12 sps:$4 sm:$0xff]  }
 0x105   :  { %v3674_v13 = vpop.f32.mrb[8].mxu1 }
 0x106   :  { %v764_v14 = vpop.f32.mrb[9].mxu1 }
 0x107   :  { %v3675_v15 = vpop.f32.mrb[10].mxu1 }
 0x108   :  { %v928_v16 = vpack.c.bf16 %v3675_v15, %v3674_v13  ;;  %v767_v17 = vpop.f32.mrb[11].mxu1  ;;  %v4075_v13 = vld [vmem:[%s5054_s0 + $0x48] ss:$12 sps:$4 sm:$0xff]  }
 0x109   :  { %v927_v18 = vpack.c.bf16 %v767_v17, %v764_v14 }
 0x10d   :  { %v3678_v19 = vpop.f32.mrb[12].mxu1 }
 0x10e   :  { %v780_v20 = vpop.f32.mrb[13].mxu1 }
 0x10f   :  { %v3679_v21 = vpop.f32.mrb[14].mxu1 }
 0x110   :  { %v930_v22 = vpack.c.bf16 %v3679_v21, %v3678_v19  ;;  %v783_v23 = vpop.f32.mrb[15].mxu1  ;;  %v4078_v21 = vld [vmem:[%s5054_s0 + $0x60] ss:$12 sps:$4 sm:$0xff]  }
 0x111   :  { %v929_v24 = vpack.c.bf16 %v783_v23, %v780_v20 }
 0x115   :  { %v3682_v25 = vpop.f32.mrb[16].mxu1 }
 0x116   :  { %v796_v26 = vpop.f32.mrb[17].mxu1 }
 0x117   :  { %v3683_v27 = vpop.f32.mrb[18].mxu1 }
 0x118   :  { %v932_v28 = vpack.c.bf16 %v3683_v27, %v3682_v25  ;;  %v799_v29 = vpop.f32.mrb[19].mxu1 }
 0x119   :  { %v931_v30 = vpack.c.bf16 %v799_v29, %v796_v26  ;;  %v4081_v29 = vld [vmem:[%s5054_s0 + $0x78] ss:$12 sps:$4 sm:$0xff]  }
 0x11b   :  { %3296 = vmatprep.subr.bf16.mxu0 %v931_v30 }
 0x11c   :  { %3297 = vmatpush3.bf16.msra.mxu0 %v923_v6 }
 0x11d   :  { %v3686_v32 = vpop.f32.mrb[20].mxu1  ;;  %3298 = vmatprep.subr.bf16.mxu0 %v932_v28 }
 0x11e   :  { %v812_v33 = vpop.f32.mrb[21].mxu1 }
 0x11f   :  { %v3687_v34 = vpop.f32.mrb[22].mxu1 }
 0x120   :  { %v934_v35 = vpack.c.bf16 %v3687_v34, %v3686_v32  ;;  %v815_v36 = vpop.f32.mrb[23].mxu1  ;;  %3299 = vmatpush3.bf16.msra.mxu0 %v924_v4  ;;  %v4082_v32 = vld [vmem:[%s5054_s0 + $0x94] ss:$12 sps:$4 sm:$0xff]  }
 0x121   :  { %v933_v37 = vpack.c.bf16 %v815_v36, %v812_v33 }
 0x123   :  { %3300 = vmatprep.subr.bf16.mxu0 %v933_v37  ;;  %v4084_v37 = vld [vmem:[%s5054_s0 + $0x90] ss:$12 sps:$4 sm:$0xff]  }
 0x124   :  { %3301 = vmatpush3.bf16.msra.mxu0 %v925_v12 }
 0x125   :  { %v3690_v38 = vpop.f32.mrb[24].mxu1  ;;  %3302 = vmatprep.subr.bf16.mxu0 %v934_v35 }
 0x126   :  { %v828_v39 = vpop.f32.mrb[25].mxu1 }
 0x127   :  { %v3691_v40 = vpop.f32.mrb[26].mxu1 }
 0x128   :  { %v936_v41 = vpack.c.bf16 %v3691_v40, %v3690_v38  ;;  %v831_v42 = vpop.f32.mrb[27].mxu1  ;;  %3303 = vmatpush3.bf16.msra.mxu0 %v926_v10  ;;  %v4085_v40 = vld [vmem:[%s5054_s0 + $0xac] ss:$12 sps:$4 sm:$0xff]  }
 0x129   :  { %v935_v43 = vpack.c.bf16 %v831_v42, %v828_v39 }
 0x12b   :  { %3304 = vmatprep.subr.bf16.mxu0 %v935_v43 }
 0x12c   :  { %3305 = vmatpush3.bf16.msra.mxu0 %v927_v18 }
 0x12d   :  { %v3694_v44 = vpop.f32.mrb[28].mxu1  ;;  %3306 = vmatprep.subr.bf16.mxu0 %v936_v41 }
 0x12e   :  { %v844_v45 = vpop.f32.mrb[29].mxu1 }
 0x12f   :  { %v3695_v46 = vpop.f32.mrb[30].mxu1 }
 0x130   :  { %v938_v47 = vpack.c.bf16 %v3695_v46, %v3694_v44  ;;  %v847_v48 = vpop.f32.mrb[31].mxu1  ;;  %3307 = vmatpush3.bf16.msra.mxu0 %v928_v16  ;;  %v4076_v16 = vld [vmem:[%s5054_s0 + $0x64] ss:$12 sps:$4 sm:$0xff]  }
 0x131   :  { %v937_v49 = vpack.c.bf16 %v847_v48, %v844_v45  ;;  %v4087_v45 = vld [vmem:[%s5054_s0 + $0xa8] ss:$12 sps:$4 sm:$0xff]   ;;  %v4088_v48 = vld [vmem:[%s5054_s0 + $0xc4] ss:$12 sps:$4 sm:$0xff]  }
 0x133   :  { %3308 = vmatprep.subr.bf16.mxu0 %v937_v49 }
 0x134   :  { %3309 = vmatpush3.bf16.msra.mxu0 %v929_v24  ;;  %v4079_v24 = vld [vmem:[%s5054_s0 + $0x7c] ss:$12 sps:$4 sm:$0xff]  }
 0x135   :  { %v3698_v50 = vpop.f32.mrb[32].mxu1  ;;  %3310 = vmatprep.subr.bf16.mxu0 %v938_v47 }
 0x136   :  { %v860_v51 = vpop.f32.mrb[33].mxu1 }
 0x137   :  { %v3699_v52 = vpop.f32.mrb[34].mxu1 }
 0x138   :  { %v940_v54 = vpack.c.bf16 %v3699_v52, %v3698_v50  ;;  %v863_v55 = vpop.f32.mrb[35].mxu1  ;;  %3311 = vmatpush3.bf16.msra.mxu0 %v930_v22 }
 0x139   :  { %v939_v57 = vpack.c.bf16 %v863_v55, %v860_v51 }
 0x13b   :  { %1300 = vmatmul.mubr.bf16.vlgmr.msra.gmra.mrb[32].mxu0 %v4064_v53  ;;  %3712 = vmatprep.subr.bf16.mxu0 %v939_v57  ;;  %v4090_v53 = vld [vmem:[%s5054_s0 + $0xc0] ss:$12 sps:$4 sm:$0xff]  }
 0x13c   :  { %3713 = vmatpush3.bf16.msra.mxu0 %v939_v57  ;;  %1307 = vmatprep.mubr.bf16.mxu0 %v4067_v56  ;;  %v4091_v56 = vld [vmem:[%s5054_s0 + $0xdc] ss:$12 sps:$4 sm:$0xff]  }
 0x13d   :  { %v3702_v58 = vpop.f32.mrb[36].mxu1  ;;  %3714 = vmatprep.subr.bf16.mxu0 %v940_v54 }
 0x13e   :  { %v876_v59 = vpop.f32.mrb[37].mxu1 }
 0x13f   :  { %v3703_v60 = vpop.f32.mrb[38].mxu1 }
 0x140   :  { %v942_v62 = vpack.c.bf16 %v3703_v60, %v3702_v58  ;;  %v879_v63 = vpop.f32.mrb[39].mxu1  ;;  %3715 = vmatpush3.bf16.msra.mxu0 %v940_v54 }
 0x141   :  { %v941_v1 = vpack.c.bf16 %v879_v63, %v876_v59 }
 0x143   :  { %1308 = vmatmul.mubr.bf16.gmra.mrb[36].mxu0 %v4069_v61  ;;  %3716 = vmatprep.subr.bf16.mxu0 %v941_v1  ;;  %v4093_v61 = vld [vmem:[%s5054_s0 + $0xd8] ss:$12 sps:$4 sm:$0xff]  }
 0x144   :  { %3717 = vmatpush3.bf16.msra.mxu0 %v941_v1  ;;  %1315 = vmatprep.mubr.bf16.mxu0 %v4070_v0  ;;  %v4094_v0 = vld [vmem:[%s5054_s0 + $0xf4] ss:$12 sps:$4 sm:$0xff]  }
 0x145   :  { %v3706_v2 = vpop.f32.mrb[40].mxu1  ;;  %3718 = vmatprep.subr.bf16.mxu0 %v942_v62 }
 0x146   :  { %v892_v3 = vpop.f32.mrb[41].mxu1 }
 0x147   :  { %v3707_v4 = vpop.f32.mrb[42].mxu1 }
 0x148   :  { %v944_v6 = vpack.c.bf16 %v3707_v4, %v3706_v2  ;;  %v895_v7 = vpop.f32.mrb[43].mxu1  ;;  %3719 = vmatpush3.bf16.msra.mxu0 %v942_v62 }
 0x149   :  { %v943_v9 = vpack.c.bf16 %v895_v7, %v892_v3 }
 0x14b   :  { %1316 = vmatmul.mubr.bf16.gmra.mrb[40].mxu0 %v4072_v5  ;;  %3720 = vmatprep.subr.bf16.mxu0 %v943_v9  ;;  %v4096_v5 = vld [vmem:[%s5054_s0 + $0xf0] ss:$12 sps:$4 sm:$0xff]  }
 0x14c   :  { %3721 = vmatpush3.bf16.msra.mxu0 %v943_v9  ;;  %1323 = vmatprep.mubr.bf16.mxu0 %v4073_v8  ;;  %v4097_v8 = vld [vmem:[%s5054_s0 + $0x10c] ss:$12 sps:$4 sm:$0xff]  }
 0x14d   :  { %v3710_v10 = vpop.f32.mrb[44].mxu1  ;;  %3722 = vmatprep.subr.bf16.mxu0 %v944_v6 }
 0x14e   :  { %v908_v11 = vpop.f32.mrb[45].mxu1 }
 0x14f   :  { %v3711_v12 = vpop.f32.mrb[46].mxu1 }
 0x150   :  { %v946_v14 = vpack.c.bf16 %v3711_v12, %v3710_v10  ;;  %v911_v15 = vpop.f32.mrb[47].mxu1  ;;  %3723 = vmatpush3.bf16.msra.mxu0 %v944_v6 }
 0x151   :  { %v945_v17 = vpack.c.bf16 %v911_v15, %v908_v11 }
 0x153   :  { %1324 = vmatmul.mubr.bf16.gmra.mrb[44].mxu0 %v4075_v13  ;;  %3724 = vmatprep.subr.bf16.mxu0 %v945_v17  ;;  %v4099_v13 = vld [vmem:[%s5054_s0 + $0x108] ss:$12 sps:$4 sm:$0xff]  }
 0x154   :  { %3725 = vmatpush3.bf16.msra.mxu0 %v945_v17  ;;  %1331 = vmatprep.mubr.bf16.mxu0 %v4076_v16  ;;  %v4100_v16 = vld [vmem:[%s5054_s0 + $0x124] ss:$12 sps:$4 sm:$0xff]  }
 0x155   :  { %3726 = vmatprep.subr.bf16.mxu0 %v946_v14  ;;  %v3778_v18 = vpop.f32.mrb[48].mxu1 }
 0x156   :  { %v1720_v19 = vpop.f32.mrb[49].mxu1 }
 0x157   :  { %v3779_v20 = vpop.f32.mrb[50].mxu1 }
 0x158   :  { %v1912_v22 = vpack.c.bf16 %v3779_v20, %v3778_v18  ;;  %3727 = vmatpush3.bf16.msra.mxu0 %v946_v14  ;;  %v1723_v23 = vpop.f32.mrb[51].mxu1  ;;  %v4102_v20 = vld [vmem:[%s5054_s0 + $0x180] ss:$12 sps:$4 sm:$0xff]  }
 0x159   :  { %v1911_v25 = vpack.c.bf16 %v1723_v23, %v1720_v19  ;;  %v4106_v23 = vld [vmem:[%s5054_s0 + $0x13c] ss:$12 sps:$4 sm:$0xff]  }
 0x15b   :  { %1332 = vmatmul.mubr.bf16.gmra.mrb[48].mxu0 %v4078_v21  ;;  %v4105_v21 = vld [vmem:[%s5054_s0 + $0x120] ss:$12 sps:$4 sm:$0xff]  }
 0x15c   :  { %1339 = vmatprep.mubr.bf16.mxu0 %v4079_v24  ;;  %v4108_v24 = vld [vmem:[%s5054_s0 + $0x19c] ss:$12 sps:$4 sm:$0xff]  }
 0x15d   :  { %v4542_v26 = vpop.f32.mrb[52].mxu1 }
 0x15e   :  { %v1736_v27 = vpop.f32.mrb[53].mxu1 }
 0x15f   :  { %v3783_v28 = vpop.f32.mrb[54].mxu1 }
 0x160   :  { %v1914_v30 = vpack.c.bf16 %v3783_v28, %v4542_v26  ;;  %v1739_v31 = vpop.f32.mrb[55].mxu1 }
 0x161   :  { %v1913_v33 = vpack.c.bf16 %v1739_v31, %v1736_v27  ;;  %v4111_v31 = vld [vmem:[%s5054_s0 + $0x198] ss:$12 sps:$4 sm:$0xff]  }
 0x163   :  { %1340 = vmatmul.mubr.bf16.gmra.mrb[52].mxu0 %v4081_v29 }
 0x164   :  { %1347 = vmatprep.mubr.bf16.mxu0 %v4082_v32 }
 0x165   :  { %v4551_v34 = vpop.f32.mrb[56].mxu1 }
 0x166   :  { %v1752_v35 = vpop.f32.mrb[57].mxu1 }
 0x167   :  { %v4553_v36 = vpop.f32.mrb[58].mxu1 }
 0x168   :  { %v1916_v38 = vpack.c.bf16 %v4553_v36, %v4551_v34  ;;  %v1755_v39 = vpop.f32.mrb[59].mxu1  ;;  %v4114_v34 = vld [vmem:[%s5054_s0 + $0x1b4] ss:$12 sps:$4 sm:$0xff]  }
 0x169   :  { %v1915_v41 = vpack.c.bf16 %v1755_v39, %v1752_v35 }
 0x16b   :  { %1348 = vmatmul.mubr.bf16.gmra.mrb[56].mxu0 %v4084_v37 }
 0x16c   :  { %1355 = vmatprep.mubr.bf16.mxu0 %v4085_v40  ;;  %v4116_v40 = vld [vmem:[%s5054_s0 + $0x150] ss:$12 sps:$4 sm:$0xff]  }
 0x16d   :  { %v4563_v42 = vpop.f32.mrb[60].mxu1 }
 0x16e   :  { %v1768_v43 = vpop.f32.mrb[61].mxu1 }
 0x16f   :  { %v4565_v44 = vpop.f32.mrb[62].mxu1 }
 0x170   :  { %v1918_v46 = vpack.c.bf16 %v4565_v44, %v4563_v42  ;;  %v1771_v47 = vpop.f32.mrb[63].mxu1  ;;  %v4120_v44 = vld [vmem:[%s5054_s0 + $0x1cc] ss:$12 sps:$4 sm:$0xff]  }
 0x171   :  { %v1917_v49 = vpack.c.bf16 %v1771_v47, %v1768_v43  ;;  %v4118_v43 = vld [vmem:[%s5054_s0 + $0x16c] ss:$12 sps:$4 sm:$0xff]  }
 0x173   :  { %1356 = vmatmul.mubr.bf16.gmra.mrb[60].mxu0 %v4087_v45 }
 0x174   :  { %1363 = vmatprep.mubr.bf16.mxu0 %v4088_v48 }
 0x175   :  { %v3794_v50 = vpop.f32.mrb[64].mxu1 }
 0x176   :  { %v1784_v51 = vpop.f32.mrb[65].mxu1 }
 0x177   :  { %v3795_v52 = vpop.f32.mrb[66].mxu1 }
 0x178   :  { %v1920_v54 = vpack.c.bf16 %v3795_v52, %v3794_v50  ;;  %v1787_v55 = vpop.f32.mrb[67].mxu1  ;;  %v4122_v50 = vld [vmem:[%s5054_s0 + $0x168] ss:$12 sps:$4 sm:$0xff]  }
 0x179   :  { %v1919_v57 = vpack.c.bf16 %v1787_v55, %v1784_v51  ;;  %v4123_v51 = vld [vmem:[%s5054_s0 + $0x1c8] ss:$12 sps:$4 sm:$0xff]  }
 0x17b   :  { %1364 = vmatmul.mubr.bf16.gmra.mrb[64].mxu0 %v4090_v53  ;;  %3464 = vmatprep.subr.bf16.mxu1 %v1919_v57  ;;  %v4124_v53 = vld [vmem:[%s5054_s0 + $0x8] ss:$12 sps:$4 sm:$0xff]  }
 0x17c   :  { %3465 = vmatpush3.bf16.msra.mxu1 %v1911_v25  ;;  %1371 = vmatprep.mubr.bf16.mxu0 %v4091_v56 }
 0x17d   :  { %v3798_v58 = vpop.f32.mrb[68].mxu1  ;;  %3466 = vmatprep.subr.bf16.mxu1 %v1920_v54  ;;  %v4125_v54 = vld [vmem:[%s5054_s0 + $0x1e4] ss:$12 sps:$4 sm:$0xff]  }
 0x17e   :  { %v1800_v59 = vpop.f32.mrb[69].mxu1 }
 0x17f   :  { %v3799_v60 = vpop.f32.mrb[70].mxu1 }
 0x180   :  { %v1922_v62 = vpack.c.bf16 %v3799_v60, %v3798_v58  ;;  %v1803_v63 = vpop.f32.mrb[71].mxu1  ;;  %3467 = vmatpush3.bf16.msra.mxu1 %v1912_v22  ;;  %v4127_v58 = vld [vmem:[%s5054_s0 + $0x20] ss:$12 sps:$4 sm:$0xff]   ;;  %v4129_v60 = vld [vmem:[%s5054_s0 + $0x38] ss:$12 sps:$4 sm:$0xff]  }
 0x181   :  { %v1921_v1 = vpack.c.bf16 %v1803_v63, %v1800_v59  ;;  %v4128_v59 = vld [vmem:[%s5054_s0 + $0x1e0] ss:$12 sps:$4 sm:$0xff]   ;;  %v4133_v63 = vld [vmem:[%s5054_s0 + $0x1f8] ss:$12 sps:$4 sm:$0xff]  }
 0x183   :  { %1372 = vmatmul.mubr.bf16.gmra.mrb[68].mxu0 %v4093_v61  ;;  %3468 = vmatprep.subr.bf16.mxu1 %v1921_v1  ;;  %v4130_v61 = vld [vmem:[%s5054_s0 + $0x1fc] ss:$12 sps:$4 sm:$0xff]   ;;  %v4135_v1 = vld [vmem:[%s5054_s0 + $0x214] ss:$12 sps:$4 sm:$0xff]  }
 0x184   :  { %3469 = vmatpush3.bf16.msra.mxu1 %v1913_v33  ;;  %1379 = vmatprep.mubr.bf16.mxu0 %v4094_v0  ;;  %v4112_v33 = vld [vmem:[%s5054_s0 + $0x154] ss:$12 sps:$4 sm:$0xff]  }
 0x185   :  { %v3802_v2 = vpop.f32.mrb[72].mxu1  ;;  %3470 = vmatprep.subr.bf16.mxu1 %v1922_v62  ;;  %v4132_v62 = vld [vmem:[%s5054_s0 + $0x50] ss:$12 sps:$4 sm:$0xff]   ;;  %v4134_v0 = vld [vmem:[%s5054_s0 + $0x68] ss:$12 sps:$4 sm:$0xff]  }
 0x186   :  { %v1816_v3 = vpop.f32.mrb[73].mxu1 }
 0x187   :  { %v3803_v4 = vpop.f32.mrb[74].mxu1 }
 0x188   :  { %v1924_v6 = vpack.c.bf16 %v3803_v4, %v3802_v2  ;;  %v1819_v7 = vpop.f32.mrb[75].mxu1  ;;  %3471 = vmatpush3.bf16.msra.mxu1 %v1914_v30  ;;  %v4110_v30 = vld [vmem:[%s5054_s0 + $0x138] ss:$12 sps:$4 sm:$0xff]   ;;  %v4137_v2 = vld [vmem:[%s5054_s0 + $0x80] ss:$12 sps:$4 sm:$0xff]  }
 0x189   :  { %v1923_v9 = vpack.c.bf16 %v1819_v7, %v1816_v3  ;;  %v4138_v3 = vld [vmem:[%s5054_s0 + $0x210] ss:$12 sps:$4 sm:$0xff]   ;;  %v4139_v4 = vld [vmem:[%s5054_s0 + $0x98] ss:$12 sps:$4 sm:$0xff]   ;;  %v4143_v7 = vld [vmem:[%s5054_s0 + $0x228] ss:$12 sps:$4 sm:$0xff]  }
 0x18b   :  { %1380 = vmatmul.mubr.bf16.gmra.mrb[72].mxu0 %v4096_v5  ;;  %3472 = vmatprep.subr.bf16.mxu1 %v1923_v9  ;;  %v4140_v5 = vld [vmem:[%s5054_s0 + $0x22c] ss:$12 sps:$4 sm:$0xff]   ;;  %v4145_v9 = vld [vmem:[%s5054_s0 + $0x244] ss:$12 sps:$4 sm:$0xff]  }
 0x18c   :  { %3473 = vmatpush3.bf16.msra.mxu1 %v1915_v41  ;;  %1387 = vmatprep.mubr.bf16.mxu0 %v4097_v8  ;;  %v4117_v41 = vld [vmem:[%s5054_s0 + $0x1b0] ss:$12 sps:$4 sm:$0xff]   ;;  %v4144_v8 = vld [vmem:[%s5054_s0 + $0xc8] ss:$12 sps:$4 sm:$0xff]  }
 0x18d   :  { %v3806_v10 = vpop.f32.mrb[76].mxu1  ;;  %3474 = vmatprep.subr.bf16.mxu1 %v1924_v6  ;;  %v4142_v6 = vld [vmem:[%s5054_s0 + $0xb0] ss:$12 sps:$4 sm:$0xff]  }
 0x18e   :  { %v1832_v11 = vpop.f32.mrb[77].mxu1 }
 0x18f   :  { %v3807_v12 = vpop.f32.mrb[78].mxu1 }
 0x190   :  { %v1926_v14 = vpack.c.bf16 %v3807_v12, %v3806_v10  ;;  %v1835_v15 = vpop.f32.mrb[79].mxu1  ;;  %3475 = vmatpush3.bf16.msra.mxu1 %v1916_v38  ;;  %v4147_v10 = vld [vmem:[%s5054_s0 + $0xe0] ss:$12 sps:$4 sm:$0xff]   ;;  %v4149_v12 = vld [vmem:[%s5054_s0 + $0xf8] ss:$12 sps:$4 sm:$0xff]  }
 0x191   :  { %v1925_v17 = vpack.c.bf16 %v1835_v15, %v1832_v11  ;;  %v4148_v11 = vld [vmem:[%s5054_s0 + $0x240] ss:$12 sps:$4 sm:$0xff]   ;;  %v4153_v15 = vld [vmem:[%s5054_s0 + $0x258] ss:$12 sps:$4 sm:$0xff]  }
 0x193   :  { %1388 = vmatmul.mubr.bf16.gmra.mrb[76].mxu0 %v4099_v13  ;;  %3476 = vmatprep.subr.bf16.mxu1 %v1925_v17  ;;  %v4150_v13 = vld [vmem:[%s5054_s0 + $0x25c] ss:$12 sps:$4 sm:$0xff]   ;;  %v4155_v17 = vld [vmem:[%s5054_s0 + $0x274] ss:$12 sps:$4 sm:$0xff]  }
 0x194   :  { %3477 = vmatpush3.bf16.msra.mxu1 %v1917_v49  ;;  %1395 = vmatprep.mubr.bf16.mxu0 %v4100_v16  ;;  %v4154_v16 = vld [vmem:[%s5054_s0 + $0x128] ss:$12 sps:$4 sm:$0xff]  }
 0x195   :  { %3478 = vmatprep.subr.bf16.mxu1 %v1926_v14  ;;  %v3810_v18 = vpop.f32.mrb[80].mxu1  ;;  %v4152_v14 = vld [vmem:[%s5054_s0 + $0x110] ss:$12 sps:$4 sm:$0xff]  }
 0x196   :  { %v1848_v19 = vpop.f32.mrb[81].mxu1 }
 0x197   :  { %v3811_v22 = vpop.f32.mrb[82].mxu1 }
 0x198   :  { %3479 = vmatpush3.bf16.msra.mxu1 %v1918_v46  ;;  %v4614_v25 = vpack.c.bf16 %v3811_v22, %v3810_v18  ;;  %v1851_v26 = vpop.f32.mrb[83].mxu1  ;;  %v4157_v18 = vld [vmem:[%s5054_s0 + $0x140] ss:$12 sps:$4 sm:$0xff]   ;;  %v4162_v22 = vld [vmem:[%s5054_s0 + $0x170] ss:$12 sps:$4 sm:$0xff]  }
 0x199   :  { %v1927_v27 = vpack.c.bf16 %v1851_v26, %v1848_v19  ;;  %v4158_v19 = vld [vmem:[%s5054_s0 + $0x270] ss:$12 sps:$4 sm:$0xff]   ;;  %v4167_v26 = vld [vmem:[%s5054_s0 + $0x2a0] ss:$12 sps:$4 sm:$0xff]  }
 0x19b   :  { %1396 = vmatmul.mubr.bf16.gmra.mrb[80].mxu0 %v4105_v21  ;;  %2289 = vmatmul.mubr.bf16.vlgmr.msra.gmra.mrb[96].mxu1 %v4102_v20  ;;  %v4159_v20 = vld [vmem:[%s5054_s0 + $0x158] ss:$12 sps:$4 sm:$0xff]  }
 0x19c   :  { %1403 = vmatprep.mubr.bf16.mxu0 %v4106_v23  ;;  %2296 = vmatprep.mubr.bf16.mxu1 %v4108_v24  ;;  %v4160_v21 = vld [vmem:[%s5054_s0 + $0x28c] ss:$12 sps:$4 sm:$0xff]   ;;  %v4163_v23 = vld [vmem:[%s5054_s0 + $0x288] ss:$12 sps:$4 sm:$0xff]   ;;  %v4164_v24 = vld [vmem:[%s5054_s0 + $0x2a4] ss:$12 sps:$4 sm:$0xff]  }
 0x19d   :  { %3824 = vmatprep.subr.bf16.mxu0 %v1927_v27  ;;  %v3814_v28 = vpop.f32.mrb[84].mxu1 }
 0x19e   :  { %v1864_v29 = vpop.f32.mrb[85].mxu1 }
 0x19f   :  { %v3815_v32 = vpop.f32.mrb[86].mxu1 }
 0x1a0   :  { %v1930_v35 = vpack.c.bf16 %v3815_v32, %v3814_v28  ;;  %v1867_v36 = vpop.f32.mrb[87].mxu1  ;;  %v4169_v28 = vld [vmem:[%s5054_s0 + $0x2bc] ss:$12 sps:$4 sm:$0xff]   ;;  %v4174_v32 = vld [vmem:[%s5054_s0 + $0x2d4] ss:$12 sps:$4 sm:$0xff]  }
 0x1a1   :  { %v1929_v37 = vpack.c.bf16 %v1867_v36, %v1864_v29  ;;  %v4171_v29 = vld [vmem:[%s5054_s0 + $0x1b8] ss:$12 sps:$4 sm:$0xff]  }
 0x1a2   :  { %v4179_v36 = vld [vmem:[%s5054_s0 + $0x2ec] ss:$12 sps:$4 sm:$0xff]  }
 0x1a3   :  { %1404 = vmatmul.mubr.bf16.gmra.mrb[84].mxu0 %v4110_v30  ;;  %2297 = vmatmul.mubr.bf16.gmra.mrb[100].mxu1 %v4111_v31  ;;  %v4172_v30 = vld [vmem:[%s5054_s0 + $0x2b8] ss:$12 sps:$4 sm:$0xff]   ;;  %v4173_v31 = vld [vmem:[%s5054_s0 + $0x1d0] ss:$12 sps:$4 sm:$0xff]  }
 0x1a4   :  { %1411 = vmatprep.mubr.bf16.mxu0 %v4112_v33  ;;  %2304 = vmatprep.mubr.bf16.mxu1 %v4114_v34  ;;  %v4176_v33 = vld [vmem:[%s5054_s0 + $0x1e8] ss:$12 sps:$4 sm:$0xff]   ;;  %v4177_v34 = vld [vmem:[%s5054_s0 + $0x2d0] ss:$12 sps:$4 sm:$0xff]  }
 0x1a5   :  { %v3818_v38 = vpop.f32.mrb[88].mxu1 }
 0x1a6   :  { %v1880_v39 = vpop.f32.mrb[89].mxu1 }
 0x1a7   :  { %v3819_v42 = vpop.f32.mrb[90].mxu1 }
 0x1a8   :  { %v1932_v45 = vpack.c.bf16 %v3819_v42, %v3818_v38  ;;  %v1883_v46 = vpop.f32.mrb[91].mxu1  ;;  %v4184_v42 = vld [vmem:[%s5054_s0 + $0x248] ss:$12 sps:$4 sm:$0xff]  }
 0x1a9   :  { %v1931_v47 = vpack.c.bf16 %v1883_v46, %v1880_v39  ;;  %v4182_v39 = vld [vmem:[%s5054_s0 + $0x2e8] ss:$12 sps:$4 sm:$0xff]  }
 0x1ab   :  { %1412 = vmatmul.mubr.bf16.gmra.mrb[88].mxu0 %v4116_v40  ;;  %2305 = vmatmul.mubr.bf16.gmra.mrb[104].mxu1 %v4117_v41  ;;  %v4183_v40 = vld [vmem:[%s5054_s0 + $0x230] ss:$12 sps:$4 sm:$0xff]  }
 0x1ac   :  { %1419 = vmatprep.mubr.bf16.mxu0 %v4118_v43  ;;  %2312 = vmatprep.mubr.bf16.mxu1 %v4120_v44 }
 0x1ad   :  { %v3822_v48 = vpop.f32.mrb[92].mxu1 }
 0x1ae   :  { %v1896_v49 = vpop.f32.mrb[93].mxu1 }
 0x1af   :  { %v3823_v52 = vpop.f32.mrb[94].mxu1 }
 0x1b0   :  { %v1934_v55 = vpack.c.bf16 %v3823_v52, %v3822_v48  ;;  %v1899_v56 = vpop.f32.mrb[95].mxu1  ;;  %v4185_v48 = vld [vmem:[%s5054_s0 + $0x260] ss:$12 sps:$4 sm:$0xff]  }
 0x1b1   :  { %v1933_v57 = vpack.c.bf16 %v1899_v56, %v1896_v49  ;;  %v4187_v56 = vld [vmem:[%s5054_s0 + $0x290] ss:$12 sps:$4 sm:$0xff]  }
 0x1b3   :  { %1420 = vmatmul.mubr.bf16.gmra.mrb[92].mxu0 %v4122_v50  ;;  %2313 = vmatmul.mubr.bf16.gmra.mrb[108].mxu1 %v4123_v51  ;;  %v4186_v50 = vld [vmem:[%s5054_s0 + $0x278] ss:$12 sps:$4 sm:$0xff]  }
 0x1b4   :  { %3728 = vmatprep.mubr.bf16.mxu0 %v4124_v53  ;;  %2320 = vmatprep.mubr.bf16.mxu1 %v4125_v54 }
 0x1bb   :  { %3729 = vmatmul.mubr.bf16.vlgmr.msra.gmra.mrb[0].mxu0 %v4127_v58  ;;  %2321 = vmatmul.mubr.bf16.gmra.mrb[112].mxu1 %v4128_v59  ;;  %v4188_v58 = vld [vmem:[%s5054_s0 + $0x2a8] ss:$12 sps:$4 sm:$0xff]  }
 0x1bc   :  { %3732 = vmatprep.mubr.bf16.mxu0 %v4129_v60  ;;  %2328 = vmatprep.mubr.bf16.mxu1 %v4130_v61 }
 0x1bd   :  { %3825 = vmatpush3.bf16.msra.mxu0 %v1927_v27  ;;  %v4168_v27 = vld [vmem:[%s5054_s0 + $0x1a0] ss:$12 sps:$4 sm:$0xff]  }
 0x1be   :  { %3826 = vmatprep.subr.bf16.mxu0 %v4614_v25 }
 0x1c1   :  { %3827 = vmatpush3.bf16.msra.mxu0 %v4614_v25  ;;  %v4166_v25 = vld [vmem:[%s5054_s0 + $0x188] ss:$12 sps:$4 sm:$0xff]  }
 0x1c2   :  { %3828 = vmatprep.subr.bf16.mxu0 %v1929_v37 }
 0x1c3   :  { %3733 = vmatmul.mubr.bf16.gmra.mrb[4].mxu0 %v4132_v62  ;;  %2329 = vmatmul.mubr.bf16.gmra.mrb[116].mxu1 %v4133_v63 }
 0x1c4   :  { %3736 = vmatprep.mubr.bf16.mxu0 %v4134_v0  ;;  %2336 = vmatprep.mubr.bf16.mxu1 %v4135_v1  ;;  %v4189_v0 = vld [vmem:[%s5054_s0 + $0x2c0] ss:$12 sps:$4 sm:$0xff]  }
 0x1c5   :  { %3829 = vmatpush3.bf16.msra.mxu0 %v1929_v37  ;;  %v4181_v37 = vld [vmem:[%s5054_s0 + $0x218] ss:$12 sps:$4 sm:$0xff]  }
 0x1c6   :  { %3830 = vmatprep.subr.bf16.mxu0 %v1930_v35 }
 0x1c9   :  { %3831 = vmatpush3.bf16.msra.mxu0 %v1930_v35  ;;  %v4178_v35 = vld [vmem:[%s5054_s0 + $0x200] ss:$12 sps:$4 sm:$0xff]  }
 0x1ca   :  { %3832 = vmatprep.subr.bf16.mxu0 %v1931_v47 }
 0x1cb   :  { %3737 = vmatmul.mubr.bf16.gmra.mrb[8].mxu0 %v4137_v2  ;;  %2337 = vmatmul.mubr.bf16.gmra.mrb[120].mxu1 %v4138_v3  ;;  %v4190_v2 = vld [vmem:[%s5054_s0 + $0x2d8] ss:$12 sps:$4 sm:$0xff]  }
 0x1cc   :  { %3740 = vmatprep.mubr.bf16.mxu0 %v4139_v4  ;;  %2344 = vmatprep.mubr.bf16.mxu1 %v4140_v5 }
 0x1cd   :  { %3833 = vmatpush3.bf16.msra.mxu0 %v1931_v47 }
 0x1ce   :  { %3834 = vmatprep.subr.bf16.mxu0 %v1932_v45 }
 0x1d1   :  { %3835 = vmatpush3.bf16.msra.mxu0 %v1932_v45 }
 0x1d2   :  { %3836 = vmatprep.subr.bf16.mxu0 %v1933_v57 }
 0x1d3   :  { %3741 = vmatmul.mubr.bf16.gmra.mrb[12].mxu0 %v4142_v6  ;;  %2345 = vmatmul.mubr.bf16.gmra.mrb[124].mxu1 %v4143_v7 }
 0x1d4   :  { %3744 = vmatprep.mubr.bf16.mxu0 %v4144_v8  ;;  %2352 = vmatprep.mubr.bf16.mxu1 %v4145_v9  ;;  %v4191_v8 = vld [vmem:[%s5054_s0 + $0x2f0] ss:$12 sps:$4 sm:$0xff]  }
 0x1d5   :  { %3837 = vmatpush3.bf16.msra.mxu0 %v1933_v57 }
 0x1d6   :  { %3838 = vmatprep.subr.bf16.mxu0 %v1934_v55 }
 0x1d9   :  { %3839 = vmatpush3.bf16.msra.mxu0 %v1934_v55 }
 0x1db   :  { %3745 = vmatmul.mubr.bf16.gmra.mrb[16].mxu0 %v4147_v10  ;;  %2353 = vmatmul.mubr.bf16.gmra.mrb[128].mxu1 %v4148_v11 }
 0x1dc   :  { %3748 = vmatprep.mubr.bf16.mxu0 %v4149_v12  ;;  %2360 = vmatprep.mubr.bf16.mxu1 %v4150_v13 }
 0x1e3   :  { %3749 = vmatmul.mubr.bf16.gmra.mrb[20].mxu0 %v4152_v14  ;;  %2361 = vmatmul.mubr.bf16.gmra.mrb[132].mxu1 %v4153_v15 }
 0x1e4   :  { %3752 = vmatprep.mubr.bf16.mxu0 %v4154_v16  ;;  %2368 = vmatprep.mubr.bf16.mxu1 %v4155_v17 }
 0x1eb   :  { %3753 = vmatmul.mubr.bf16.gmra.mrb[24].mxu0 %v4157_v18  ;;  %2369 = vmatmul.mubr.bf16.gmra.mrb[136].mxu1 %v4158_v19 }
 0x1ec   :  { %3756 = vmatprep.mubr.bf16.mxu0 %v4159_v20  ;;  %2376 = vmatprep.mubr.bf16.mxu1 %v4160_v21 }
 0x1f3   :  { %3757 = vmatmul.mubr.bf16.gmra.mrb[28].mxu0 %v4162_v22  ;;  %2377 = vmatmul.mubr.bf16.gmra.mrb[140].mxu1 %v4163_v23 }
 0x1f4   :  { %2384 = vmatprep.mubr.bf16.mxu1 %v4164_v24  ;;  %3840 = vmatprep.mubr.bf16.mxu0 %v4166_v25 }
 0x1fb   :  { %2385 = vmatmul.mubr.bf16.gmra.mrb[144].mxu1 %v4167_v26  ;;  %3841 = vmatmul.mubr.bf16.vlgmr.msra.gmra.mrb[0].mxu0 %v4168_v27 }
 0x1fc   :  { %2392 = vmatprep.mubr.bf16.mxu1 %v4169_v28  ;;  %3844 = vmatprep.mubr.bf16.mxu0 %v4171_v29 }
 0x203   :  { %2393 = vmatmul.mubr.bf16.gmra.mrb[148].mxu1 %v4172_v30  ;;  %3845 = vmatmul.mubr.bf16.gmra.mrb[4].mxu0 %v4173_v31 }
 0x204   :  { %2400 = vmatprep.mubr.bf16.mxu1 %v4174_v32  ;;  %3848 = vmatprep.mubr.bf16.mxu0 %v4176_v33 }
 0x20b   :  { %2401 = vmatmul.mubr.bf16.gmra.mrb[152].mxu1 %v4177_v34  ;;  %3849 = vmatmul.mubr.bf16.gmra.mrb[8].mxu0 %v4178_v35 }
 0x20c   :  { %2408 = vmatprep.mubr.bf16.mxu1 %v4179_v36  ;;  %3852 = vmatprep.mubr.bf16.mxu0 %v4181_v37 }
 0x20e   :  { %v3312_v38 = vpop.f32.mrb[32].mxu0 }
 0x20f   :  { %v3313_v41 = vpop.f32.mrb[33].mxu0 }
 0x210   :  { %v4795_v43 = vadd.f32 %v3313_v41, %v3312_v38  ;;  %v3315_v44 = vpop.f32.mrb[34].mxu0 }
 0x211   :  { %v3316_v45 = vpop.f32.mrb[35].mxu0 }
 0x212   :  { %v4797_v46 = vadd.f32 %v3316_v45, %v3315_v44 }
 0x213   :  { %2409 = vmatmul.mubr.bf16.gmra.mrb[156].mxu1 %v4182_v39  ;;  %3853 = vmatmul.mubr.bf16.gmra.mrb[12].mxu0 %v4183_v40 }
 0x214   :  { %3856 = vmatprep.mubr.bf16.mxu0 %v4184_v42 }
 0x216   :  { %v3318_v47 = vpop.f32.mrb[36].mxu0 }
 0x217   :  { %v3319_v49 = vpop.f32.mrb[37].mxu0 }
 0x218   :  { %v4805_v51 = vadd.f32 %v3319_v49, %v3318_v47  ;;  %v3321_v52 = vpop.f32.mrb[38].mxu0 }
 0x219   :  { %v3322_v53 = vpop.f32.mrb[39].mxu0 }
 0x21a   :  { %v4807_v54 = vadd.f32 %v3322_v53, %v3321_v52 }
 0x21b   :  { %3857 = vmatmul.mubr.bf16.gmra.mrb[16].mxu0 %v4185_v48 }
 0x21c   :  { %3860 = vmatprep.mubr.bf16.mxu0 %v4186_v50 }
 0x21e   :  { %v3324_v55 = vpop.f32.mrb[40].mxu0 }
 0x21f   :  { %v3325_v57 = vpop.f32.mrb[41].mxu0 }
 0x220   :  { %v4815_v59 = vadd.f32 %v3325_v57, %v3324_v55  ;;  %v3327_v60 = vpop.f32.mrb[42].mxu0 }
 0x221   :  { %v3328_v61 = vpop.f32.mrb[43].mxu0 }
 0x222   :  { %v4817_v62 = vadd.f32 %v3328_v61, %v3327_v60 }
 0x223   :  { %3861 = vmatmul.mubr.bf16.gmra.mrb[20].mxu0 %v4187_v56 }
 0x224   :  { %3864 = vmatprep.mubr.bf16.mxu0 %v4188_v58 }
 0x226   :  { %v3330_v63 = vpop.f32.mrb[44].mxu0 }
 0x227   :  { %v3331_v1 = vpop.f32.mrb[45].mxu0 }
 0x228   :  { %v4825_v3 = vadd.f32 %v3331_v1, %v3330_v63  ;;  %v3333_v4 = vpop.f32.mrb[46].mxu0 }
 0x229   :  { %v3334_v5 = vpop.f32.mrb[47].mxu0 }
 0x22a   :  { %v4827_v6 = vadd.f32 %v3334_v5, %v3333_v4 }
 0x22b   :  { %3865 = vmatmul.mubr.bf16.gmra.mrb[24].mxu0 %v4189_v0 }
 0x22c   :  { %3868 = vmatprep.mubr.bf16.mxu0 %v4190_v2 }
 0x22e   :  { %v3336_v7 = vpop.f32.mrb[48].mxu0 }
 0x22f   :  { %v3337_v9 = vpop.f32.mrb[49].mxu0 }
 0x230   :  { %v4832_v10 = vadd.f32 %v3337_v9, %v3336_v7  ;;  %v3339_v11 = vpop.f32.mrb[50].mxu0 }
 0x231   :  { %v3340_v12 = vpop.f32.mrb[51].mxu0 }
 0x232   :  { %v4834_v13 = vadd.f32 %v3340_v12, %v3339_v11 }
 0x233   :  { %3869 = vmatmul.mubr.bf16.gmra.mrb[28].mxu0 %v4191_v8 }
 0x236   :  { %v3342_v14 = vpop.f32.mrb[52].mxu0 }
 0x237   :  { %v3343_v15 = vpop.f32.mrb[53].mxu0 }
 0x238   :  { %v4836_v16 = vadd.f32 %v3343_v15, %v3342_v14  ;;  %v3345_v17 = vpop.f32.mrb[54].mxu0 }
 0x239   :  { %v3346_v18 = vpop.f32.mrb[55].mxu0 }
 0x23a   :  { %v4838_v19 = vadd.f32 %v3346_v18, %v3345_v17 }
 0x23e   :  { %v3348_v20 = vpop.f32.mrb[56].mxu0 }
 0x23f   :  { %v3349_v21 = vpop.f32.mrb[57].mxu0 }
 0x240   :  { %v4840_v22 = vadd.f32 %v3349_v21, %v3348_v20  ;;  %v3351_v23 = vpop.f32.mrb[58].mxu0 }
 0x241   :  { %v3352_v24 = vpop.f32.mrb[59].mxu0 }
 0x242   :  { %v4842_v25 = vadd.f32 %v3352_v24, %v3351_v23 }
 0x246   :  { %v3354_v26 = vpop.f32.mrb[60].mxu0 }
 0x247   :  { %v3355_v27 = vpop.f32.mrb[61].mxu0 }
 0x248   :  { %v4844_v28 = vadd.f32 %v3355_v27, %v3354_v26  ;;  %v3357_v29 = vpop.f32.mrb[62].mxu0 }
 0x249   :  { %v3358_v30 = vpop.f32.mrb[63].mxu0 }
 0x24a   :  { %v4846_v31 = vadd.f32 %v3358_v30, %v3357_v29 }
 0x24e   :  { %v3360_v32 = vpop.f32.mrb[64].mxu0 }
 0x24f   :  { %v3361_v33 = vpop.f32.mrb[65].mxu0 }
 0x250   :  { %v4848_v34 = vadd.f32 %v3361_v33, %v3360_v32  ;;  %v3363_v35 = vpop.f32.mrb[66].mxu0 }
 0x251   :  { %v3364_v36 = vpop.f32.mrb[67].mxu0 }
 0x252   :  { %v4850_v37 = vadd.f32 %v3364_v36, %v3363_v35 }
 0x256   :  { %v3366_v38 = vpop.f32.mrb[68].mxu0 }
 0x257   :  { %v3367_v39 = vpop.f32.mrb[69].mxu0 }
 0x258   :  { %v4852_v40 = vadd.f32 %v3367_v39, %v3366_v38  ;;  %v3369_v41 = vpop.f32.mrb[70].mxu0 }
 0x259   :  { %v3370_v42 = vpop.f32.mrb[71].mxu0 }
 0x25a   :  { %v4854_v44 = vadd.f32 %v3370_v42, %v3369_v41 }
 0x25e   :  { %v3372_v45 = vpop.f32.mrb[72].mxu0 }
 0x25f   :  { %v3373_v47 = vpop.f32.mrb[73].mxu0 }
 0x260   :  { %v4856_v48 = vadd.f32 %v3373_v47, %v3372_v45  ;;  %v3375_v49 = vpop.f32.mrb[74].mxu0 }
 0x261   :  { %v3376_v50 = vpop.f32.mrb[75].mxu0 }
 0x262   :  { %v4858_v52 = vadd.f32 %v3376_v50, %v3375_v49 }
 0x266   :  { %v3378_v53 = vpop.f32.mrb[76].mxu0 }
 0x267   :  { %v3379_v55 = vpop.f32.mrb[77].mxu0 }
 0x268   :  { %v4860_v56 = vadd.f32 %v3379_v55, %v3378_v53  ;;  %v3381_v57 = vpop.f32.mrb[78].mxu0 }
 0x269   :  { %v3382_v58 = vpop.f32.mrb[79].mxu0 }
 0x26a   :  { %v4862_v60 = vadd.f32 %v3382_v58, %v3381_v57 }
 0x26e   :  { %v3480_v61 = vpop.f32.mrb[96].mxu1  ;;  %v3384_v63 = vpop.f32.mrb[80].mxu0 }
 0x26f   :  { %v3481_v0 = vpop.f32.mrb[97].mxu1  ;;  %v3385_v1 = vpop.f32.mrb[81].mxu0 }
 0x270   :  { %v3482_v2 = vadd.f32 %v3481_v0, %v3480_v61  ;;  %v3483_v4 = vpop.f32.mrb[98].mxu1  ;;  %v4864_v5 = vadd.f32 %v3385_v1, %v3384_v63  ;;  %v3387_v7 = vpop.f32.mrb[82].mxu0 }
 0x271   :  { %v3484_v8 = vpop.f32.mrb[99].mxu1  ;;  %v3388_v9 = vpop.f32.mrb[83].mxu0 }
 0x272   :  { %v3485_v11 = vadd.f32 %v3484_v8, %v3483_v4  ;;  %v4866_v12 = vadd.f32 %v3388_v9, %v3387_v7  ;;  %v4869_v14 = vadd.f32 %v3482_v2, %v4795_v43 }
 0x274   :  { %v4872_v15 = vadd.f32 %v3485_v11, %v4797_v46 }
 0x276   :  { %v3486_v17 = vpop.f32.mrb[100].mxu1  ;;  %v3390_v18 = vpop.f32.mrb[84].mxu0 }
 0x277   :  { %v3487_v20 = vpop.f32.mrb[101].mxu1  ;;  %v3391_v21 = vpop.f32.mrb[85].mxu0 }
 0x278   :  { %v3488_v23 = vadd.f32 %v3487_v20, %v3486_v17  ;;  %v3489_v24 = vpop.f32.mrb[102].mxu1  ;;  %v4874_v26 = vadd.f32 %v3391_v21, %v3390_v18  ;;  %v3393_v27 = vpop.f32.mrb[86].mxu0 }
 0x279   :  { %v3490_v29 = vpop.f32.mrb[103].mxu1  ;;  %v3394_v30 = vpop.f32.mrb[87].mxu0 }
 0x27a   :  { %v3491_v32 = vadd.f32 %v3490_v29, %v3489_v24  ;;  %v4876_v33 = vadd.f32 %v3394_v30, %v3393_v27  ;;  %v4879_v43 = vadd.f32 %v3488_v23, %v4805_v51 }
 0x27c   :  { %v4882_v46 = vadd.f32 %v3491_v32, %v4807_v54 }
 0x27e   :  { %v3492_v35 = vpop.f32.mrb[104].mxu1  ;;  %v3396_v36 = vpop.f32.mrb[88].mxu0 }
 0x27f   :  { %v3493_v38 = vpop.f32.mrb[105].mxu1  ;;  %v3397_v39 = vpop.f32.mrb[89].mxu0 }
 0x280   :  { %v3494_v41 = vadd.f32 %v3493_v38, %v3492_v35  ;;  %v3495_v42 = vpop.f32.mrb[106].mxu1  ;;  %v4884_v45 = vadd.f32 %v3397_v39, %v3396_v36  ;;  %v3399_v47 = vpop.f32.mrb[90].mxu0 }
 0x281   :  { %v3496_v49 = vpop.f32.mrb[107].mxu1  ;;  %v3400_v50 = vpop.f32.mrb[91].mxu0 }
 0x282   :  { %v3497_v53 = vadd.f32 %v3496_v49, %v3495_v42  ;;  %v4886_v55 = vadd.f32 %v3400_v50, %v3399_v47  ;;  %v4889_v51 = vadd.f32 %v3494_v41, %v4815_v59 }
 0x284   :  { %v4892_v54 = vadd.f32 %v3497_v53, %v4817_v62 }
 0x286   :  { %v3498_v57 = vpop.f32.mrb[108].mxu1  ;;  %v3402_v58 = vpop.f32.mrb[92].mxu0 }
 0x287   :  { %v3499_v61 = vpop.f32.mrb[109].mxu1  ;;  %v3403_v63 = vpop.f32.mrb[93].mxu0 }
 0x288   :  { %v3500_v0 = vadd.f32 %v3499_v61, %v3498_v57  ;;  %v3501_v1 = vpop.f32.mrb[110].mxu1  ;;  %v4894_v2 = vadd.f32 %v3403_v63, %v3402_v58  ;;  %v3405_v4 = vpop.f32.mrb[94].mxu0 }
 0x289   :  { %v3502_v7 = vpop.f32.mrb[111].mxu1  ;;  %v3406_v8 = vpop.f32.mrb[95].mxu0 }
 0x28a   :  { %v3503_v9 = vadd.f32 %v3502_v7, %v3501_v1  ;;  %v4896_v11 = vadd.f32 %v3406_v8, %v3405_v4  ;;  %v4899_v59 = vadd.f32 %v3500_v0, %v4825_v3 }
 0x28c   :  { %v4902_v62 = vadd.f32 %v3503_v9, %v4827_v6 }
 0x28e   :  { %v3504_v17 = vpop.f32.mrb[112].mxu1 }
 0x28f   :  { %v3505_v18 = vpop.f32.mrb[113].mxu1 }
 0x290   :  { %v3506_v20 = vadd.f32 %v3505_v18, %v3504_v17  ;;  %v3507_v21 = vpop.f32.mrb[114].mxu1 }
 0x291   :  { %v3508_v23 = vpop.f32.mrb[115].mxu1 }
 0x292   :  { %v3509_v24 = vadd.f32 %v3508_v23, %v3507_v21  ;;  %v4905_v27 = vadd.f32 %v3506_v20, %v4832_v10 }
 0x294   :  { %v4908_v29 = vadd.f32 %v3509_v24, %v4834_v13 }
 0x296   :  { %v3510_v30 = vpop.f32.mrb[116].mxu1 }
 0x297   :  { %v3511_v32 = vpop.f32.mrb[117].mxu1 }
 0x298   :  { %v3512_v35 = vadd.f32 %v3511_v32, %v3510_v30  ;;  %v3513_v3 = vpop.f32.mrb[118].mxu1 }
 0x299   :  { %v3514_v36 = vpop.f32.mrb[119].mxu1 }
 0x29a   :  { %v3515_v38 = vadd.f32 %v3514_v36, %v3513_v3  ;;  %v4911_v6 = vadd.f32 %v3512_v35, %v4836_v16 }
 0x29c   :  { %v4914_v39 = vadd.f32 %v3515_v38, %v4838_v19 }
 0x29e   :  { %v3516_v41 = vpop.f32.mrb[120].mxu1 }
 0x29f   :  { %v3517_v42 = vpop.f32.mrb[121].mxu1 }
 0x2a0   :  { %v3518_v47 = vadd.f32 %v3517_v42, %v3516_v41  ;;  %v3519_v10 = vpop.f32.mrb[122].mxu1 }
 0x2a1   :  { %v3520_v49 = vpop.f32.mrb[123].mxu1 }
 0x2a2   :  { %v3521_v50 = vadd.f32 %v3520_v49, %v3519_v10  ;;  %v4917_v13 = vadd.f32 %v3518_v47, %v4840_v22 }
 0x2a4   :  { %v4920_v53 = vadd.f32 %v3521_v50, %v4842_v25 }
 0x2a6   :  { %v3522_v57 = vpop.f32.mrb[124].mxu1 }
 0x2a7   :  { %v3523_v58 = vpop.f32.mrb[125].mxu1 }
 0x2a8   :  { %v3524_v61 = vadd.f32 %v3523_v58, %v3522_v57  ;;  %v3525_v16 = vpop.f32.mrb[126].mxu1 }
 0x2a9   :  { %v3526_v63 = vpop.f32.mrb[127].mxu1 }
 0x2aa   :  { %v3527_v0 = vadd.f32 %v3526_v63, %v3525_v16  ;;  %v4923_v19 = vadd.f32 %v3524_v61, %v4844_v28 }
 0x2ac   :  { %v4926_v1 = vadd.f32 %v3527_v0, %v4846_v31 }
 0x2ae   :  { %v3528_v4 = vpop.f32.mrb[128].mxu1 }
 0x2af   :  { %v3529_v7 = vpop.f32.mrb[129].mxu1 }
 0x2b0   :  { %v3530_v8 = vadd.f32 %v3529_v7, %v3528_v4  ;;  %v3531_v22 = vpop.f32.mrb[130].mxu1 }
 0x2b1   :  { %v3532_v9 = vpop.f32.mrb[131].mxu1 }
 0x2b2   :  { %v3533_v17 = vadd.f32 %v3532_v9, %v3531_v22  ;;  %v4929_v25 = vadd.f32 %v3530_v8, %v4848_v34 }
 0x2b4   :  { %v4932_v18 = vadd.f32 %v3533_v17, %v4850_v37 }
 0x2b6   :  { %v3534_v20 = vpop.f32.mrb[132].mxu1 }
 0x2b7   :  { %v3535_v21 = vpop.f32.mrb[133].mxu1 }
 0x2b8   :  { %v3536_v23 = vadd.f32 %v3535_v21, %v3534_v20  ;;  %v3537_v28 = vpop.f32.mrb[134].mxu1 }
 0x2b9   :  { %v3538_v24 = vpop.f32.mrb[135].mxu1 }
 0x2ba   :  { %v3539_v30 = vadd.f32 %v3538_v24, %v3537_v28  ;;  %v4935_v31 = vadd.f32 %v3536_v23, %v4852_v40 }
 0x2bc   :  { %v4938_v32 = vadd.f32 %v3539_v30, %v4854_v44 }
 0x2be   :  { %v3540_v35 = vpop.f32.mrb[136].mxu1 }
 0x2bf   :  { %v3541_v3 = vpop.f32.mrb[137].mxu1 }
 0x2c0   :  { %v3542_v36 = vadd.f32 %v3541_v3, %v3540_v35  ;;  %v3543_v34 = vpop.f32.mrb[138].mxu1 }
 0x2c1   :  { %v3544_v38 = vpop.f32.mrb[139].mxu1 }
 0x2c2   :  { %v3545_v41 = vadd.f32 %v3544_v38, %v3543_v34  ;;  %v4941_v37 = vadd.f32 %v3542_v36, %v4856_v48 }
 0x2c4   :  { %v4944_v42 = vadd.f32 %v3545_v41, %v4858_v52 }
 0x2c6   :  { %v3546_v47 = vpop.f32.mrb[140].mxu1 }
 0x2c7   :  { %v3547_v10 = vpop.f32.mrb[141].mxu1 }
 0x2c8   :  { %v3548_v49 = vadd.f32 %v3547_v10, %v3546_v47  ;;  %v3549_v40 = vpop.f32.mrb[142].mxu1 }
 0x2c9   :  { %v3550_v50 = vpop.f32.mrb[143].mxu1 }
 0x2ca   :  { %v3551_v57 = vadd.f32 %v3550_v50, %v3549_v40  ;;  %v4947_v44 = vadd.f32 %v3548_v49, %v4860_v56 }
 0x2cc   :  { %v4950_v58 = vadd.f32 %v3551_v57, %v4862_v60 }
 0x2ce   :  { %v3552_v61 = vpop.f32.mrb[144].mxu1  ;;  %v3842_v16 = vpop.f32.mrb[0].mxu0 }
 0x2cf   :  { %v3873_v48 = vadd.f32 %v4879_v43, %v3842_v16  ;;  %v3553_v63 = vpop.f32.mrb[145].mxu1  ;;  %v2451_v0 = vpop.f32.mrb[1].mxu0 }
 0x2d0   :  { %v3554_v52 = vadd.f32 %v3553_v63, %v3552_v61  ;;  %v3875_v4 = vadd.f32 %v4869_v14, %v2451_v0  ;;  %v3555_v7 = vpop.f32.mrb[146].mxu1  ;;  %v3843_v8 = vpop.f32.mrb[2].mxu0 }
 0x2d1   :  { %v3877_v22 = vadd.f32 %v4882_v46, %v3843_v8  ;;  %v3556_v9 = vpop.f32.mrb[147].mxu1  ;;  %v2454_v17 = vpop.f32.mrb[3].mxu0  ;;  %v2647_v21 = vmax.f32 %v3873_v48, 0.0 }
 0x2d2   :  { %v3557_v56 = vadd.f32 %v3556_v9, %v3555_v7  ;;  %v3879_v20 = vadd.f32 %v4872_v15, %v2454_v17  ;;  %v4957_v60 = vadd.f32 %v3554_v52, %v4864_v5  ;;  %v2645_v43 = vmax.f32 %v3875_v4, 0.0 }
 0x2d3   :  { %v2648_v23 = vmax.f32 %v3877_v22, 0.0 }
 0x2d4   :  { %v2646_v28 = vmax.f32 %v3879_v20, 0.0  ;;  %v4960_v24 = vadd.f32 %v3557_v56, %v4866_v12 }
 0x2d5   :  { %v3153_v14 = vpack.c.bf16 %v2648_v23, %v2647_v21 }
 0x2d6   :  { %v3148_v30 = vpack.c.bf16 %v2646_v28, %v2645_v43  ;;  %v3558_v35 = vpop.f32.mrb[148].mxu1  ;;  %v3846_v3 = vpop.f32.mrb[4].mxu0 }
 0x2d7   :  { %3225 = vst [vmem:[%s5055_s5 + $0x8] sm:$0xff] %v3153_v14   ;;  %v3881_v15 = vadd.f32 %v4899_v59, %v3846_v3  ;;  %v3559_v46 = vpop.f32.mrb[149].mxu1  ;;  %v2467_v5 = vpop.f32.mrb[5].mxu0 }
 0x2d8   :  { %3149 = vst [vmem:[%s5055_s5] sm:$0xff] %v3148_v30   ;;  %v3560_v36 = vadd.f32 %v3559_v46, %v3558_v35  ;;  %v3883_v12 = vadd.f32 %v4889_v51, %v2467_v5  ;;  %v3561_v34 = vpop.f32.mrb[150].mxu1  ;;  %v3847_v38 = vpop.f32.mrb[6].mxu0 }
 0x2d9   :  { %v3885_v41 = vadd.f32 %v4902_v62, %v3847_v38  ;;  %v3562_v47 = vpop.f32.mrb[151].mxu1  ;;  %v2470_v10 = vpop.f32.mrb[7].mxu0  ;;  %v2651_v50 = vmax.f32 %v3881_v15, 0.0 }
 0x2da   :  { %v3563_v49 = vadd.f32 %v3562_v47, %v3561_v34  ;;  %v3887_v40 = vadd.f32 %v4892_v54, %v2470_v10  ;;  %v4973_v59 = vadd.f32 %v3560_v36, %v4874_v26  ;;  %v2649_v61 = vmax.f32 %v3883_v12, 0.0 }
 0x2db   :  { %v2652_v57 = vmax.f32 %v3885_v41, 0.0 }
 0x2dc   :  { %v2650_v16 = vmax.f32 %v3887_v40, 0.0  ;;  %v4976_v48 = vadd.f32 %v3563_v49, %v4876_v33 }
 0x2dd   :  { %v3163_v51 = vpack.c.bf16 %v2652_v57, %v2651_v50 }
 0x2de   :  { %v3158_v63 = vpack.c.bf16 %v2650_v16, %v2649_v61  ;;  %v3564_v0 = vpop.f32.mrb[152].mxu1  ;;  %v3850_v52 = vpop.f32.mrb[8].mxu0 }
 0x2df   :  { %3227 = vst [vmem:[%s5055_s5 + $0x18] sm:$0xff] %v3163_v51   ;;  %v3889_v54 = vadd.f32 %v4911_v6, %v3850_v52  ;;  %v3565_v62 = vpop.f32.mrb[153].mxu1  ;;  %v2483_v26 = vpop.f32.mrb[9].mxu0 }
 0x2e0   :  { %3226 = vst [vmem:[%s5055_s5 + $0x10] sm:$0xff] %v3158_v63   ;;  %v3566_v4 = vadd.f32 %v3565_v62, %v3564_v0  ;;  %v3891_v33 = vadd.f32 %v4905_v27, %v2483_v26  ;;  %v3567_v7 = vpop.f32.mrb[154].mxu1  ;;  %v3851_v8 = vpop.f32.mrb[10].mxu0 }
 0x2e1   :  { %v3893_v22 = vadd.f32 %v4914_v39, %v3851_v8  ;;  %v3568_v9 = vpop.f32.mrb[155].mxu1  ;;  %v2486_v17 = vpop.f32.mrb[11].mxu0  ;;  %v2655_v21 = vmax.f32 %v3889_v54, 0.0 }
 0x2e2   :  { %v3569_v56 = vadd.f32 %v3568_v9, %v3567_v7  ;;  %v3895_v20 = vadd.f32 %v4908_v29, %v2486_v17  ;;  %v4989_v6 = vadd.f32 %v3566_v4, %v4884_v45  ;;  %v2653_v43 = vmax.f32 %v3891_v33, 0.0 }
 0x2e3   :  { %v2656_v23 = vmax.f32 %v3893_v22, 0.0 }
 0x2e4   :  { %v2654_v28 = vmax.f32 %v3895_v20, 0.0  ;;  %v4992_v14 = vadd.f32 %v3569_v56, %v4886_v55 }
 0x2e5   :  { %v3173_v27 = vpack.c.bf16 %v2656_v23, %v2655_v21 }
 0x2e6   :  { %v3168_v30 = vpack.c.bf16 %v2654_v28, %v2653_v43  ;;  %v3570_v35 = vpop.f32.mrb[156].mxu1  ;;  %v3854_v3 = vpop.f32.mrb[12].mxu0 }
 0x2e7   :  { %3229 = vst [vmem:[%s5055_s5 + $0x28] sm:$0xff] %v3173_v27   ;;  %v3897_v29 = vadd.f32 %v4923_v19, %v3854_v3  ;;  %v3571_v39 = vpop.f32.mrb[157].mxu1  ;;  %v2499_v45 = vpop.f32.mrb[13].mxu0 }
 0x2e8   :  { %3228 = vst [vmem:[%s5055_s5 + $0x20] sm:$0xff] %v3168_v30   ;;  %v3572_v15 = vadd.f32 %v3571_v39, %v3570_v35  ;;  %v3899_v55 = vadd.f32 %v4917_v13, %v2499_v45  ;;  %v3573_v46 = vpop.f32.mrb[158].mxu1  ;;  %v3855_v5 = vpop.f32.mrb[14].mxu0 }
 0x2e9   :  { %v3901_v36 = vadd.f32 %v4926_v1, %v3855_v5  ;;  %v3574_v12 = vpop.f32.mrb[159].mxu1  ;;  %v2502_v34 = vpop.f32.mrb[15].mxu0  ;;  %v2659_v47 = vmax.f32 %v3897_v29, 0.0 }
 0x2ea   :  { %v3575_v38 = vadd.f32 %v3574_v12, %v3573_v46  ;;  %v3903_v41 = vadd.f32 %v4920_v53, %v2502_v34  ;;  %v3928_v19 = vadd.f32 %v3572_v15, %v4894_v2  ;;  %v2657_v49 = vmax.f32 %v3899_v55, 0.0 }
 0x2eb   :  { %v2660_v10 = vmax.f32 %v3901_v36, 0.0 }
 0x2ec   :  { %v2658_v40 = vmax.f32 %v3903_v41, 0.0  ;;  %v3932_v50 = vadd.f32 %v3575_v38, %v4896_v11 }
 0x2ed   :  { %v3183_v57 = vpack.c.bf16 %v2660_v10, %v2659_v47 }
 0x2ee   :  { %v3178_v61 = vpack.c.bf16 %v2658_v40, %v2657_v49  ;;  %v3858_v13 = vpop.f32.mrb[16].mxu0 }
 0x2ef   :  { %3231 = vst [vmem:[%s5055_s5 + $0x38] sm:$0xff] %v3183_v57   ;;  %v3905_v1 = vadd.f32 %v4935_v31, %v3858_v13  ;;  %v2515_v16 = vpop.f32.mrb[17].mxu0 }
 0x2f0   :  { %3230 = vst [vmem:[%s5055_s5 + $0x30] sm:$0xff] %v3178_v61   ;;  %v3907_v2 = vadd.f32 %v4929_v25, %v2515_v16  ;;  %v3859_v53 = vpop.f32.mrb[18].mxu0 }
 0x2f1   :  { %v3909_v51 = vadd.f32 %v4938_v32, %v3859_v53  ;;  %v2518_v11 = vpop.f32.mrb[19].mxu0  ;;  %v2663_v0 = vmax.f32 %v3905_v1, 0.0 }
 0x2f2   :  { %v3911_v63 = vadd.f32 %v4932_v18, %v2518_v11  ;;  %v2661_v54 = vmax.f32 %v3907_v2, 0.0 }
 0x2f3   :  { %v2664_v52 = vmax.f32 %v3909_v51, 0.0 }
 0x2f4   :  { %v2662_v62 = vmax.f32 %v3911_v63, 0.0 }
 0x2f5   :  { %v3193_v26 = vpack.c.bf16 %v2664_v52, %v2663_v0 }
 0x2f6   :  { %v3188_v4 = vpack.c.bf16 %v2662_v62, %v2661_v54  ;;  %v3862_v31 = vpop.f32.mrb[20].mxu0 }
 0x2f7   :  { %3233 = vst [vmem:[%s5055_s5 + $0x48] sm:$0xff] %v3193_v26   ;;  %v3913_v33 = vadd.f32 %v4947_v44, %v3862_v31  ;;  %v2531_v25 = vpop.f32.mrb[21].mxu0 }
 0x2f8   :  { %3232 = vst [vmem:[%s5055_s5 + $0x40] sm:$0xff] %v3188_v4   ;;  %v3915_v18 = vadd.f32 %v4941_v37, %v2531_v25  ;;  %v3863_v32 = vpop.f32.mrb[22].mxu0 }
 0x2f9   :  { %v3917_v7 = vadd.f32 %v4950_v58, %v3863_v32  ;;  %v2534_v8 = vpop.f32.mrb[23].mxu0  ;;  %v2667_v9 = vmax.f32 %v3913_v33, 0.0 }
 0x2fa   :  { %v3919_v22 = vadd.f32 %v4944_v42, %v2534_v8  ;;  %v2665_v56 = vmax.f32 %v3915_v18, 0.0 }
 0x2fb   :  { %v2668_v17 = vmax.f32 %v3917_v7, 0.0 }
 0x2fc   :  { %v2666_v20 = vmax.f32 %v3919_v22, 0.0 }
 0x2fd   :  { %v3203_v21 = vpack.c.bf16 %v2668_v17, %v2667_v9 }
 0x2fe   :  { %v3198_v23 = vpack.c.bf16 %v2666_v20, %v2665_v56  ;;  %v3866_v44 = vpop.f32.mrb[24].mxu0 }
 0x2ff   :  { %3235 = vst [vmem:[%s5055_s5 + $0x58] sm:$0xff] %v3203_v21   ;;  %v3921_v43 = vadd.f32 %v4973_v59, %v3866_v44  ;;  %v2547_v37 = vpop.f32.mrb[25].mxu0 }
 0x300   :  { %3234 = vst [vmem:[%s5055_s5 + $0x50] sm:$0xff] %v3198_v23   ;;  %v3923_v42 = vadd.f32 %v4957_v60, %v2547_v37  ;;  %v3867_v58 = vpop.f32.mrb[26].mxu0 }
 0x301   :  { %v3925_v28 = vadd.f32 %v4976_v48, %v3867_v58  ;;  %v2550_v27 = vpop.f32.mrb[27].mxu0  ;;  %v2671_v35 = vmax.f32 %v3921_v43, 0.0 }
 0x302   :  { %v3927_v30 = vadd.f32 %v4960_v24, %v2550_v27  ;;  %v2669_v29 = vmax.f32 %v3923_v42, 0.0 }
 0x303   :  { %v2672_v3 = vmax.f32 %v3925_v28, 0.0 }
 0x304   :  { %v2670_v39 = vmax.f32 %v3927_v30, 0.0 }
 0x305   :  { %v3213_v45 = vpack.c.bf16 %v2672_v3, %v2671_v35 }
 0x306   :  { %v3208_v15 = vpack.c.bf16 %v2670_v39, %v2669_v29  ;;  %v3870_v59 = vpop.f32.mrb[28].mxu0 }
 0x307   :  { %3237 = vst [vmem:[%s5055_s5 + $0x68] sm:$0xff] %v3213_v45   ;;  %v3929_v55 = vadd.f32 %v3928_v19, %v3870_v59  ;;  %v2563_v46 = vpop.f32.mrb[29].mxu0 }
 0x308   :  { %3236 = vst [vmem:[%s5055_s5 + $0x60] sm:$0xff] %v3208_v15   ;;  %v3931_v60 = vadd.f32 %v4989_v6, %v2563_v46  ;;  %v3871_v24 = vpop.f32.mrb[30].mxu0 }
 0x309   :  { %v3933_v48 = vadd.f32 %v3932_v50, %v3871_v24  ;;  %v2566_v5 = vpop.f32.mrb[31].mxu0  ;;  %v2675_v12 = vmax.f32 %v3929_v55, 0.0 }
 0x30a   :  { %v3935_v36 = vadd.f32 %v4992_v14, %v2566_v5  ;;  %v2673_v38 = vmax.f32 %v3931_v60, 0.0 }
 0x30b   :  { %v2676_v34 = vmax.f32 %v3933_v48, 0.0 }
 0x30c   :  { %v2674_v41 = vmax.f32 %v3935_v36, 0.0 }
 0x30d   :  { %v3223_v47 = vpack.c.bf16 %v2676_v34, %v2675_v12 }
 0x30e   :  { %v3218_v10 = vpack.c.bf16 %v2674_v41, %v2673_v38 }
 0x30f   :  { %3239 = vst [vmem:[%s5055_s5 + $0x78] sm:$0xff] %v3223_v47  }
 0x310   :  { %3238 = vst [vmem:[%s5055_s5 + $0x70] sm:$0xff] %v3218_v10  }

// kernel: graph_matrix_completion_forward.13
= control target key start
LH: loop header
LB: loop body
LE: loop exit
PB: predicated region body
PF: predicated region fallthrough
CT: control target
= control target key end

     0   :  { %vm272_vm0 = vcmask 15360   ;;  %s585_s2 = inlined_call_operand.vmem [shape: bf16[128,2], index: 2, kind: input, shape index: {}]   ;;  %s586_s0 = inlined_call_operand.vmem [shape: bf16[128,128], index: 0, kind: input, shape index: {}]   ;;  %s587_s1 = inlined_call_operand.vmem [shape: bf16[128,128], index: 1, kind: input, shape index: {}]   ;;  %s588_s3 = inlined_call_operand.vmem [shape: f32[128,2], index: 3, kind: output, shape index: {}]  }
   0x1   :  { %v373_v0 = vld [vmem:[%s585_s2] sm:$0xff]   ;;  %v374_v1 = vld [vmem:[%s585_s2 + $0x8] sm:$0xff]   ;;  %v375_v2 = vld [vmem:[%s585_s2 + $0x10] sm:$0xff]  }
   0x2   :  { %325 = vmatprep.subr.bf16.mxu0 %v373_v0  ;;  %357 = vmatprep.subr.bf16.mxu1 %v373_v0  ;;  %v376_v3 = vld [vmem:[%s585_s2 + $0x18] sm:$0xff]   ;;  %v15_v4 = vld [vmem:[%s586_s0] sm:$0xf]  ;;  %v16_v5 = vld [vmem:[%s586_s0 + $0x4] sm:$0xf] }
   0x3   :  { %326 = vmatpush3.bf16.msra.mxu0 %v373_v0  ;;  %365 = vmatpush3.bf16.msra.mxu1 %v373_v0  ;;  %v31_v6 = vld [vmem:[%s587_s1] sm:$0xf]  ;;  %v32_v7 = vld [vmem:[%s587_s1 + $0x4] sm:$0xf]  ;;  %v378_v19 = vld [vmem:[%s585_s2 + $0x28] sm:$0xff]  }
   0x4   :  { %327 = vmatprep.subr.bf16.mxu0 %v374_v1  ;;  %358 = vmatprep.subr.bf16.mxu1 %v374_v1  ;;  %v47_v8 = vmul.bf16 %v31_v6, %v15_v4  ;;  %v23_v9 = vld [vmem:[%s586_s0 + $0x20] sm:$0xf]  ;;  %v24_v10 = vld [vmem:[%s586_s0 + $0x24] sm:$0xf]  ;;  %v48_v11 = vmul.bf16 %v32_v7, %v16_v5  ;;  %v379_v20 = vld [vmem:[%s585_s2 + $0x30] sm:$0xff]  }
   0x5   :  { %v39_v12 = vld [vmem:[%s587_s1 + $0x20] sm:$0xf]  ;;  %v40_v13 = vld [vmem:[%s587_s1 + $0x24] sm:$0xf]  ;;  %v17_v21 = vld [vmem:[%s586_s0 + $0x8] sm:$0xf] }
   0x6   :  { %v55_v14 = vmul.bf16 %v39_v12, %v23_v9  ;;  %v56_v15 = vmul.bf16 %v40_v13, %v24_v10  ;;  %v377_v16 = vld [vmem:[%s585_s2 + $0x20] sm:$0xff]   ;;  %v293_v17 = vcombine.low %v47_v8, %v48_v11  ;;  %v33_v22 = vld [vmem:[%s587_s1 + $0x8] sm:$0xf]  ;;  %v18_v23 = vld [vmem:[%s586_s0 + $0xc] sm:$0xf] }
   0x7   :  { %328 = vmatpush3.bf16.msra.mxu0 %v374_v1  ;;  %366 = vmatpush3.bf16.msra.mxu1 %v374_v1  ;;  %v34_v24 = vld [vmem:[%s587_s1 + $0xc] sm:$0xf]  ;;  %v25_v25 = vld [vmem:[%s586_s0 + $0x28] sm:$0xf]  ;;  %v380_v28 = vld [vmem:[%s585_s2 + $0x38] sm:$0xff]   ;;  %v49_v38 = vmul.bf16 %v33_v22, %v17_v21 }
   0x8   :  { %329 = vmatprep.subr.bf16.mxu0 %v375_v2  ;;  %359 = vmatprep.subr.bf16.mxu1 %v375_v2  ;;  %v297_v18 = vcombine.low %v55_v14, %v56_v15  ;;  %v26_v26 = vld [vmem:[%s586_s0 + $0x2c] sm:$0xf]  ;;  %v41_v27 = vld [vmem:[%s587_s1 + $0x28] sm:$0xf]  ;;  %v19_v30 = vld [vmem:[%s586_s0 + $0x10] sm:$0xf]  ;;  %v50_v39 = vmul.bf16 %v34_v24, %v18_v23 }
   0x9   :  { %341 = vmatprep.mubr.bf16.mxu0 %v293_v17  ;;  %v42_v29 = vld [vmem:[%s587_s1 + $0x2c] sm:$0xf]  ;;  %v20_v31 = vld [vmem:[%s586_s0 + $0x14] sm:$0xf]  ;;  %v35_v32 = vld [vmem:[%s587_s1 + $0x10] sm:$0xf]  ;;  %v57_v40 = vmul.bf16 %v41_v27, %v25_v25 }
   0xa   :  { %349 = vmatprep.mubr.bf16.mxu1 %v297_v18  ;;  %v36_v33 = vld [vmem:[%s587_s1 + $0x14] sm:$0xf]  ;;  %v27_v34 = vld [vmem:[%s586_s0 + $0x30] sm:$0xf]  ;;  %v58_v41 = vmul.bf16 %v42_v29, %v26_v26  ;;  %v51_v42 = vmul.bf16 %v35_v32, %v19_v30  ;;  %v21_v46 = vld [vmem:[%s586_s0 + $0x18] sm:$0xf]  ;;  %v294_v48 = vcombine.low %v49_v38, %v50_v39 }
   0xb   :  { %330 = vmatpush3.bf16.msra.mxu0 %v375_v2  ;;  %367 = vmatpush3.bf16.msra.mxu1 %v375_v2  ;;  %v28_v35 = vld [vmem:[%s586_s0 + $0x34] sm:$0xf]  ;;  %v43_v36 = vld [vmem:[%s587_s1 + $0x30] sm:$0xf]  ;;  %v52_v43 = vmul.bf16 %v36_v33, %v20_v31  ;;  %v22_v47 = vld [vmem:[%s586_s0 + $0x1c] sm:$0xf] }
   0xc   :  { %331 = vmatprep.subr.bf16.mxu0 %v376_v3  ;;  %360 = vmatprep.subr.bf16.mxu1 %v376_v3  ;;  %v44_v37 = vld [vmem:[%s587_s1 + $0x34] sm:$0xf]  ;;  %v59_v44 = vmul.bf16 %v43_v36, %v27_v34  ;;  %v298_v49 = vcombine.low %v57_v40, %v58_v41  ;;  %v37_v50 = vld [vmem:[%s587_s1 + $0x18] sm:$0xf]  ;;  %v38_v51 = vld [vmem:[%s587_s1 + $0x1c] sm:$0xf] }
   0xd   :  { %v60_v45 = vmul.bf16 %v44_v37, %v28_v35  ;;  %v29_v52 = vld [vmem:[%s586_s0 + $0x38] sm:$0xf]  ;;  %v295_v53 = vcombine.low %v51_v42, %v52_v43  ;;  %v30_v55 = vld [vmem:[%s586_s0 + $0x3c] sm:$0xf]  ;;  %v53_v58 = vmul.bf16 %v37_v50, %v21_v46  ;;  %v54_v59 = vmul.bf16 %v38_v51, %v22_v47 }
   0xe   :  { %v45_v56 = vld [vmem:[%s587_s1 + $0x38] sm:$0xf]  ;;  %v46_v57 = vld [vmem:[%s587_s1 + $0x3c] sm:$0xf] }
   0xf   :  { %332 = vmatpush3.bf16.msra.mxu0 %v376_v3  ;;  %368 = vmatpush3.bf16.msra.mxu1 %v376_v3  ;;  %v299_v54 = vcombine.low %v59_v44, %v60_v45  ;;  %v61_v60 = vmul.bf16 %v45_v56, %v29_v52  ;;  %v62_v61 = vmul.bf16 %v46_v57, %v30_v55 }
  0x10   :  { %333 = vmatprep.subr.bf16.mxu0 %v377_v16  ;;  %361 = vmatprep.subr.bf16.mxu1 %v377_v16  ;;  %v296_v62 = vcombine.low %v53_v58, %v54_v59 }
  0x11   :  { %v300_v63 = vcombine.low %v61_v60, %v62_v61 }
  0x13   :  { %334 = vmatpush3.bf16.msra.mxu0 %v377_v16  ;;  %369 = vmatpush3.bf16.msra.mxu1 %v377_v16 }
  0x14   :  { %335 = vmatprep.subr.bf16.mxu0 %v378_v19  ;;  %362 = vmatprep.subr.bf16.mxu1 %v378_v19 }
  0x17   :  { %336 = vmatpush3.bf16.msra.mxu0 %v378_v19  ;;  %370 = vmatpush3.bf16.msra.mxu1 %v378_v19 }
  0x18   :  { %337 = vmatprep.subr.bf16.mxu0 %v379_v20  ;;  %363 = vmatprep.subr.bf16.mxu1 %v379_v20 }
  0x1b   :  { %338 = vmatpush3.bf16.msra.mxu0 %v379_v20  ;;  %371 = vmatpush3.bf16.msra.mxu1 %v379_v20 }
  0x1c   :  { %339 = vmatprep.subr.bf16.mxu0 %v380_v28  ;;  %364 = vmatprep.subr.bf16.mxu1 %v380_v28 }
  0x1f   :  { %340 = vmatpush3.bf16.msra.mxu0 %v380_v28  ;;  %372 = vmatpush3.bf16.msra.mxu1 %v380_v28 }
  0x22   :  { %342 = vmatmul.mubr.bf16.vlgmr.msra.gmra.mrb[0].mxu0 %v294_v48  ;;  %350 = vmatmul.mubr.bf16.vlgmr.msra.gmra.mrb[0].mxu1 %v298_v49 }
  0x23   :  { %345 = vmatprep.mubr.bf16.mxu0 %v295_v53  ;;  %353 = vmatprep.mubr.bf16.mxu1 %v299_v54 }
  0x2a   :  { %346 = vmatmul.mubr.bf16.gmra.mrb[4].mxu0 %v296_v62  ;;  %354 = vmatmul.mubr.bf16.gmra.mrb[4].mxu1 %v300_v63 }
  0xf5   :  { %v343_v0 = vpop.f32.mrb[0].mxu0  ;;  %v351_v1 = vpop.f32.mrb[0].mxu1 }
  0xf6   :  { %275 = vst.msk [vmem:[%s588_s3 + $0x10] sm:$0xff] %vm272_vm0, %v343_v0  ;;  %283 = vst.msk [vmem:[%s588_s3 + $0x50] sm:$0xff] %vm272_vm0, %v351_v1  ;;  %v209_v2 = vpop.f32.mrb[1].mxu0  ;;  %v241_v3 = vpop.f32.mrb[1].mxu1 }
  0xf7   :  { %273 = vst.msk [vmem:[%s588_s3] sm:$0xff] %vm272_vm0, %v209_v2  ;;  %281 = vst.msk [vmem:[%s588_s3 + $0x40] sm:$0xff] %vm272_vm0, %v241_v3  ;;  %v344_v4 = vpop.f32.mrb[2].mxu0  ;;  %v352_v5 = vpop.f32.mrb[2].mxu1 }
  0xf8   :  { %276 = vst.msk [vmem:[%s588_s3 + $0x18] sm:$0xff] %vm272_vm0, %v344_v4  ;;  %284 = vst.msk [vmem:[%s588_s3 + $0x58] sm:$0xff] %vm272_vm0, %v352_v5  ;;  %v212_v6 = vpop.f32.mrb[3].mxu0  ;;  %v244_v7 = vpop.f32.mrb[3].mxu1 }
  0xf9   :  { %274 = vst.msk [vmem:[%s588_s3 + $0x8] sm:$0xff] %vm272_vm0, %v212_v6  ;;  %282 = vst.msk [vmem:[%s588_s3 + $0x48] sm:$0xff] %vm272_vm0, %v244_v7 }
  0xfd   :  { %v347_v8 = vpop.f32.mrb[4].mxu0  ;;  %v355_v9 = vpop.f32.mrb[4].mxu1 }
  0xfe   :  { %279 = vst.msk [vmem:[%s588_s3 + $0x30] sm:$0xff] %vm272_vm0, %v347_v8  ;;  %287 = vst.msk [vmem:[%s588_s3 + $0x70] sm:$0xff] %vm272_vm0, %v355_v9  ;;  %v225_v10 = vpop.f32.mrb[5].mxu0  ;;  %v257_v11 = vpop.f32.mrb[5].mxu1 }
  0xff   :  { %277 = vst.msk [vmem:[%s588_s3 + $0x20] sm:$0xff] %vm272_vm0, %v225_v10  ;;  %285 = vst.msk [vmem:[%s588_s3 + $0x60] sm:$0xff] %vm272_vm0, %v257_v11  ;;  %v348_v12 = vpop.f32.mrb[6].mxu0  ;;  %v356_v13 = vpop.f32.mrb[6].mxu1 }
 0x100   :  { %280 = vst.msk [vmem:[%s588_s3 + $0x38] sm:$0xff] %vm272_vm0, %v348_v12  ;;  %288 = vst.msk [vmem:[%s588_s3 + $0x78] sm:$0xff] %vm272_vm0, %v356_v13  ;;  %v228_v14 = vpop.f32.mrb[7].mxu0  ;;  %v260_v15 = vpop.f32.mrb[7].mxu1 }
 0x101   :  { %278 = vst.msk [vmem:[%s588_s3 + $0x28] sm:$0xff] %vm272_vm0, %v228_v14  ;;  %286 = vst.msk [vmem:[%s588_s3 + $0x68] sm:$0xff] %vm272_vm0, %v260_v15 }

</bundles_post_ra>
